<compile_context>
chip_gen: v5e
topology: v5e:2x2
jax: 0.10.0
libtpu: 0.0.40
codegen_flags: <defaults>
</compile_context>

<pallas_src>
import functools

import numpy as np
import jax
import jax.numpy as jnp
from jax import lax
from jax.experimental import pallas as pl
from jax.experimental.pallas import tpu as pltpu

DEPTH = [4, 8]
KSIZE = 5


# ---------------------------------------------------------------------------
# Kernel A: per-image conv1 -> pool -> ReLU -> conv2 -> pool -> ReLU -> flatten
# ---------------------------------------------------------------------------
def _feature_kernel(x_ref, w1_ref, b1_ref, w2_ref, b2_ref, s1_ref, s2_ref,
                    o_ref, pat1_ref, pat2_ref, *, H, W, C1, C2, K):
    f32 = jnp.float32
    P = K // 2
    H2, W2 = H // 2, W // 2
    L4 = (H2 // 2) * (W2 // 2)

    def im2col(a, Hc, Wc, n_cin, pat_ref):
        # a: (n_cin, Hc*Wc) activation, spatial flattened into the lane axis.
        # Writes row (kh*K + kw)*n_cin + ci of the patch matrix: the tap-shifted
        # (zero outside the image) copy of channel ci.  Rows are written once;
        # all accumulation happens later inside one MXU matmul.
        Lc = Hc * Wc
        zpad = jnp.zeros((n_cin, (P + 1) * Wc), f32)
        apad = jnp.concatenate([zpad, a, zpad], axis=-1)   # zero halo rows (flat)
        wpos = lax.broadcasted_iota(jnp.int32, (n_cin, Lc), 1) % Wc
        for kh in range(K):                                # taps fully unrolled
            for kw in range(K):
                dh, dw = kh - P, kw - P
                s = (dh + P + 1) * Wc + dw                 # static offset, >= 0
                win = apad[:, s:s + Lc]
                if dw != 0:                                # only w-border needs a mask
                    wv = wpos + dw
                    win = jnp.where((wv >= 0) & (wv < Wc), win, 0.0)
                pat_ref[pl.ds((kh * K + kw) * n_cin, n_cin), :] = win

    def pool2x2(c, Wc, sel):
        # c: (cout, Hc*Wc).  Two shifted maxes give the 2x2 block max anchored at
        # every (h, w); the one-hot matmul `sel` keeps only the even (h, w)
        # anchors (each column of sel has exactly one 1).
        cz = jnp.zeros((c.shape[0], 1), f32)
        zh = jnp.maximum(c, jnp.concatenate([c[:, 1:], cz], axis=-1))
        rz = jnp.zeros((c.shape[0], Wc), f32)
        zv = jnp.maximum(zh, jnp.concatenate([zh[:, Wc:], rz], axis=-1))
        return jnp.dot(zv, sel, preferred_element_type=f32)

    x = x_ref[0]                                                    # (1, H*W)

    # conv1: one (C1, 25) @ (25, H*W) MXU matmul.
    im2col(x, H, W, 1, pat1_ref)
    c1 = jnp.dot(w1_ref[...], pat1_ref[...], preferred_element_type=f32)
    # bias + ReLU applied after pooling: both commute exactly with max-pool and
    # run on the 4x smaller map.
    p1 = jnp.maximum(pool2x2(c1, W, s1_ref[...]) + b1_ref[...], 0.0)   # (C1, H2*W2)

    # conv2: one (C2, 25*C1) @ (25*C1, H2*W2) MXU matmul (channel contraction on MXU).
    im2col(p1, H2, W2, C1, pat2_ref)
    c2 = jnp.dot(w2_ref[...], pat2_ref[...], preferred_element_type=f32)
    p2 = jnp.maximum(pool2x2(c2, W2, s2_ref[...]) + b2_ref[...], 0.0)  # (C2, H4*W4)

    # flatten (C2, H4*W4) -> (1, C2*H4*W4) in torch NCHW-flatten order (c-major):
    # 8 small lane-offset stores into the 128-lane output block.
    for c in range(C2):
        o_ref[0, 0, pl.ds(c * L4, L4)] = p2[c, :]


# ---------------------------------------------------------------------------
# Kernel B: fc1 + ReLU -> [dropout = identity] -> fc2 -> log_softmax(dim=0)
# (grid-less: log_softmax over the batch axis needs every row)
# ---------------------------------------------------------------------------
def _head_kernel(feat_ref, wf1_ref, bf1_ref, wf2_ref, bf2_ref, o_ref):
    f32 = jnp.float32
    # fc1 + ReLU: a single (N, 128) @ (128, 512) MXU matmul (K = 128 exactly).
    h1 = jnp.maximum(
        jnp.dot(feat_ref[...], wf1_ref[...], preferred_element_type=f32)
        + bf1_ref[...], 0.0)
    # TODO(synk): F.dropout(training=True) is stochastic; implemented as identity (eval semantics).
    logits = jnp.dot(h1, wf2_ref[...], preferred_element_type=f32) + bf2_ref[...]
    # log_softmax over dim=0 (the batch axis), exactly as in the reference module.
    m = jnp.max(logits, axis=0, keepdims=True)
    lse = jnp.log(jnp.sum(jnp.exp(logits - m), axis=0, keepdims=True)) + m
    o_ref[...] = (logits - lse).astype(o_ref.dtype)


# ---------------------------------------------------------------------------
# Wrapper: parameter re-layout (tiny, parameter-side only) + the two pallas_calls
# ---------------------------------------------------------------------------
def convnet_forward(params, x):
    """Forward pass matching the PyTorch ConvNet; x is NCHW (N, 1, H, W)."""
    N, Cin, H, W = x.shape
    assert Cin == 1 and H % 4 == 0 and W % 4 == 0
    K = KSIZE
    C1 = params["conv1_w"].shape[0]
    C2 = params["conv2_w"].shape[0]
    H2, W2 = H // 2, W // 2
    H4, W4 = H2 // 2, W2 // 2
    L1, L2, L4 = H * W, H2 * W2, H4 * W4
    nh = params["fc1_w"].shape[1]
    nc = params["fc2_w"].shape[1]

    # Conv weights as (cout, tap*cin) matrices matching the patch-row order.
    w1 = params["conv1_w"].reshape(C1, K * K)                              # (C1, 25)
    w2 = jnp.transpose(params["conv2_w"], (0, 2, 3, 1)).reshape(C2, K * K * C1)
    b1 = params["conv1_b"].reshape(C1, 1)
    b2 = params["conv2_b"].reshape(C2, 1)
    wf1 = params["fc1_w"]                    # (C2*H4*W4, nh), torch flatten row order
    bf1 = params["fc1_b"].reshape(1, nh)
    wf2 = params["fc2_w"]                    # (nh, nc)
    bf2 = params["fc2_b"].reshape(1, nc)

    # One-hot max-pool compaction matrices (shape-derived compile-time constants).
    def pool_select(Hc, Wc):
        m = np.arange((Hc // 2) * (Wc // 2))
        src = 2 * (m // (Wc // 2)) * Wc + 2 * (m % (Wc // 2))
        return jnp.asarray(
            (np.arange(Hc * Wc)[:, None] == src[None, :]).astype(np.float32))

    s1 = pool_select(H, W)                   # (L1, L2)
    s2 = pool_select(H2, W2)                 # (L2, L4)

    # Activations live as (image, channel, flattened spatial): lane axis = H*W.
    x_flat = x.reshape(N, 1, L1)

    feat = pl.pallas_call(
        functools.partial(_feature_kernel, H=H, W=W, C1=C1, C2=C2, K=K),
        out_shape=jax.ShapeDtypeStruct((N, 1, C2 * L4), jnp.float32),
        grid_spec=pltpu.PrefetchScalarGridSpec(
            num_scalar_prefetch=0,
            grid=(N,),                                   # one image per program
            in_specs=[
                pl.BlockSpec((1, 1, L1), lambda n: (n, 0, 0)),
                pl.BlockSpec((C1, K * K), lambda n: (0, 0)),
                pl.BlockSpec((C1, 1), lambda n: (0, 0)),
                pl.BlockSpec((C2, K * K * C1), lambda n: (0, 0)),
                pl.BlockSpec((C2, 1), lambda n: (0, 0)),
                pl.BlockSpec((L1, L2), lambda n: (0, 0)),
                pl.BlockSpec((L2, L4), lambda n: (0, 0)),
            ],
            out_specs=pl.BlockSpec((1, 1, C2 * L4), lambda n: (n, 0, 0)),
            scratch_shapes=[
                pltpu.VMEM((K * K, L1), jnp.float32),        # conv1 patch matrix
                pltpu.VMEM((K * K * C1, L2), jnp.float32),   # conv2 patch matrix
            ]),
        compiler_params=pltpu.CompilerParams(
            dimension_semantics=("parallel",)),          # v7x: split batch over 2 TCs
    )(x_flat, w1, b1, w2, b2, s1, s2)

    # (N, 1, 128) -> (N, 128): contiguous metadata reshape between the two calls.
    feat = feat.reshape(N, C2 * L4)

    return pl.pallas_call(
        _head_kernel,
        out_shape=jax.ShapeDtypeStruct((N, nc), jnp.float32),
        in_specs=[pl.BlockSpec(memory_space=pltpu.MemorySpace.VMEM)] * 5,
        out_specs=pl.BlockSpec(memory_space=pltpu.MemorySpace.VMEM),
    )(feat, wf1, bf1, wf2, bf2)


# ---------------------------------------------------------------------------
# Parameter init mirroring the PyTorch layer shapes
# ---------------------------------------------------------------------------
def init_params(image_size, num_classes, key):
    ks = jax.random.split(key, 8)

    def u(k, shape, fan_in):
        bound = 1.0 / jnp.sqrt(jnp.float32(fan_in))
        return jax.random.uniform(k, shape, jnp.float32, -bound, bound)

    fc1_in = (image_size // 4) * (image_size // 4) * DEPTH[1]
    return {
        "conv1_w": u(ks[0], (DEPTH[0], 1, 5, 5), 1 * 5 * 5),
        "conv1_b": u(ks[1], (DEPTH[0],), 1 * 5 * 5),
        "conv2_w": u(ks[2], (DEPTH[1], DEPTH[0], 5, 5), DEPTH[0] * 5 * 5),
        "conv2_b": u(ks[3], (DEPTH[1],), DEPTH[0] * 5 * 5),
        "fc1_w": u(ks[4], (fc1_in, 512), fc1_in),   # (in, out), torch flatten row order
        "fc1_b": u(ks[5], (512,), fc1_in),
        "fc2_w": u(ks[6], (512, num_classes), 512),
        "fc2_b": u(ks[7], (num_classes,), 512),
    }


if __name__ == "__main__":
    image_size = 16
    num_classes = 10
    batch = 2

    key = jax.random.PRNGKey(0)
    kp, kx = jax.random.split(key)
    params = init_params(image_size, num_classes, kp)
    x = jax.random.normal(kx, (batch, 1, image_size, image_size), jnp.float32)

    out = jax.jit(convnet_forward)(params, x)
    out = jax.block_until_ready(out)
    assert out.shape == (batch, num_classes)
    assert bool(jnp.all(jnp.isfinite(out)))
    print("KERNEL_OK")
</pallas_src>

<mosaic_0001>
module attributes {stable_mosaic.version = 11 : i64} {
  func.func @_feature_kernel(%arg0: i32, %arg1: memref<1x1x256xf32, #tpu.memory_space<vmem>>, %arg2: memref<4x25xf32, #tpu.memory_space<vmem>>, %arg3: memref<4x1xf32, #tpu.memory_space<vmem>>, %arg4: memref<8x100xf32, #tpu.memory_space<vmem>>, %arg5: memref<8x1xf32, #tpu.memory_space<vmem>>, %arg6: memref<256x64xf32, #tpu.memory_space<vmem>>, %arg7: memref<64x16xf32, #tpu.memory_space<vmem>>, %arg8: memref<1x1x128xf32, #tpu.memory_space<vmem>>, %arg9: memref<25x256xf32, #tpu.memory_space<vmem>>, %arg10: memref<100x64xf32, #tpu.memory_space<vmem>>) attributes {dimension_semantics = [#tpu.dimension_semantics<parallel>], iteration_bounds = array<i64: 2>, scalar_prefetch = 0 : i64, scratch_operands = 2 : i64, tpu.core_type = #tpu.core_type<tc>, window_params = [{transform_indices = @transform_0, window_bounds = array<i64: 1, 1, 256>}, {pipeline_mode = #tpu.pipeline_mode<synchronous>, transform_indices = @transform_1, window_bounds = array<i64: 4, 25>}, {pipeline_mode = #tpu.pipeline_mode<synchronous>, transform_indices = @transform_2, window_bounds = array<i64: 4, 1>}, {pipeline_mode = #tpu.pipeline_mode<synchronous>, transform_indices = @transform_3, window_bounds = array<i64: 8, 100>}, {pipeline_mode = #tpu.pipeline_mode<synchronous>, transform_indices = @transform_4, window_bounds = array<i64: 8, 1>}, {pipeline_mode = #tpu.pipeline_mode<synchronous>, transform_indices = @transform_5, window_bounds = array<i64: 256, 64>}, {pipeline_mode = #tpu.pipeline_mode<synchronous>, transform_indices = @transform_6, window_bounds = array<i64: 64, 16>}, {transform_indices = @transform_7, window_bounds = array<i64: 1, 1, 128>}]} {
    %c0 = arith.constant 0 : index
    %c0_0 = arith.constant 0 : index
    %c0_1 = arith.constant 0 : index
    %0 = vector.load %arg1[%c0, %c0_0, %c0_1] : memref<1x1x256xf32, #tpu.memory_space<vmem>>, vector<1x1x256xf32>
    %1 = vector.shape_cast %0 : vector<1x1x256xf32> to vector<1x256xf32>
    %cst = arith.constant 0.000000e+00 : f32
    %2 = vector.broadcast %cst : f32 to vector<1x48xf32>
    %3 = tpu.concatenate %2, %1, %2 in 1 : vector<1x48xf32>, vector<1x256xf32>, vector<1x48xf32> -> vector<1x352xf32>
    %4 = tpu.iota {dimensions = array<i32: 1>} : vector<1x256xi32>
    %c16_i32 = arith.constant 16 : i32
    %c0_i32 = arith.constant 0 : i32
    %5 = arith.cmpi eq, %c16_i32, %c0_i32 : i32
    %c1_i32 = arith.constant 1 : i32
    %6 = arith.select %5, %c1_i32, %c16_i32 : i32
    %7 = vector.broadcast %6 : i32 to vector<1x256xi32>
    %8 = arith.remsi %4, %7 : vector<1x256xi32>
    %c0_i32_2 = arith.constant 0 : i32
    %9 = vector.broadcast %c0_i32_2 : i32 to vector<1x256xi32>
    %10 = arith.cmpi ne, %8, %9 : vector<1x256xi32>
    %c0_i32_3 = arith.constant 0 : i32
    %11 = vector.broadcast %c0_i32_3 : i32 to vector<1x256xi32>
    %12 = arith.cmpi slt, %8, %11 : vector<1x256xi32>
    %c0_i32_4 = arith.constant 0 : i32
    %13 = arith.cmpi slt, %6, %c0_i32_4 : i32
    %14 = vector.broadcast %13 : i1 to vector<1x256xi1>
    %15 = vector.broadcast %14 : vector<1x256xi1> to vector<1x256xi1>
    %16 = arith.xori %12, %15 : vector<1x256xi1>
    %17 = arith.andi %16, %10 : vector<1x256xi1>
    %18 = vector.broadcast %6 : i32 to vector<1x256xi32>
    %19 = arith.addi %8, %18 : vector<1x256xi32>
    %20 = arith.select %17, %19, %8 : vector<1x256xi1>, vector<1x256xi32>
    %21 = vector.extract_strided_slice %3 {offsets = [0, 14], sizes = [1, 256], strides = [1, 1]} : vector<1x352xf32> to vector<1x256xf32>
    %c-2_i32 = arith.constant -2 : i32
    %22 = vector.broadcast %c-2_i32 : i32 to vector<1x256xi32>
    %23 = arith.addi %20, %22 : vector<1x256xi32>
    %c0_i32_5 = arith.constant 0 : i32
    %24 = vector.broadcast %c0_i32_5 : i32 to vector<1x256xi32>
    %25 = arith.cmpi sge, %23, %24 : vector<1x256xi32>
    %c16_i32_6 = arith.constant 16 : i32
    %26 = vector.broadcast %c16_i32_6 : i32 to vector<1x256xi32>
    %27 = arith.cmpi slt, %23, %26 : vector<1x256xi32>
    %28 = arith.andi %25, %27 : vector<1x256xi1>
    %cst_7 = arith.constant 0.000000e+00 : f32
    %29 = vector.broadcast %cst_7 : f32 to vector<1x256xf32>
    %30 = arith.select %28, %21, %29 : vector<1x256xi1>, vector<1x256xf32>
    %c0_8 = arith.constant 0 : index
    %c0_9 = arith.constant 0 : index
    %31 = vector.load %arg9[%c0_8, %c0_9] : memref<25x256xf32, #tpu.memory_space<vmem>>, vector<1x256xf32>
    tpu.vector_store %arg9[%c0_8, %c0_9], %30 {strides = array<i32>} : memref<25x256xf32, #tpu.memory_space<vmem>>, vector<1x256xf32>,
    %32 = vector.extract_strided_slice %3 {offsets = [0, 15], sizes = [1, 256], strides = [1, 1]} : vector<1x352xf32> to vector<1x256xf32>
    %c-1_i32 = arith.constant -1 : i32
    %33 = vector.broadcast %c-1_i32 : i32 to vector<1x256xi32>
    %34 = arith.addi %20, %33 : vector<1x256xi32>
    %c0_i32_10 = arith.constant 0 : i32
    %35 = vector.broadcast %c0_i32_10 : i32 to vector<1x256xi32>
    %36 = arith.cmpi sge, %34, %35 : vector<1x256xi32>
    %c16_i32_11 = arith.constant 16 : i32
    %37 = vector.broadcast %c16_i32_11 : i32 to vector<1x256xi32>
    %38 = arith.cmpi slt, %34, %37 : vector<1x256xi32>
    %39 = arith.andi %36, %38 : vector<1x256xi1>
    %cst_12 = arith.constant 0.000000e+00 : f32
    %40 = vector.broadcast %cst_12 : f32 to vector<1x256xf32>
    %41 = arith.select %39, %32, %40 : vector<1x256xi1>, vector<1x256xf32>
    %c1 = arith.constant 1 : index
    %c0_13 = arith.constant 0 : index
    %42 = vector.load %arg9[%c1, %c0_13] : memref<25x256xf32, #tpu.memory_space<vmem>>, vector<1x256xf32>
    tpu.vector_store %arg9[%c1, %c0_13], %41 {strides = array<i32>} : memref<25x256xf32, #tpu.memory_space<vmem>>, vector<1x256xf32>,
    %43 = vector.extract_strided_slice %3 {offsets = [0, 16], sizes = [1, 256], strides = [1, 1]} : vector<1x352xf32> to vector<1x256xf32>
    %c2 = arith.constant 2 : index
    %c0_14 = arith.constant 0 : index
    %44 = vector.load %arg9[%c2, %c0_14] : memref<25x256xf32, #tpu.memory_space<vmem>>, vector<1x256xf32>
    tpu.vector_store %arg9[%c2, %c0_14], %43 {strides = array<i32>} : memref<25x256xf32, #tpu.memory_space<vmem>>, vector<1x256xf32>,
    %45 = vector.extract_strided_slice %3 {offsets = [0, 17], sizes = [1, 256], strides = [1, 1]} : vector<1x352xf32> to vector<1x256xf32>
    %c1_i32_15 = arith.constant 1 : i32
    %46 = vector.broadcast %c1_i32_15 : i32 to vector<1x256xi32>
    %47 = arith.addi %20, %46 : vector<1x256xi32>
    %c0_i32_16 = arith.constant 0 : i32
    %48 = vector.broadcast %c0_i32_16 : i32 to vector<1x256xi32>
    %49 = arith.cmpi sge, %47, %48 : vector<1x256xi32>
    %c16_i32_17 = arith.constant 16 : i32
    %50 = vector.broadcast %c16_i32_17 : i32 to vector<1x256xi32>
    %51 = arith.cmpi slt, %47, %50 : vector<1x256xi32>
    %52 = arith.andi %49, %51 : vector<1x256xi1>
    %cst_18 = arith.constant 0.000000e+00 : f32
    %53 = vector.broadcast %cst_18 : f32 to vector<1x256xf32>
    %54 = arith.select %52, %45, %53 : vector<1x256xi1>, vector<1x256xf32>
    %c3 = arith.constant 3 : index
    %c0_19 = arith.constant 0 : index
    %55 = vector.load %arg9[%c3, %c0_19] : memref<25x256xf32, #tpu.memory_space<vmem>>, vector<1x256xf32>
    tpu.vector_store %arg9[%c3, %c0_19], %54 {strides = array<i32>} : memref<25x256xf32, #tpu.memory_space<vmem>>, vector<1x256xf32>,
    %56 = vector.extract_strided_slice %3 {offsets = [0, 18], sizes = [1, 256], strides = [1, 1]} : vector<1x352xf32> to vector<1x256xf32>
    %c2_i32 = arith.constant 2 : i32
    %57 = vector.broadcast %c2_i32 : i32 to vector<1x256xi32>
    %58 = arith.addi %20, %57 : vector<1x256xi32>
    %c0_i32_20 = arith.constant 0 : i32
    %59 = vector.broadcast %c0_i32_20 : i32 to vector<1x256xi32>
    %60 = arith.cmpi sge, %58, %59 : vector<1x256xi32>
    %c16_i32_21 = arith.constant 16 : i32
    %61 = vector.broadcast %c16_i32_21 : i32 to vector<1x256xi32>
    %62 = arith.cmpi slt, %58, %61 : vector<1x256xi32>
    %63 = arith.andi %60, %62 : vector<1x256xi1>
    %cst_22 = arith.constant 0.000000e+00 : f32
    %64 = vector.broadcast %cst_22 : f32 to vector<1x256xf32>
    %65 = arith.select %63, %56, %64 : vector<1x256xi1>, vector<1x256xf32>
    %c4 = arith.constant 4 : index
    %c0_23 = arith.constant 0 : index
    %66 = vector.load %arg9[%c4, %c0_23] : memref<25x256xf32, #tpu.memory_space<vmem>>, vector<1x256xf32>
    tpu.vector_store %arg9[%c4, %c0_23], %65 {strides = array<i32>} : memref<25x256xf32, #tpu.memory_space<vmem>>, vector<1x256xf32>,
    %67 = vector.extract_strided_slice %3 {offsets = [0, 30], sizes = [1, 256], strides = [1, 1]} : vector<1x352xf32> to vector<1x256xf32>
    %c-2_i32_24 = arith.constant -2 : i32
    %68 = vector.broadcast %c-2_i32_24 : i32 to vector<1x256xi32>
    %69 = arith.addi %20, %68 : vector<1x256xi32>
    %c0_i32_25 = arith.constant 0 : i32
    %70 = vector.broadcast %c0_i32_25 : i32 to vector<1x256xi32>
    %71 = arith.cmpi sge, %69, %70 : vector<1x256xi32>
    %c16_i32_26 = arith.constant 16 : i32
    %72 = vector.broadcast %c16_i32_26 : i32 to vector<1x256xi32>
    %73 = arith.cmpi slt, %69, %72 : vector<1x256xi32>
    %74 = arith.andi %71, %73 : vector<1x256xi1>
    %cst_27 = arith.constant 0.000000e+00 : f32
    %75 = vector.broadcast %cst_27 : f32 to vector<1x256xf32>
    %76 = arith.select %74, %67, %75 : vector<1x256xi1>, vector<1x256xf32>
    %c5 = arith.constant 5 : index
    %c0_28 = arith.constant 0 : index
    %77 = vector.load %arg9[%c5, %c0_28] : memref<25x256xf32, #tpu.memory_space<vmem>>, vector<1x256xf32>
    tpu.vector_store %arg9[%c5, %c0_28], %76 {strides = array<i32>} : memref<25x256xf32, #tpu.memory_space<vmem>>, vector<1x256xf32>,
    %78 = vector.extract_strided_slice %3 {offsets = [0, 31], sizes = [1, 256], strides = [1, 1]} : vector<1x352xf32> to vector<1x256xf32>
    %c-1_i32_29 = arith.constant -1 : i32
    %79 = vector.broadcast %c-1_i32_29 : i32 to vector<1x256xi32>
    %80 = arith.addi %20, %79 : vector<1x256xi32>
    %c0_i32_30 = arith.constant 0 : i32
    %81 = vector.broadcast %c0_i32_30 : i32 to vector<1x256xi32>
    %82 = arith.cmpi sge, %80, %81 : vector<1x256xi32>
    %c16_i32_31 = arith.constant 16 : i32
    %83 = vector.broadcast %c16_i32_31 : i32 to vector<1x256xi32>
    %84 = arith.cmpi slt, %80, %83 : vector<1x256xi32>
    %85 = arith.andi %82, %84 : vector<1x256xi1>
    %cst_32 = arith.constant 0.000000e+00 : f32
    %86 = vector.broadcast %cst_32 : f32 to vector<1x256xf32>
    %87 = arith.select %85, %78, %86 : vector<1x256xi1>, vector<1x256xf32>
    %c6 = arith.constant 6 : index
    %c0_33 = arith.constant 0 : index
    %88 = vector.load %arg9[%c6, %c0_33] : memref<25x256xf32, #tpu.memory_space<vmem>>, vector<1x256xf32>
    tpu.vector_store %arg9[%c6, %c0_33], %87 {strides = array<i32>} : memref<25x256xf32, #tpu.memory_space<vmem>>, vector<1x256xf32>,
    %89 = vector.extract_strided_slice %3 {offsets = [0, 32], sizes = [1, 256], strides = [1, 1]} : vector<1x352xf32> to vector<1x256xf32>
    %c7 = arith.constant 7 : index
    %c0_34 = arith.constant 0 : index
    %90 = vector.load %arg9[%c7, %c0_34] : memref<25x256xf32, #tpu.memory_space<vmem>>, vector<1x256xf32>
    tpu.vector_store %arg9[%c7, %c0_34], %89 {strides = array<i32>} : memref<25x256xf32, #tpu.memory_space<vmem>>, vector<1x256xf32>,
    %91 = vector.extract_strided_slice %3 {offsets = [0, 33], sizes = [1, 256], strides = [1, 1]} : vector<1x352xf32> to vector<1x256xf32>
    %c1_i32_35 = arith.constant 1 : i32
    %92 = vector.broadcast %c1_i32_35 : i32 to vector<1x256xi32>
    %93 = arith.addi %20, %92 : vector<1x256xi32>
    %c0_i32_36 = arith.constant 0 : i32
    %94 = vector.broadcast %c0_i32_36 : i32 to vector<1x256xi32>
    %95 = arith.cmpi sge, %93, %94 : vector<1x256xi32>
    %c16_i32_37 = arith.constant 16 : i32
    %96 = vector.broadcast %c16_i32_37 : i32 to vector<1x256xi32>
    %97 = arith.cmpi slt, %93, %96 : vector<1x256xi32>
    %98 = arith.andi %95, %97 : vector<1x256xi1>
    %cst_38 = arith.constant 0.000000e+00 : f32
    %99 = vector.broadcast %cst_38 : f32 to vector<1x256xf32>
    %100 = arith.select %98, %91, %99 : vector<1x256xi1>, vector<1x256xf32>
    %c8 = arith.constant 8 : index
    %c0_39 = arith.constant 0 : index
    %101 = vector.load %arg9[%c8, %c0_39] : memref<25x256xf32, #tpu.memory_space<vmem>>, vector<1x256xf32>
    tpu.vector_store %arg9[%c8, %c0_39], %100 {strides = array<i32>} : memref<25x256xf32, #tpu.memory_space<vmem>>, vector<1x256xf32>,
    %102 = vector.extract_strided_slice %3 {offsets = [0, 34], sizes = [1, 256], strides = [1, 1]} : vector<1x352xf32> to vector<1x256xf32>
    %c2_i32_40 = arith.constant 2 : i32
    %103 = vector.broadcast %c2_i32_40 : i32 to vector<1x256xi32>
    %104 = arith.addi %20, %103 : vector<1x256xi32>
    %c0_i32_41 = arith.constant 0 : i32
    %105 = vector.broadcast %c0_i32_41 : i32 to vector<1x256xi32>
    %106 = arith.cmpi sge, %104, %105 : vector<1x256xi32>
    %c16_i32_42 = arith.constant 16 : i32
    %107 = vector.broadcast %c16_i32_42 : i32 to vector<1x256xi32>
    %108 = arith.cmpi slt, %104, %107 : vector<1x256xi32>
    %109 = arith.andi %106, %108 : vector<1x256xi1>
    %cst_43 = arith.constant 0.000000e+00 : f32
    %110 = vector.broadcast %cst_43 : f32 to vector<1x256xf32>
    %111 = arith.select %109, %102, %110 : vector<1x256xi1>, vector<1x256xf32>
    %c9 = arith.constant 9 : index
    %c0_44 = arith.constant 0 : index
    %112 = vector.load %arg9[%c9, %c0_44] : memref<25x256xf32, #tpu.memory_space<vmem>>, vector<1x256xf32>
    tpu.vector_store %arg9[%c9, %c0_44], %111 {strides = array<i32>} : memref<25x256xf32, #tpu.memory_space<vmem>>, vector<1x256xf32>,
    %113 = vector.extract_strided_slice %3 {offsets = [0, 46], sizes = [1, 256], strides = [1, 1]} : vector<1x352xf32> to vector<1x256xf32>
    %c-2_i32_45 = arith.constant -2 : i32
    %114 = vector.broadcast %c-2_i32_45 : i32 to vector<1x256xi32>
    %115 = arith.addi %20, %114 : vector<1x256xi32>
    %c0_i32_46 = arith.constant 0 : i32
    %116 = vector.broadcast %c0_i32_46 : i32 to vector<1x256xi32>
    %117 = arith.cmpi sge, %115, %116 : vector<1x256xi32>
    %c16_i32_47 = arith.constant 16 : i32
    %118 = vector.broadcast %c16_i32_47 : i32 to vector<1x256xi32>
    %119 = arith.cmpi slt, %115, %118 : vector<1x256xi32>
    %120 = arith.andi %117, %119 : vector<1x256xi1>
    %cst_48 = arith.constant 0.000000e+00 : f32
    %121 = vector.broadcast %cst_48 : f32 to vector<1x256xf32>
    %122 = arith.select %120, %113, %121 : vector<1x256xi1>, vector<1x256xf32>
    %c10 = arith.constant 10 : index
    %c0_49 = arith.constant 0 : index
    %123 = vector.load %arg9[%c10, %c0_49] : memref<25x256xf32, #tpu.memory_space<vmem>>, vector<1x256xf32>
    tpu.vector_store %arg9[%c10, %c0_49], %122 {strides = array<i32>} : memref<25x256xf32, #tpu.memory_space<vmem>>, vector<1x256xf32>,
    %124 = vector.extract_strided_slice %3 {offsets = [0, 47], sizes = [1, 256], strides = [1, 1]} : vector<1x352xf32> to vector<1x256xf32>
    %c-1_i32_50 = arith.constant -1 : i32
    %125 = vector.broadcast %c-1_i32_50 : i32 to vector<1x256xi32>
    %126 = arith.addi %20, %125 : vector<1x256xi32>
    %c0_i32_51 = arith.constant 0 : i32
    %127 = vector.broadcast %c0_i32_51 : i32 to vector<1x256xi32>
    %128 = arith.cmpi sge, %126, %127 : vector<1x256xi32>
    %c16_i32_52 = arith.constant 16 : i32
    %129 = vector.broadcast %c16_i32_52 : i32 to vector<1x256xi32>
    %130 = arith.cmpi slt, %126, %129 : vector<1x256xi32>
    %131 = arith.andi %128, %130 : vector<1x256xi1>
    %cst_53 = arith.constant 0.000000e+00 : f32
    %132 = vector.broadcast %cst_53 : f32 to vector<1x256xf32>
    %133 = arith.select %131, %124, %132 : vector<1x256xi1>, vector<1x256xf32>
    %c11 = arith.constant 11 : index
    %c0_54 = arith.constant 0 : index
    %134 = vector.load %arg9[%c11, %c0_54] : memref<25x256xf32, #tpu.memory_space<vmem>>, vector<1x256xf32>
    tpu.vector_store %arg9[%c11, %c0_54], %133 {strides = array<i32>} : memref<25x256xf32, #tpu.memory_space<vmem>>, vector<1x256xf32>,
    %135 = vector.extract_strided_slice %3 {offsets = [0, 48], sizes = [1, 256], strides = [1, 1]} : vector<1x352xf32> to vector<1x256xf32>
    %c12 = arith.constant 12 : index
    %c0_55 = arith.constant 0 : index
    %136 = vector.load %arg9[%c12, %c0_55] : memref<25x256xf32, #tpu.memory_space<vmem>>, vector<1x256xf32>
    tpu.vector_store %arg9[%c12, %c0_55], %135 {strides = array<i32>} : memref<25x256xf32, #tpu.memory_space<vmem>>, vector<1x256xf32>,
    %137 = vector.extract_strided_slice %3 {offsets = [0, 49], sizes = [1, 256], strides = [1, 1]} : vector<1x352xf32> to vector<1x256xf32>
    %c1_i32_56 = arith.constant 1 : i32
    %138 = vector.broadcast %c1_i32_56 : i32 to vector<1x256xi32>
    %139 = arith.addi %20, %138 : vector<1x256xi32>
    %c0_i32_57 = arith.constant 0 : i32
    %140 = vector.broadcast %c0_i32_57 : i32 to vector<1x256xi32>
    %141 = arith.cmpi sge, %139, %140 : vector<1x256xi32>
    %c16_i32_58 = arith.constant 16 : i32
    %142 = vector.broadcast %c16_i32_58 : i32 to vector<1x256xi32>
    %143 = arith.cmpi slt, %139, %142 : vector<1x256xi32>
    %144 = arith.andi %141, %143 : vector<1x256xi1>
    %cst_59 = arith.constant 0.000000e+00 : f32
    %145 = vector.broadcast %cst_59 : f32 to vector<1x256xf32>
    %146 = arith.select %144, %137, %145 : vector<1x256xi1>, vector<1x256xf32>
    %c13 = arith.constant 13 : index
    %c0_60 = arith.constant 0 : index
    %147 = vector.load %arg9[%c13, %c0_60] : memref<25x256xf32, #tpu.memory_space<vmem>>, vector<1x256xf32>
    tpu.vector_store %arg9[%c13, %c0_60], %146 {strides = array<i32>} : memref<25x256xf32, #tpu.memory_space<vmem>>, vector<1x256xf32>,
    %148 = vector.extract_strided_slice %3 {offsets = [0, 50], sizes = [1, 256], strides = [1, 1]} : vector<1x352xf32> to vector<1x256xf32>
    %c2_i32_61 = arith.constant 2 : i32
    %149 = vector.broadcast %c2_i32_61 : i32 to vector<1x256xi32>
    %150 = arith.addi %20, %149 : vector<1x256xi32>
    %c0_i32_62 = arith.constant 0 : i32
    %151 = vector.broadcast %c0_i32_62 : i32 to vector<1x256xi32>
    %152 = arith.cmpi sge, %150, %151 : vector<1x256xi32>
    %c16_i32_63 = arith.constant 16 : i32
    %153 = vector.broadcast %c16_i32_63 : i32 to vector<1x256xi32>
    %154 = arith.cmpi slt, %150, %153 : vector<1x256xi32>
    %155 = arith.andi %152, %154 : vector<1x256xi1>
    %cst_64 = arith.constant 0.000000e+00 : f32
    %156 = vector.broadcast %cst_64 : f32 to vector<1x256xf32>
    %157 = arith.select %155, %148, %156 : vector<1x256xi1>, vector<1x256xf32>
    %c14 = arith.constant 14 : index
    %c0_65 = arith.constant 0 : index
    %158 = vector.load %arg9[%c14, %c0_65] : memref<25x256xf32, #tpu.memory_space<vmem>>, vector<1x256xf32>
    tpu.vector_store %arg9[%c14, %c0_65], %157 {strides = array<i32>} : memref<25x256xf32, #tpu.memory_space<vmem>>, vector<1x256xf32>,
    %159 = vector.extract_strided_slice %3 {offsets = [0, 62], sizes = [1, 256], strides = [1, 1]} : vector<1x352xf32> to vector<1x256xf32>
    %c-2_i32_66 = arith.constant -2 : i32
    %160 = vector.broadcast %c-2_i32_66 : i32 to vector<1x256xi32>
    %161 = arith.addi %20, %160 : vector<1x256xi32>
    %c0_i32_67 = arith.constant 0 : i32
    %162 = vector.broadcast %c0_i32_67 : i32 to vector<1x256xi32>
    %163 = arith.cmpi sge, %161, %162 : vector<1x256xi32>
    %c16_i32_68 = arith.constant 16 : i32
    %164 = vector.broadcast %c16_i32_68 : i32 to vector<1x256xi32>
    %165 = arith.cmpi slt, %161, %164 : vector<1x256xi32>
    %166 = arith.andi %163, %165 : vector<1x256xi1>
    %cst_69 = arith.constant 0.000000e+00 : f32
    %167 = vector.broadcast %cst_69 : f32 to vector<1x256xf32>
    %168 = arith.select %166, %159, %167 : vector<1x256xi1>, vector<1x256xf32>
    %c15 = arith.constant 15 : index
    %c0_70 = arith.constant 0 : index
    %169 = vector.load %arg9[%c15, %c0_70] : memref<25x256xf32, #tpu.memory_space<vmem>>, vector<1x256xf32>
    tpu.vector_store %arg9[%c15, %c0_70], %168 {strides = array<i32>} : memref<25x256xf32, #tpu.memory_space<vmem>>, vector<1x256xf32>,
    %170 = vector.extract_strided_slice %3 {offsets = [0, 63], sizes = [1, 256], strides = [1, 1]} : vector<1x352xf32> to vector<1x256xf32>
    %c-1_i32_71 = arith.constant -1 : i32
    %171 = vector.broadcast %c-1_i32_71 : i32 to vector<1x256xi32>
    %172 = arith.addi %20, %171 : vector<1x256xi32>
    %c0_i32_72 = arith.constant 0 : i32
    %173 = vector.broadcast %c0_i32_72 : i32 to vector<1x256xi32>
    %174 = arith.cmpi sge, %172, %173 : vector<1x256xi32>
    %c16_i32_73 = arith.constant 16 : i32
    %175 = vector.broadcast %c16_i32_73 : i32 to vector<1x256xi32>
    %176 = arith.cmpi slt, %172, %175 : vector<1x256xi32>
    %177 = arith.andi %174, %176 : vector<1x256xi1>
    %cst_74 = arith.constant 0.000000e+00 : f32
    %178 = vector.broadcast %cst_74 : f32 to vector<1x256xf32>
    %179 = arith.select %177, %170, %178 : vector<1x256xi1>, vector<1x256xf32>
    %c16 = arith.constant 16 : index
    %c0_75 = arith.constant 0 : index
    %180 = vector.load %arg9[%c16, %c0_75] : memref<25x256xf32, #tpu.memory_space<vmem>>, vector<1x256xf32>
    tpu.vector_store %arg9[%c16, %c0_75], %179 {strides = array<i32>} : memref<25x256xf32, #tpu.memory_space<vmem>>, vector<1x256xf32>,
    %181 = vector.extract_strided_slice %3 {offsets = [0, 64], sizes = [1, 256], strides = [1, 1]} : vector<1x352xf32> to vector<1x256xf32>
    %c17 = arith.constant 17 : index
    %c0_76 = arith.constant 0 : index
    %182 = vector.load %arg9[%c17, %c0_76] : memref<25x256xf32, #tpu.memory_space<vmem>>, vector<1x256xf32>
    tpu.vector_store %arg9[%c17, %c0_76], %181 {strides = array<i32>} : memref<25x256xf32, #tpu.memory_space<vmem>>, vector<1x256xf32>,
    %183 = vector.extract_strided_slice %3 {offsets = [0, 65], sizes = [1, 256], strides = [1, 1]} : vector<1x352xf32> to vector<1x256xf32>
    %c1_i32_77 = arith.constant 1 : i32
    %184 = vector.broadcast %c1_i32_77 : i32 to vector<1x256xi32>
    %185 = arith.addi %20, %184 : vector<1x256xi32>
    %c0_i32_78 = arith.constant 0 : i32
    %186 = vector.broadcast %c0_i32_78 : i32 to vector<1x256xi32>
    %187 = arith.cmpi sge, %185, %186 : vector<1x256xi32>
    %c16_i32_79 = arith.constant 16 : i32
    %188 = vector.broadcast %c16_i32_79 : i32 to vector<1x256xi32>
    %189 = arith.cmpi slt, %185, %188 : vector<1x256xi32>
    %190 = arith.andi %187, %189 : vector<1x256xi1>
    %cst_80 = arith.constant 0.000000e+00 : f32
    %191 = vector.broadcast %cst_80 : f32 to vector<1x256xf32>
    %192 = arith.select %190, %183, %191 : vector<1x256xi1>, vector<1x256xf32>
    %c18 = arith.constant 18 : index
    %c0_81 = arith.constant 0 : index
    %193 = vector.load %arg9[%c18, %c0_81] : memref<25x256xf32, #tpu.memory_space<vmem>>, vector<1x256xf32>
    tpu.vector_store %arg9[%c18, %c0_81], %192 {strides = array<i32>} : memref<25x256xf32, #tpu.memory_space<vmem>>, vector<1x256xf32>,
    %194 = vector.extract_strided_slice %3 {offsets = [0, 66], sizes = [1, 256], strides = [1, 1]} : vector<1x352xf32> to vector<1x256xf32>
    %c2_i32_82 = arith.constant 2 : i32
    %195 = vector.broadcast %c2_i32_82 : i32 to vector<1x256xi32>
    %196 = arith.addi %20, %195 : vector<1x256xi32>
    %c0_i32_83 = arith.constant 0 : i32
    %197 = vector.broadcast %c0_i32_83 : i32 to vector<1x256xi32>
    %198 = arith.cmpi sge, %196, %197 : vector<1x256xi32>
    %c16_i32_84 = arith.constant 16 : i32
    %199 = vector.broadcast %c16_i32_84 : i32 to vector<1x256xi32>
    %200 = arith.cmpi slt, %196, %199 : vector<1x256xi32>
    %201 = arith.andi %198, %200 : vector<1x256xi1>
    %cst_85 = arith.constant 0.000000e+00 : f32
    %202 = vector.broadcast %cst_85 : f32 to vector<1x256xf32>
    %203 = arith.select %201, %194, %202 : vector<1x256xi1>, vector<1x256xf32>
    %c19 = arith.constant 19 : index
    %c0_86 = arith.constant 0 : index
    %204 = vector.load %arg9[%c19, %c0_86] : memref<25x256xf32, #tpu.memory_space<vmem>>, vector<1x256xf32>
    tpu.vector_store %arg9[%c19, %c0_86], %203 {strides = array<i32>} : memref<25x256xf32, #tpu.memory_space<vmem>>, vector<1x256xf32>,
    %205 = vector.extract_strided_slice %3 {offsets = [0, 78], sizes = [1, 256], strides = [1, 1]} : vector<1x352xf32> to vector<1x256xf32>
    %c-2_i32_87 = arith.constant -2 : i32
    %206 = vector.broadcast %c-2_i32_87 : i32 to vector<1x256xi32>
    %207 = arith.addi %20, %206 : vector<1x256xi32>
    %c0_i32_88 = arith.constant 0 : i32
    %208 = vector.broadcast %c0_i32_88 : i32 to vector<1x256xi32>
    %209 = arith.cmpi sge, %207, %208 : vector<1x256xi32>
    %c16_i32_89 = arith.constant 16 : i32
    %210 = vector.broadcast %c16_i32_89 : i32 to vector<1x256xi32>
    %211 = arith.cmpi slt, %207, %210 : vector<1x256xi32>
    %212 = arith.andi %209, %211 : vector<1x256xi1>
    %cst_90 = arith.constant 0.000000e+00 : f32
    %213 = vector.broadcast %cst_90 : f32 to vector<1x256xf32>
    %214 = arith.select %212, %205, %213 : vector<1x256xi1>, vector<1x256xf32>
    %c20 = arith.constant 20 : index
    %c0_91 = arith.constant 0 : index
    %215 = vector.load %arg9[%c20, %c0_91] : memref<25x256xf32, #tpu.memory_space<vmem>>, vector<1x256xf32>
    tpu.vector_store %arg9[%c20, %c0_91], %214 {strides = array<i32>} : memref<25x256xf32, #tpu.memory_space<vmem>>, vector<1x256xf32>,
    %216 = vector.extract_strided_slice %3 {offsets = [0, 79], sizes = [1, 256], strides = [1, 1]} : vector<1x352xf32> to vector<1x256xf32>
    %c-1_i32_92 = arith.constant -1 : i32
    %217 = vector.broadcast %c-1_i32_92 : i32 to vector<1x256xi32>
    %218 = arith.addi %20, %217 : vector<1x256xi32>
    %c0_i32_93 = arith.constant 0 : i32
    %219 = vector.broadcast %c0_i32_93 : i32 to vector<1x256xi32>
    %220 = arith.cmpi sge, %218, %219 : vector<1x256xi32>
    %c16_i32_94 = arith.constant 16 : i32
    %221 = vector.broadcast %c16_i32_94 : i32 to vector<1x256xi32>
    %222 = arith.cmpi slt, %218, %221 : vector<1x256xi32>
    %223 = arith.andi %220, %222 : vector<1x256xi1>
    %cst_95 = arith.constant 0.000000e+00 : f32
    %224 = vector.broadcast %cst_95 : f32 to vector<1x256xf32>
    %225 = arith.select %223, %216, %224 : vector<1x256xi1>, vector<1x256xf32>
    %c21 = arith.constant 21 : index
    %c0_96 = arith.constant 0 : index
    %226 = vector.load %arg9[%c21, %c0_96] : memref<25x256xf32, #tpu.memory_space<vmem>>, vector<1x256xf32>
    tpu.vector_store %arg9[%c21, %c0_96], %225 {strides = array<i32>} : memref<25x256xf32, #tpu.memory_space<vmem>>, vector<1x256xf32>,
    %227 = vector.extract_strided_slice %3 {offsets = [0, 80], sizes = [1, 256], strides = [1, 1]} : vector<1x352xf32> to vector<1x256xf32>
    %c22 = arith.constant 22 : index
    %c0_97 = arith.constant 0 : index
    %228 = vector.load %arg9[%c22, %c0_97] : memref<25x256xf32, #tpu.memory_space<vmem>>, vector<1x256xf32>
    tpu.vector_store %arg9[%c22, %c0_97], %227 {strides = array<i32>} : memref<25x256xf32, #tpu.memory_space<vmem>>, vector<1x256xf32>,
    %229 = vector.extract_strided_slice %3 {offsets = [0, 81], sizes = [1, 256], strides = [1, 1]} : vector<1x352xf32> to vector<1x256xf32>
    %c1_i32_98 = arith.constant 1 : i32
    %230 = vector.broadcast %c1_i32_98 : i32 to vector<1x256xi32>
    %231 = arith.addi %20, %230 : vector<1x256xi32>
    %c0_i32_99 = arith.constant 0 : i32
    %232 = vector.broadcast %c0_i32_99 : i32 to vector<1x256xi32>
    %233 = arith.cmpi sge, %231, %232 : vector<1x256xi32>
    %c16_i32_100 = arith.constant 16 : i32
    %234 = vector.broadcast %c16_i32_100 : i32 to vector<1x256xi32>
    %235 = arith.cmpi slt, %231, %234 : vector<1x256xi32>
    %236 = arith.andi %233, %235 : vector<1x256xi1>
    %cst_101 = arith.constant 0.000000e+00 : f32
    %237 = vector.broadcast %cst_101 : f32 to vector<1x256xf32>
    %238 = arith.select %236, %229, %237 : vector<1x256xi1>, vector<1x256xf32>
    %c23 = arith.constant 23 : index
    %c0_102 = arith.constant 0 : index
    %239 = vector.load %arg9[%c23, %c0_102] : memref<25x256xf32, #tpu.memory_space<vmem>>, vector<1x256xf32>
    tpu.vector_store %arg9[%c23, %c0_102], %238 {strides = array<i32>} : memref<25x256xf32, #tpu.memory_space<vmem>>, vector<1x256xf32>,
    %240 = vector.extract_strided_slice %3 {offsets = [0, 82], sizes = [1, 256], strides = [1, 1]} : vector<1x352xf32> to vector<1x256xf32>
    %c2_i32_103 = arith.constant 2 : i32
    %241 = vector.broadcast %c2_i32_103 : i32 to vector<1x256xi32>
    %242 = arith.addi %20, %241 : vector<1x256xi32>
    %c0_i32_104 = arith.constant 0 : i32
    %243 = vector.broadcast %c0_i32_104 : i32 to vector<1x256xi32>
    %244 = arith.cmpi sge, %242, %243 : vector<1x256xi32>
    %c16_i32_105 = arith.constant 16 : i32
    %245 = vector.broadcast %c16_i32_105 : i32 to vector<1x256xi32>
    %246 = arith.cmpi slt, %242, %245 : vector<1x256xi32>
    %247 = arith.andi %244, %246 : vector<1x256xi1>
    %cst_106 = arith.constant 0.000000e+00 : f32
    %248 = vector.broadcast %cst_106 : f32 to vector<1x256xf32>
    %249 = arith.select %247, %240, %248 : vector<1x256xi1>, vector<1x256xf32>
    %c24 = arith.constant 24 : index
    %c0_107 = arith.constant 0 : index
    %250 = vector.load %arg9[%c24, %c0_107] : memref<25x256xf32, #tpu.memory_space<vmem>>, vector<1x256xf32>
    tpu.vector_store %arg9[%c24, %c0_107], %249 {strides = array<i32>} : memref<25x256xf32, #tpu.memory_space<vmem>>, vector<1x256xf32>,
    %c0_108 = arith.constant 0 : index
    %c0_109 = arith.constant 0 : index
    %251 = vector.load %arg2[%c0_108, %c0_109] : memref<4x25xf32, #tpu.memory_space<vmem>>, vector<4x25xf32>
    %c0_110 = arith.constant 0 : index
    %c0_111 = arith.constant 0 : index
    %252 = vector.load %arg9[%c0_110, %c0_111] : memref<25x256xf32, #tpu.memory_space<vmem>>, vector<25x256xf32>
    %cst_112 = arith.constant dense<0.000000e+00> : vector<4x256xf32>
    %253 = tpu.matmul %251, %252, %cst_112 {dimension_numbers = #tpu.dot_dimension_numbers<[1], [0], [0], [1], [0, 0, 1, 1], [], []>} : vector<4x25xf32>, vector<25x256xf32>, vector<4x256xf32> -> vector<4x256xf32>
    %c0_113 = arith.constant 0 : index
    %c0_114 = arith.constant 0 : index
    %254 = vector.load %arg6[%c0_113, %c0_114] : memref<256x64xf32, #tpu.memory_space<vmem>>, vector<256x64xf32>
    %cst_115 = arith.constant 0.000000e+00 : f32
    %255 = vector.broadcast %cst_115 : f32 to vector<4x1xf32>
    %256 = vector.extract_strided_slice %253 {offsets = [0, 1], sizes = [4, 255], strides = [1, 1]} : vector<4x256xf32> to vector<4x255xf32>
    %257 = tpu.concatenate %256, %255 in 1 : vector<4x255xf32>, vector<4x1xf32> -> vector<4x256xf32>
    %258 = arith.maximumf %253, %257 : vector<4x256xf32>
    %cst_116 = arith.constant 0.000000e+00 : f32
    %259 = vector.broadcast %cst_116 : f32 to vector<4x16xf32>
    %260 = vector.extract_strided_slice %258 {offsets = [0, 16], sizes = [4, 240], strides = [1, 1]} : vector<4x256xf32> to vector<4x240xf32>
    %261 = tpu.concatenate %260, %259 in 1 : vector<4x240xf32>, vector<4x16xf32> -> vector<4x256xf32>
    %262 = arith.maximumf %258, %261 : vector<4x256xf32>
    %cst_117 = arith.constant dense<0.000000e+00> : vector<4x64xf32>
    %263 = tpu.matmul %262, %254, %cst_117 {dimension_numbers = #tpu.dot_dimension_numbers<[1], [0], [0], [1], [0, 0, 1, 1], [], []>} : vector<4x256xf32>, vector<256x64xf32>, vector<4x64xf32> -> vector<4x64xf32>
    %c0_118 = arith.constant 0 : index
    %c0_119 = arith.constant 0 : index
    %264 = vector.load %arg3[%c0_118, %c0_119] : memref<4x1xf32, #tpu.memory_space<vmem>>, vector<4x1xf32>
    %265 = vector.broadcast %264 : vector<4x1xf32> to vector<4x64xf32>
    %266 = arith.addf %263, %265 : vector<4x64xf32>
    %cst_120 = arith.constant 0.000000e+00 : f32
    %267 = vector.broadcast %cst_120 : f32 to vector<4x64xf32>
    %268 = arith.maximumf %266, %267 : vector<4x64xf32>
    %cst_121 = arith.constant 0.000000e+00 : f32
    %269 = vector.broadcast %cst_121 : f32 to vector<4x24xf32>
    %270 = tpu.concatenate %269, %268, %269 in 1 : vector<4x24xf32>, vector<4x64xf32>, vector<4x24xf32> -> vector<4x112xf32>
    %271 = tpu.iota {dimensions = array<i32: 1>} : vector<4x64xi32>
    %c8_i32 = arith.constant 8 : i32
    %c0_i32_122 = arith.constant 0 : i32
    %272 = arith.cmpi eq, %c8_i32, %c0_i32_122 : i32
    %c1_i32_123 = arith.constant 1 : i32
    %273 = arith.select %272, %c1_i32_123, %c8_i32 : i32
    %274 = vector.broadcast %273 : i32 to vector<4x64xi32>
    %275 = arith.remsi %271, %274 : vector<4x64xi32>
    %c0_i32_124 = arith.constant 0 : i32
    %276 = vector.broadcast %c0_i32_124 : i32 to vector<4x64xi32>
    %277 = arith.cmpi ne, %275, %276 : vector<4x64xi32>
    %c0_i32_125 = arith.constant 0 : i32
    %278 = vector.broadcast %c0_i32_125 : i32 to vector<4x64xi32>
    %279 = arith.cmpi slt, %275, %278 : vector<4x64xi32>
    %c0_i32_126 = arith.constant 0 : i32
    %280 = arith.cmpi slt, %273, %c0_i32_126 : i32
    %281 = vector.broadcast %280 : i1 to vector<4x64xi1>
    %282 = vector.broadcast %281 : vector<4x64xi1> to vector<4x64xi1>
    %283 = arith.xori %279, %282 : vector<4x64xi1>
    %284 = arith.andi %283, %277 : vector<4x64xi1>
    %285 = vector.broadcast %273 : i32 to vector<4x64xi32>
    %286 = arith.addi %275, %285 : vector<4x64xi32>
    %287 = arith.select %284, %286, %275 : vector<4x64xi1>, vector<4x64xi32>
    %288 = vector.extract_strided_slice %270 {offsets = [0, 6], sizes = [4, 64], strides = [1, 1]} : vector<4x112xf32> to vector<4x64xf32>
    %c-2_i32_127 = arith.constant -2 : i32
    %289 = vector.broadcast %c-2_i32_127 : i32 to vector<4x64xi32>
    %290 = arith.addi %287, %289 : vector<4x64xi32>
    %c0_i32_128 = arith.constant 0 : i32
    %291 = vector.broadcast %c0_i32_128 : i32 to vector<4x64xi32>
    %292 = arith.cmpi sge, %290, %291 : vector<4x64xi32>
    %c8_i32_129 = arith.constant 8 : i32
    %293 = vector.broadcast %c8_i32_129 : i32 to vector<4x64xi32>
    %294 = arith.cmpi slt, %290, %293 : vector<4x64xi32>
    %295 = arith.andi %292, %294 : vector<4x64xi1>
    %cst_130 = arith.constant 0.000000e+00 : f32
    %296 = vector.broadcast %cst_130 : f32 to vector<4x64xf32>
    %297 = arith.select %295, %288, %296 : vector<4x64xi1>, vector<4x64xf32>
    %c0_131 = arith.constant 0 : index
    %c0_132 = arith.constant 0 : index
    %298 = vector.load %arg10[%c0_131, %c0_132] : memref<100x64xf32, #tpu.memory_space<vmem>>, vector<4x64xf32>
    tpu.vector_store %arg10[%c0_131, %c0_132], %297 {strides = array<i32>} : memref<100x64xf32, #tpu.memory_space<vmem>>, vector<4x64xf32>,
    %299 = vector.extract_strided_slice %270 {offsets = [0, 7], sizes = [4, 64], strides = [1, 1]} : vector<4x112xf32> to vector<4x64xf32>
    %c-1_i32_133 = arith.constant -1 : i32
    %300 = vector.broadcast %c-1_i32_133 : i32 to vector<4x64xi32>
    %301 = arith.addi %287, %300 : vector<4x64xi32>
    %c0_i32_134 = arith.constant 0 : i32
    %302 = vector.broadcast %c0_i32_134 : i32 to vector<4x64xi32>
    %303 = arith.cmpi sge, %301, %302 : vector<4x64xi32>
    %c8_i32_135 = arith.constant 8 : i32
    %304 = vector.broadcast %c8_i32_135 : i32 to vector<4x64xi32>
    %305 = arith.cmpi slt, %301, %304 : vector<4x64xi32>
    %306 = arith.andi %303, %305 : vector<4x64xi1>
    %cst_136 = arith.constant 0.000000e+00 : f32
    %307 = vector.broadcast %cst_136 : f32 to vector<4x64xf32>
    %308 = arith.select %306, %299, %307 : vector<4x64xi1>, vector<4x64xf32>
    %c4_137 = arith.constant 4 : index
    %c0_138 = arith.constant 0 : index
    %309 = vector.load %arg10[%c4_137, %c0_138] : memref<100x64xf32, #tpu.memory_space<vmem>>, vector<4x64xf32>
    tpu.vector_store %arg10[%c4_137, %c0_138], %308 {strides = array<i32>} : memref<100x64xf32, #tpu.memory_space<vmem>>, vector<4x64xf32>,
    %310 = vector.extract_strided_slice %270 {offsets = [0, 8], sizes = [4, 64], strides = [1, 1]} : vector<4x112xf32> to vector<4x64xf32>
    %c8_139 = arith.constant 8 : index
    %c0_140 = arith.constant 0 : index
    %311 = vector.load %arg10[%c8_139, %c0_140] : memref<100x64xf32, #tpu.memory_space<vmem>>, vector<4x64xf32>
    tpu.vector_store %arg10[%c8_139, %c0_140], %310 {strides = array<i32>} : memref<100x64xf32, #tpu.memory_space<vmem>>, vector<4x64xf32>,
    %312 = vector.extract_strided_slice %270 {offsets = [0, 9], sizes = [4, 64], strides = [1, 1]} : vector<4x112xf32> to vector<4x64xf32>
    %c1_i32_141 = arith.constant 1 : i32
    %313 = vector.broadcast %c1_i32_141 : i32 to vector<4x64xi32>
    %314 = arith.addi %287, %313 : vector<4x64xi32>
    %c0_i32_142 = arith.constant 0 : i32
    %315 = vector.broadcast %c0_i32_142 : i32 to vector<4x64xi32>
    %316 = arith.cmpi sge, %314, %315 : vector<4x64xi32>
    %c8_i32_143 = arith.constant 8 : i32
    %317 = vector.broadcast %c8_i32_143 : i32 to vector<4x64xi32>
    %318 = arith.cmpi slt, %314, %317 : vector<4x64xi32>
    %319 = arith.andi %316, %318 : vector<4x64xi1>
    %cst_144 = arith.constant 0.000000e+00 : f32
    %320 = vector.broadcast %cst_144 : f32 to vector<4x64xf32>
    %321 = arith.select %319, %312, %320 : vector<4x64xi1>, vector<4x64xf32>
    %c12_145 = arith.constant 12 : index
    %c0_146 = arith.constant 0 : index
    %322 = vector.load %arg10[%c12_145, %c0_146] : memref<100x64xf32, #tpu.memory_space<vmem>>, vector<4x64xf32>
    tpu.vector_store %arg10[%c12_145, %c0_146], %321 {strides = array<i32>} : memref<100x64xf32, #tpu.memory_space<vmem>>, vector<4x64xf32>,
    %323 = vector.extract_strided_slice %270 {offsets = [0, 10], sizes = [4, 64], strides = [1, 1]} : vector<4x112xf32> to vector<4x64xf32>
    %c2_i32_147 = arith.constant 2 : i32
    %324 = vector.broadcast %c2_i32_147 : i32 to vector<4x64xi32>
    %325 = arith.addi %287, %324 : vector<4x64xi32>
    %c0_i32_148 = arith.constant 0 : i32
    %326 = vector.broadcast %c0_i32_148 : i32 to vector<4x64xi32>
    %327 = arith.cmpi sge, %325, %326 : vector<4x64xi32>
    %c8_i32_149 = arith.constant 8 : i32
    %328 = vector.broadcast %c8_i32_149 : i32 to vector<4x64xi32>
    %329 = arith.cmpi slt, %325, %328 : vector<4x64xi32>
    %330 = arith.andi %327, %329 : vector<4x64xi1>
    %cst_150 = arith.constant 0.000000e+00 : f32
    %331 = vector.broadcast %cst_150 : f32 to vector<4x64xf32>
    %332 = arith.select %330, %323, %331 : vector<4x64xi1>, vector<4x64xf32>
    %c16_151 = arith.constant 16 : index
    %c0_152 = arith.constant 0 : index
    %333 = vector.load %arg10[%c16_151, %c0_152] : memref<100x64xf32, #tpu.memory_space<vmem>>, vector<4x64xf32>
    tpu.vector_store %arg10[%c16_151, %c0_152], %332 {strides = array<i32>} : memref<100x64xf32, #tpu.memory_space<vmem>>, vector<4x64xf32>,
    %334 = vector.extract_strided_slice %270 {offsets = [0, 14], sizes = [4, 64], strides = [1, 1]} : vector<4x112xf32> to vector<4x64xf32>
    %c-2_i32_153 = arith.constant -2 : i32
    %335 = vector.broadcast %c-2_i32_153 : i32 to vector<4x64xi32>
    %336 = arith.addi %287, %335 : vector<4x64xi32>
    %c0_i32_154 = arith.constant 0 : i32
    %337 = vector.broadcast %c0_i32_154 : i32 to vector<4x64xi32>
    %338 = arith.cmpi sge, %336, %337 : vector<4x64xi32>
    %c8_i32_155 = arith.constant 8 : i32
    %339 = vector.broadcast %c8_i32_155 : i32 to vector<4x64xi32>
    %340 = arith.cmpi slt, %336, %339 : vector<4x64xi32>
    %341 = arith.andi %338, %340 : vector<4x64xi1>
    %cst_156 = arith.constant 0.000000e+00 : f32
    %342 = vector.broadcast %cst_156 : f32 to vector<4x64xf32>
    %343 = arith.select %341, %334, %342 : vector<4x64xi1>, vector<4x64xf32>
    %c20_157 = arith.constant 20 : index
    %c0_158 = arith.constant 0 : index
    %344 = vector.load %arg10[%c20_157, %c0_158] : memref<100x64xf32, #tpu.memory_space<vmem>>, vector<4x64xf32>
    tpu.vector_store %arg10[%c20_157, %c0_158], %343 {strides = array<i32>} : memref<100x64xf32, #tpu.memory_space<vmem>>, vector<4x64xf32>,
    %345 = vector.extract_strided_slice %270 {offsets = [0, 15], sizes = [4, 64], strides = [1, 1]} : vector<4x112xf32> to vector<4x64xf32>
    %c-1_i32_159 = arith.constant -1 : i32
    %346 = vector.broadcast %c-1_i32_159 : i32 to vector<4x64xi32>
    %347 = arith.addi %287, %346 : vector<4x64xi32>
    %c0_i32_160 = arith.constant 0 : i32
    %348 = vector.broadcast %c0_i32_160 : i32 to vector<4x64xi32>
    %349 = arith.cmpi sge, %347, %348 : vector<4x64xi32>
    %c8_i32_161 = arith.constant 8 : i32
    %350 = vector.broadcast %c8_i32_161 : i32 to vector<4x64xi32>
    %351 = arith.cmpi slt, %347, %350 : vector<4x64xi32>
    %352 = arith.andi %349, %351 : vector<4x64xi1>
    %cst_162 = arith.constant 0.000000e+00 : f32
    %353 = vector.broadcast %cst_162 : f32 to vector<4x64xf32>
    %354 = arith.select %352, %345, %353 : vector<4x64xi1>, vector<4x64xf32>
    %c24_163 = arith.constant 24 : index
    %c0_164 = arith.constant 0 : index
    %355 = vector.load %arg10[%c24_163, %c0_164] : memref<100x64xf32, #tpu.memory_space<vmem>>, vector<4x64xf32>
    tpu.vector_store %arg10[%c24_163, %c0_164], %354 {strides = array<i32>} : memref<100x64xf32, #tpu.memory_space<vmem>>, vector<4x64xf32>,
    %356 = vector.extract_strided_slice %270 {offsets = [0, 16], sizes = [4, 64], strides = [1, 1]} : vector<4x112xf32> to vector<4x64xf32>
    %c28 = arith.constant 28 : index
    %c0_165 = arith.constant 0 : index
    %357 = vector.load %arg10[%c28, %c0_165] : memref<100x64xf32, #tpu.memory_space<vmem>>, vector<4x64xf32>
    tpu.vector_store %arg10[%c28, %c0_165], %356 {strides = array<i32>} : memref<100x64xf32, #tpu.memory_space<vmem>>, vector<4x64xf32>,
    %358 = vector.extract_strided_slice %270 {offsets = [0, 17], sizes = [4, 64], strides = [1, 1]} : vector<4x112xf32> to vector<4x64xf32>
    %c1_i32_166 = arith.constant 1 : i32
    %359 = vector.broadcast %c1_i32_166 : i32 to vector<4x64xi32>
    %360 = arith.addi %287, %359 : vector<4x64xi32>
    %c0_i32_167 = arith.constant 0 : i32
    %361 = vector.broadcast %c0_i32_167 : i32 to vector<4x64xi32>
    %362 = arith.cmpi sge, %360, %361 : vector<4x64xi32>
    %c8_i32_168 = arith.constant 8 : i32
    %363 = vector.broadcast %c8_i32_168 : i32 to vector<4x64xi32>
    %364 = arith.cmpi slt, %360, %363 : vector<4x64xi32>
    %365 = arith.andi %362, %364 : vector<4x64xi1>
    %cst_169 = arith.constant 0.000000e+00 : f32
    %366 = vector.broadcast %cst_169 : f32 to vector<4x64xf32>
    %367 = arith.select %365, %358, %366 : vector<4x64xi1>, vector<4x64xf32>
    %c32 = arith.constant 32 : index
    %c0_170 = arith.constant 0 : index
    %368 = vector.load %arg10[%c32, %c0_170] : memref<100x64xf32, #tpu.memory_space<vmem>>, vector<4x64xf32>
    tpu.vector_store %arg10[%c32, %c0_170], %367 {strides = array<i32>} : memref<100x64xf32, #tpu.memory_space<vmem>>, vector<4x64xf32>,
    %369 = vector.extract_strided_slice %270 {offsets = [0, 18], sizes = [4, 64], strides = [1, 1]} : vector<4x112xf32> to vector<4x64xf32>
    %c2_i32_171 = arith.constant 2 : i32
    %370 = vector.broadcast %c2_i32_171 : i32 to vector<4x64xi32>
    %371 = arith.addi %287, %370 : vector<4x64xi32>
    %c0_i32_172 = arith.constant 0 : i32
    %372 = vector.broadcast %c0_i32_172 : i32 to vector<4x64xi32>
    %373 = arith.cmpi sge, %371, %372 : vector<4x64xi32>
    %c8_i32_173 = arith.constant 8 : i32
    %374 = vector.broadcast %c8_i32_173 : i32 to vector<4x64xi32>
    %375 = arith.cmpi slt, %371, %374 : vector<4x64xi32>
    %376 = arith.andi %373, %375 : vector<4x64xi1>
    %cst_174 = arith.constant 0.000000e+00 : f32
    %377 = vector.broadcast %cst_174 : f32 to vector<4x64xf32>
    %378 = arith.select %376, %369, %377 : vector<4x64xi1>, vector<4x64xf32>
    %c36 = arith.constant 36 : index
    %c0_175 = arith.constant 0 : index
    %379 = vector.load %arg10[%c36, %c0_175] : memref<100x64xf32, #tpu.memory_space<vmem>>, vector<4x64xf32>
    tpu.vector_store %arg10[%c36, %c0_175], %378 {strides = array<i32>} : memref<100x64xf32, #tpu.memory_space<vmem>>, vector<4x64xf32>,
    %380 = vector.extract_strided_slice %270 {offsets = [0, 22], sizes = [4, 64], strides = [1, 1]} : vector<4x112xf32> to vector<4x64xf32>
    %c-2_i32_176 = arith.constant -2 : i32
    %381 = vector.broadcast %c-2_i32_176 : i32 to vector<4x64xi32>
    %382 = arith.addi %287, %381 : vector<4x64xi32>
    %c0_i32_177 = arith.constant 0 : i32
    %383 = vector.broadcast %c0_i32_177 : i32 to vector<4x64xi32>
    %384 = arith.cmpi sge, %382, %383 : vector<4x64xi32>
    %c8_i32_178 = arith.constant 8 : i32
    %385 = vector.broadcast %c8_i32_178 : i32 to vector<4x64xi32>
    %386 = arith.cmpi slt, %382, %385 : vector<4x64xi32>
    %387 = arith.andi %384, %386 : vector<4x64xi1>
    %cst_179 = arith.constant 0.000000e+00 : f32
    %388 = vector.broadcast %cst_179 : f32 to vector<4x64xf32>
    %389 = arith.select %387, %380, %388 : vector<4x64xi1>, vector<4x64xf32>
    %c40 = arith.constant 40 : index
    %c0_180 = arith.constant 0 : index
    %390 = vector.load %arg10[%c40, %c0_180] : memref<100x64xf32, #tpu.memory_space<vmem>>, vector<4x64xf32>
    tpu.vector_store %arg10[%c40, %c0_180], %389 {strides = array<i32>} : memref<100x64xf32, #tpu.memory_space<vmem>>, vector<4x64xf32>,
    %391 = vector.extract_strided_slice %270 {offsets = [0, 23], sizes = [4, 64], strides = [1, 1]} : vector<4x112xf32> to vector<4x64xf32>
    %c-1_i32_181 = arith.constant -1 : i32
    %392 = vector.broadcast %c-1_i32_181 : i32 to vector<4x64xi32>
    %393 = arith.addi %287, %392 : vector<4x64xi32>
    %c0_i32_182 = arith.constant 0 : i32
    %394 = vector.broadcast %c0_i32_182 : i32 to vector<4x64xi32>
    %395 = arith.cmpi sge, %393, %394 : vector<4x64xi32>
    %c8_i32_183 = arith.constant 8 : i32
    %396 = vector.broadcast %c8_i32_183 : i32 to vector<4x64xi32>
    %397 = arith.cmpi slt, %393, %396 : vector<4x64xi32>
    %398 = arith.andi %395, %397 : vector<4x64xi1>
    %cst_184 = arith.constant 0.000000e+00 : f32
    %399 = vector.broadcast %cst_184 : f32 to vector<4x64xf32>
    %400 = arith.select %398, %391, %399 : vector<4x64xi1>, vector<4x64xf32>
    %c44 = arith.constant 44 : index
    %c0_185 = arith.constant 0 : index
    %401 = vector.load %arg10[%c44, %c0_185] : memref<100x64xf32, #tpu.memory_space<vmem>>, vector<4x64xf32>
    tpu.vector_store %arg10[%c44, %c0_185], %400 {strides = array<i32>} : memref<100x64xf32, #tpu.memory_space<vmem>>, vector<4x64xf32>,
    %402 = vector.extract_strided_slice %270 {offsets = [0, 24], sizes = [4, 64], strides = [1, 1]} : vector<4x112xf32> to vector<4x64xf32>
    %c48 = arith.constant 48 : index
    %c0_186 = arith.constant 0 : index
    %403 = vector.load %arg10[%c48, %c0_186] : memref<100x64xf32, #tpu.memory_space<vmem>>, vector<4x64xf32>
    tpu.vector_store %arg10[%c48, %c0_186], %402 {strides = array<i32>} : memref<100x64xf32, #tpu.memory_space<vmem>>, vector<4x64xf32>,
    %404 = vector.extract_strided_slice %270 {offsets = [0, 25], sizes = [4, 64], strides = [1, 1]} : vector<4x112xf32> to vector<4x64xf32>
    %c1_i32_187 = arith.constant 1 : i32
    %405 = vector.broadcast %c1_i32_187 : i32 to vector<4x64xi32>
    %406 = arith.addi %287, %405 : vector<4x64xi32>
    %c0_i32_188 = arith.constant 0 : i32
    %407 = vector.broadcast %c0_i32_188 : i32 to vector<4x64xi32>
    %408 = arith.cmpi sge, %406, %407 : vector<4x64xi32>
    %c8_i32_189 = arith.constant 8 : i32
    %409 = vector.broadcast %c8_i32_189 : i32 to vector<4x64xi32>
    %410 = arith.cmpi slt, %406, %409 : vector<4x64xi32>
    %411 = arith.andi %408, %410 : vector<4x64xi1>
    %cst_190 = arith.constant 0.000000e+00 : f32
    %412 = vector.broadcast %cst_190 : f32 to vector<4x64xf32>
    %413 = arith.select %411, %404, %412 : vector<4x64xi1>, vector<4x64xf32>
    %c52 = arith.constant 52 : index
    %c0_191 = arith.constant 0 : index
    %414 = vector.load %arg10[%c52, %c0_191] : memref<100x64xf32, #tpu.memory_space<vmem>>, vector<4x64xf32>
    tpu.vector_store %arg10[%c52, %c0_191], %413 {strides = array<i32>} : memref<100x64xf32, #tpu.memory_space<vmem>>, vector<4x64xf32>,
    %415 = vector.extract_strided_slice %270 {offsets = [0, 26], sizes = [4, 64], strides = [1, 1]} : vector<4x112xf32> to vector<4x64xf32>
    %c2_i32_192 = arith.constant 2 : i32
    %416 = vector.broadcast %c2_i32_192 : i32 to vector<4x64xi32>
    %417 = arith.addi %287, %416 : vector<4x64xi32>
    %c0_i32_193 = arith.constant 0 : i32
    %418 = vector.broadcast %c0_i32_193 : i32 to vector<4x64xi32>
    %419 = arith.cmpi sge, %417, %418 : vector<4x64xi32>
    %c8_i32_194 = arith.constant 8 : i32
    %420 = vector.broadcast %c8_i32_194 : i32 to vector<4x64xi32>
    %421 = arith.cmpi slt, %417, %420 : vector<4x64xi32>
    %422 = arith.andi %419, %421 : vector<4x64xi1>
    %cst_195 = arith.constant 0.000000e+00 : f32
    %423 = vector.broadcast %cst_195 : f32 to vector<4x64xf32>
    %424 = arith.select %422, %415, %423 : vector<4x64xi1>, vector<4x64xf32>
    %c56 = arith.constant 56 : index
    %c0_196 = arith.constant 0 : index
    %425 = vector.load %arg10[%c56, %c0_196] : memref<100x64xf32, #tpu.memory_space<vmem>>, vector<4x64xf32>
    tpu.vector_store %arg10[%c56, %c0_196], %424 {strides = array<i32>} : memref<100x64xf32, #tpu.memory_space<vmem>>, vector<4x64xf32>,
    %426 = vector.extract_strided_slice %270 {offsets = [0, 30], sizes = [4, 64], strides = [1, 1]} : vector<4x112xf32> to vector<4x64xf32>
    %c-2_i32_197 = arith.constant -2 : i32
    %427 = vector.broadcast %c-2_i32_197 : i32 to vector<4x64xi32>
    %428 = arith.addi %287, %427 : vector<4x64xi32>
    %c0_i32_198 = arith.constant 0 : i32
    %429 = vector.broadcast %c0_i32_198 : i32 to vector<4x64xi32>
    %430 = arith.cmpi sge, %428, %429 : vector<4x64xi32>
    %c8_i32_199 = arith.constant 8 : i32
    %431 = vector.broadcast %c8_i32_199 : i32 to vector<4x64xi32>
    %432 = arith.cmpi slt, %428, %431 : vector<4x64xi32>
    %433 = arith.andi %430, %432 : vector<4x64xi1>
    %cst_200 = arith.constant 0.000000e+00 : f32
    %434 = vector.broadcast %cst_200 : f32 to vector<4x64xf32>
    %435 = arith.select %433, %426, %434 : vector<4x64xi1>, vector<4x64xf32>
    %c60 = arith.constant 60 : index
    %c0_201 = arith.constant 0 : index
    %436 = vector.load %arg10[%c60, %c0_201] : memref<100x64xf32, #tpu.memory_space<vmem>>, vector<4x64xf32>
    tpu.vector_store %arg10[%c60, %c0_201], %435 {strides = array<i32>} : memref<100x64xf32, #tpu.memory_space<vmem>>, vector<4x64xf32>,
    %437 = vector.extract_strided_slice %270 {offsets = [0, 31], sizes = [4, 64], strides = [1, 1]} : vector<4x112xf32> to vector<4x64xf32>
    %c-1_i32_202 = arith.constant -1 : i32
    %438 = vector.broadcast %c-1_i32_202 : i32 to vector<4x64xi32>
    %439 = arith.addi %287, %438 : vector<4x64xi32>
    %c0_i32_203 = arith.constant 0 : i32
    %440 = vector.broadcast %c0_i32_203 : i32 to vector<4x64xi32>
    %441 = arith.cmpi sge, %439, %440 : vector<4x64xi32>
    %c8_i32_204 = arith.constant 8 : i32
    %442 = vector.broadcast %c8_i32_204 : i32 to vector<4x64xi32>
    %443 = arith.cmpi slt, %439, %442 : vector<4x64xi32>
    %444 = arith.andi %441, %443 : vector<4x64xi1>
    %cst_205 = arith.constant 0.000000e+00 : f32
    %445 = vector.broadcast %cst_205 : f32 to vector<4x64xf32>
    %446 = arith.select %444, %437, %445 : vector<4x64xi1>, vector<4x64xf32>
    %c64 = arith.constant 64 : index
    %c0_206 = arith.constant 0 : index
    %447 = vector.load %arg10[%c64, %c0_206] : memref<100x64xf32, #tpu.memory_space<vmem>>, vector<4x64xf32>
    tpu.vector_store %arg10[%c64, %c0_206], %446 {strides = array<i32>} : memref<100x64xf32, #tpu.memory_space<vmem>>, vector<4x64xf32>,
    %448 = vector.extract_strided_slice %270 {offsets = [0, 32], sizes = [4, 64], strides = [1, 1]} : vector<4x112xf32> to vector<4x64xf32>
    %c68 = arith.constant 68 : index
    %c0_207 = arith.constant 0 : index
    %449 = vector.load %arg10[%c68, %c0_207] : memref<100x64xf32, #tpu.memory_space<vmem>>, vector<4x64xf32>
    tpu.vector_store %arg10[%c68, %c0_207], %448 {strides = array<i32>} : memref<100x64xf32, #tpu.memory_space<vmem>>, vector<4x64xf32>,
    %450 = vector.extract_strided_slice %270 {offsets = [0, 33], sizes = [4, 64], strides = [1, 1]} : vector<4x112xf32> to vector<4x64xf32>
    %c1_i32_208 = arith.constant 1 : i32
    %451 = vector.broadcast %c1_i32_208 : i32 to vector<4x64xi32>
    %452 = arith.addi %287, %451 : vector<4x64xi32>
    %c0_i32_209 = arith.constant 0 : i32
    %453 = vector.broadcast %c0_i32_209 : i32 to vector<4x64xi32>
    %454 = arith.cmpi sge, %452, %453 : vector<4x64xi32>
    %c8_i32_210 = arith.constant 8 : i32
    %455 = vector.broadcast %c8_i32_210 : i32 to vector<4x64xi32>
    %456 = arith.cmpi slt, %452, %455 : vector<4x64xi32>
    %457 = arith.andi %454, %456 : vector<4x64xi1>
    %cst_211 = arith.constant 0.000000e+00 : f32
    %458 = vector.broadcast %cst_211 : f32 to vector<4x64xf32>
    %459 = arith.select %457, %450, %458 : vector<4x64xi1>, vector<4x64xf32>
    %c72 = arith.constant 72 : index
    %c0_212 = arith.constant 0 : index
    %460 = vector.load %arg10[%c72, %c0_212] : memref<100x64xf32, #tpu.memory_space<vmem>>, vector<4x64xf32>
    tpu.vector_store %arg10[%c72, %c0_212], %459 {strides = array<i32>} : memref<100x64xf32, #tpu.memory_space<vmem>>, vector<4x64xf32>,
    %461 = vector.extract_strided_slice %270 {offsets = [0, 34], sizes = [4, 64], strides = [1, 1]} : vector<4x112xf32> to vector<4x64xf32>
    %c2_i32_213 = arith.constant 2 : i32
    %462 = vector.broadcast %c2_i32_213 : i32 to vector<4x64xi32>
    %463 = arith.addi %287, %462 : vector<4x64xi32>
    %c0_i32_214 = arith.constant 0 : i32
    %464 = vector.broadcast %c0_i32_214 : i32 to vector<4x64xi32>
    %465 = arith.cmpi sge, %463, %464 : vector<4x64xi32>
    %c8_i32_215 = arith.constant 8 : i32
    %466 = vector.broadcast %c8_i32_215 : i32 to vector<4x64xi32>
    %467 = arith.cmpi slt, %463, %466 : vector<4x64xi32>
    %468 = arith.andi %465, %467 : vector<4x64xi1>
    %cst_216 = arith.constant 0.000000e+00 : f32
    %469 = vector.broadcast %cst_216 : f32 to vector<4x64xf32>
    %470 = arith.select %468, %461, %469 : vector<4x64xi1>, vector<4x64xf32>
    %c76 = arith.constant 76 : index
    %c0_217 = arith.constant 0 : index
    %471 = vector.load %arg10[%c76, %c0_217] : memref<100x64xf32, #tpu.memory_space<vmem>>, vector<4x64xf32>
    tpu.vector_store %arg10[%c76, %c0_217], %470 {strides = array<i32>} : memref<100x64xf32, #tpu.memory_space<vmem>>, vector<4x64xf32>,
    %472 = vector.extract_strided_slice %270 {offsets = [0, 38], sizes = [4, 64], strides = [1, 1]} : vector<4x112xf32> to vector<4x64xf32>
    %c-2_i32_218 = arith.constant -2 : i32
    %473 = vector.broadcast %c-2_i32_218 : i32 to vector<4x64xi32>
    %474 = arith.addi %287, %473 : vector<4x64xi32>
    %c0_i32_219 = arith.constant 0 : i32
    %475 = vector.broadcast %c0_i32_219 : i32 to vector<4x64xi32>
    %476 = arith.cmpi sge, %474, %475 : vector<4x64xi32>
    %c8_i32_220 = arith.constant 8 : i32
    %477 = vector.broadcast %c8_i32_220 : i32 to vector<4x64xi32>
    %478 = arith.cmpi slt, %474, %477 : vector<4x64xi32>
    %479 = arith.andi %476, %478 : vector<4x64xi1>
    %cst_221 = arith.constant 0.000000e+00 : f32
    %480 = vector.broadcast %cst_221 : f32 to vector<4x64xf32>
    %481 = arith.select %479, %472, %480 : vector<4x64xi1>, vector<4x64xf32>
    %c80 = arith.constant 80 : index
    %c0_222 = arith.constant 0 : index
    %482 = vector.load %arg10[%c80, %c0_222] : memref<100x64xf32, #tpu.memory_space<vmem>>, vector<4x64xf32>
    tpu.vector_store %arg10[%c80, %c0_222], %481 {strides = array<i32>} : memref<100x64xf32, #tpu.memory_space<vmem>>, vector<4x64xf32>,
    %483 = vector.extract_strided_slice %270 {offsets = [0, 39], sizes = [4, 64], strides = [1, 1]} : vector<4x112xf32> to vector<4x64xf32>
    %c-1_i32_223 = arith.constant -1 : i32
    %484 = vector.broadcast %c-1_i32_223 : i32 to vector<4x64xi32>
    %485 = arith.addi %287, %484 : vector<4x64xi32>
    %c0_i32_224 = arith.constant 0 : i32
    %486 = vector.broadcast %c0_i32_224 : i32 to vector<4x64xi32>
    %487 = arith.cmpi sge, %485, %486 : vector<4x64xi32>
    %c8_i32_225 = arith.constant 8 : i32
    %488 = vector.broadcast %c8_i32_225 : i32 to vector<4x64xi32>
    %489 = arith.cmpi slt, %485, %488 : vector<4x64xi32>
    %490 = arith.andi %487, %489 : vector<4x64xi1>
    %cst_226 = arith.constant 0.000000e+00 : f32
    %491 = vector.broadcast %cst_226 : f32 to vector<4x64xf32>
    %492 = arith.select %490, %483, %491 : vector<4x64xi1>, vector<4x64xf32>
    %c84 = arith.constant 84 : index
    %c0_227 = arith.constant 0 : index
    %493 = vector.load %arg10[%c84, %c0_227] : memref<100x64xf32, #tpu.memory_space<vmem>>, vector<4x64xf32>
    tpu.vector_store %arg10[%c84, %c0_227], %492 {strides = array<i32>} : memref<100x64xf32, #tpu.memory_space<vmem>>, vector<4x64xf32>,
    %494 = vector.extract_strided_slice %270 {offsets = [0, 40], sizes = [4, 64], strides = [1, 1]} : vector<4x112xf32> to vector<4x64xf32>
    %c88 = arith.constant 88 : index
    %c0_228 = arith.constant 0 : index
    %495 = vector.load %arg10[%c88, %c0_228] : memref<100x64xf32, #tpu.memory_space<vmem>>, vector<4x64xf32>
    tpu.vector_store %arg10[%c88, %c0_228], %494 {strides = array<i32>} : memref<100x64xf32, #tpu.memory_space<vmem>>, vector<4x64xf32>,
    %496 = vector.extract_strided_slice %270 {offsets = [0, 41], sizes = [4, 64], strides = [1, 1]} : vector<4x112xf32> to vector<4x64xf32>
    %c1_i32_229 = arith.constant 1 : i32
    %497 = vector.broadcast %c1_i32_229 : i32 to vector<4x64xi32>
    %498 = arith.addi %287, %497 : vector<4x64xi32>
    %c0_i32_230 = arith.constant 0 : i32
    %499 = vector.broadcast %c0_i32_230 : i32 to vector<4x64xi32>
    %500 = arith.cmpi sge, %498, %499 : vector<4x64xi32>
    %c8_i32_231 = arith.constant 8 : i32
    %501 = vector.broadcast %c8_i32_231 : i32 to vector<4x64xi32>
    %502 = arith.cmpi slt, %498, %501 : vector<4x64xi32>
    %503 = arith.andi %500, %502 : vector<4x64xi1>
    %cst_232 = arith.constant 0.000000e+00 : f32
    %504 = vector.broadcast %cst_232 : f32 to vector<4x64xf32>
    %505 = arith.select %503, %496, %504 : vector<4x64xi1>, vector<4x64xf32>
    %c92 = arith.constant 92 : index
    %c0_233 = arith.constant 0 : index
    %506 = vector.load %arg10[%c92, %c0_233] : memref<100x64xf32, #tpu.memory_space<vmem>>, vector<4x64xf32>
    tpu.vector_store %arg10[%c92, %c0_233], %505 {strides = array<i32>} : memref<100x64xf32, #tpu.memory_space<vmem>>, vector<4x64xf32>,
    %507 = vector.extract_strided_slice %270 {offsets = [0, 42], sizes = [4, 64], strides = [1, 1]} : vector<4x112xf32> to vector<4x64xf32>
    %c2_i32_234 = arith.constant 2 : i32
    %508 = vector.broadcast %c2_i32_234 : i32 to vector<4x64xi32>
    %509 = arith.addi %287, %508 : vector<4x64xi32>
    %c0_i32_235 = arith.constant 0 : i32
    %510 = vector.broadcast %c0_i32_235 : i32 to vector<4x64xi32>
    %511 = arith.cmpi sge, %509, %510 : vector<4x64xi32>
    %c8_i32_236 = arith.constant 8 : i32
    %512 = vector.broadcast %c8_i32_236 : i32 to vector<4x64xi32>
    %513 = arith.cmpi slt, %509, %512 : vector<4x64xi32>
    %514 = arith.andi %511, %513 : vector<4x64xi1>
    %cst_237 = arith.constant 0.000000e+00 : f32
    %515 = vector.broadcast %cst_237 : f32 to vector<4x64xf32>
    %516 = arith.select %514, %507, %515 : vector<4x64xi1>, vector<4x64xf32>
    %c96 = arith.constant 96 : index
    %c0_238 = arith.constant 0 : index
    %517 = vector.load %arg10[%c96, %c0_238] : memref<100x64xf32, #tpu.memory_space<vmem>>, vector<4x64xf32>
    tpu.vector_store %arg10[%c96, %c0_238], %516 {strides = array<i32>} : memref<100x64xf32, #tpu.memory_space<vmem>>, vector<4x64xf32>,
    %c0_239 = arith.constant 0 : index
    %c0_240 = arith.constant 0 : index
    %518 = vector.load %arg4[%c0_239, %c0_240] : memref<8x100xf32, #tpu.memory_space<vmem>>, vector<8x100xf32>
    %c0_241 = arith.constant 0 : index
    %c0_242 = arith.constant 0 : index
    %519 = vector.load %arg10[%c0_241, %c0_242] : memref<100x64xf32, #tpu.memory_space<vmem>>, vector<100x64xf32>
    %cst_243 = arith.constant dense<0.000000e+00> : vector<8x64xf32>
    %520 = tpu.matmul %518, %519, %cst_243 {dimension_numbers = #tpu.dot_dimension_numbers<[1], [0], [0], [1], [0, 0, 1, 1], [], []>} : vector<8x100xf32>, vector<100x64xf32>, vector<8x64xf32> -> vector<8x64xf32>
    %c0_244 = arith.constant 0 : index
    %c0_245 = arith.constant 0 : index
    %521 = vector.load %arg7[%c0_244, %c0_245] : memref<64x16xf32, #tpu.memory_space<vmem>>, vector<64x16xf32>
    %cst_246 = arith.constant 0.000000e+00 : f32
    %522 = vector.broadcast %cst_246 : f32 to vector<8x1xf32>
    %523 = vector.extract_strided_slice %520 {offsets = [0, 1], sizes = [8, 63], strides = [1, 1]} : vector<8x64xf32> to vector<8x63xf32>
    %524 = tpu.concatenate %523, %522 in 1 : vector<8x63xf32>, vector<8x1xf32> -> vector<8x64xf32>
    %525 = arith.maximumf %520, %524 : vector<8x64xf32>
    %cst_247 = arith.constant 0.000000e+00 : f32
    %526 = vector.broadcast %cst_247 : f32 to vector<8x8xf32>
    %527 = vector.extract_strided_slice %525 {offsets = [0, 8], sizes = [8, 56], strides = [1, 1]} : vector<8x64xf32> to vector<8x56xf32>
    %528 = tpu.concatenate %527, %526 in 1 : vector<8x56xf32>, vector<8x8xf32> -> vector<8x64xf32>
    %529 = arith.maximumf %525, %528 : vector<8x64xf32>
    %cst_248 = arith.constant dense<0.000000e+00> : vector<8x16xf32>
    %530 = tpu.matmul %529, %521, %cst_248 {dimension_numbers = #tpu.dot_dimension_numbers<[1], [0], [0], [1], [0, 0, 1, 1], [], []>} : vector<8x64xf32>, vector<64x16xf32>, vector<8x16xf32> -> vector<8x16xf32>
    %c0_249 = arith.constant 0 : index
    %c0_250 = arith.constant 0 : index
    %531 = vector.load %arg5[%c0_249, %c0_250] : memref<8x1xf32, #tpu.memory_space<vmem>>, vector<8x1xf32>
    %532 = vector.broadcast %531 : vector<8x1xf32> to vector<8x16xf32>
    %533 = arith.addf %530, %532 : vector<8x16xf32>
    %cst_251 = arith.constant 0.000000e+00 : f32
    %534 = vector.broadcast %cst_251 : f32 to vector<8x16xf32>
    %535 = arith.maximumf %533, %534 : vector<8x16xf32>
    %536 = vector.extract_strided_slice %535 {offsets = [0, 0], sizes = [1, 16], strides = [1, 1]} : vector<8x16xf32> to vector<1x16xf32>
    %537 = vector.shape_cast %536 : vector<1x16xf32> to vector<16xf32>
    %c0_252 = arith.constant 0 : index
    %c0_253 = arith.constant 0 : index
    %c0_254 = arith.constant 0 : index
    %538 = vector.load %arg8[%c0_252, %c0_253, %c0_254] : memref<1x1x128xf32, #tpu.memory_space<vmem>>, vector<1x1x16xf32>
    %539 = vector.shape_cast %538 : vector<1x1x16xf32> to vector<16xf32>
    %540 = vector.shape_cast %537 : vector<16xf32> to vector<1x1x16xf32>
    tpu.vector_store %arg8[%c0_252, %c0_253, %c0_254], %540 {strides = array<i32>} : memref<1x1x128xf32, #tpu.memory_space<vmem>>, vector<1x1x16xf32>,
    %541 = vector.extract_strided_slice %535 {offsets = [1, 0], sizes = [1, 16], strides = [1, 1]} : vector<8x16xf32> to vector<1x16xf32>
    %542 = vector.shape_cast %541 : vector<1x16xf32> to vector<16xf32>
    %c0_255 = arith.constant 0 : index
    %c0_256 = arith.constant 0 : index
    %c16_257 = arith.constant 16 : index
    %543 = vector.load %arg8[%c0_255, %c0_256, %c16_257] : memref<1x1x128xf32, #tpu.memory_space<vmem>>, vector<1x1x16xf32>
    %544 = vector.shape_cast %543 : vector<1x1x16xf32> to vector<16xf32>
    %545 = vector.shape_cast %542 : vector<16xf32> to vector<1x1x16xf32>
    tpu.vector_store %arg8[%c0_255, %c0_256, %c16_257], %545 {strides = array<i32>} : memref<1x1x128xf32, #tpu.memory_space<vmem>>, vector<1x1x16xf32>,
    %546 = vector.extract_strided_slice %535 {offsets = [2, 0], sizes = [1, 16], strides = [1, 1]} : vector<8x16xf32> to vector<1x16xf32>
    %547 = vector.shape_cast %546 : vector<1x16xf32> to vector<16xf32>
    %c0_258 = arith.constant 0 : index
    %c0_259 = arith.constant 0 : index
    %c32_260 = arith.constant 32 : index
    %548 = vector.load %arg8[%c0_258, %c0_259, %c32_260] : memref<1x1x128xf32, #tpu.memory_space<vmem>>, vector<1x1x16xf32>
    %549 = vector.shape_cast %548 : vector<1x1x16xf32> to vector<16xf32>
    %550 = vector.shape_cast %547 : vector<16xf32> to vector<1x1x16xf32>
    tpu.vector_store %arg8[%c0_258, %c0_259, %c32_260], %550 {strides = array<i32>} : memref<1x1x128xf32, #tpu.memory_space<vmem>>, vector<1x1x16xf32>,
    %551 = vector.extract_strided_slice %535 {offsets = [3, 0], sizes = [1, 16], strides = [1, 1]} : vector<8x16xf32> to vector<1x16xf32>
    %552 = vector.shape_cast %551 : vector<1x16xf32> to vector<16xf32>
    %c0_261 = arith.constant 0 : index
    %c0_262 = arith.constant 0 : index
    %c48_263 = arith.constant 48 : index
    %553 = vector.load %arg8[%c0_261, %c0_262, %c48_263] : memref<1x1x128xf32, #tpu.memory_space<vmem>>, vector<1x1x16xf32>
    %554 = vector.shape_cast %553 : vector<1x1x16xf32> to vector<16xf32>
    %555 = vector.shape_cast %552 : vector<16xf32> to vector<1x1x16xf32>
    tpu.vector_store %arg8[%c0_261, %c0_262, %c48_263], %555 {strides = array<i32>} : memref<1x1x128xf32, #tpu.memory_space<vmem>>, vector<1x1x16xf32>,
    %556 = vector.extract_strided_slice %535 {offsets = [4, 0], sizes = [1, 16], strides = [1, 1]} : vector<8x16xf32> to vector<1x16xf32>
    %557 = vector.shape_cast %556 : vector<1x16xf32> to vector<16xf32>
    %c0_264 = arith.constant 0 : index
    %c0_265 = arith.constant 0 : index
    %c64_266 = arith.constant 64 : index
    %558 = vector.load %arg8[%c0_264, %c0_265, %c64_266] : memref<1x1x128xf32, #tpu.memory_space<vmem>>, vector<1x1x16xf32>
    %559 = vector.shape_cast %558 : vector<1x1x16xf32> to vector<16xf32>
    %560 = vector.shape_cast %557 : vector<16xf32> to vector<1x1x16xf32>
    tpu.vector_store %arg8[%c0_264, %c0_265, %c64_266], %560 {strides = array<i32>} : memref<1x1x128xf32, #tpu.memory_space<vmem>>, vector<1x1x16xf32>,
    %561 = vector.extract_strided_slice %535 {offsets = [5, 0], sizes = [1, 16], strides = [1, 1]} : vector<8x16xf32> to vector<1x16xf32>
    %562 = vector.shape_cast %561 : vector<1x16xf32> to vector<16xf32>
    %c0_267 = arith.constant 0 : index
    %c0_268 = arith.constant 0 : index
    %c80_269 = arith.constant 80 : index
    %563 = vector.load %arg8[%c0_267, %c0_268, %c80_269] : memref<1x1x128xf32, #tpu.memory_space<vmem>>, vector<1x1x16xf32>
    %564 = vector.shape_cast %563 : vector<1x1x16xf32> to vector<16xf32>
    %565 = vector.shape_cast %562 : vector<16xf32> to vector<1x1x16xf32>
    tpu.vector_store %arg8[%c0_267, %c0_268, %c80_269], %565 {strides = array<i32>} : memref<1x1x128xf32, #tpu.memory_space<vmem>>, vector<1x1x16xf32>,
    %566 = vector.extract_strided_slice %535 {offsets = [6, 0], sizes = [1, 16], strides = [1, 1]} : vector<8x16xf32> to vector<1x16xf32>
    %567 = vector.shape_cast %566 : vector<1x16xf32> to vector<16xf32>
    %c0_270 = arith.constant 0 : index
    %c0_271 = arith.constant 0 : index
    %c96_272 = arith.constant 96 : index
    %568 = vector.load %arg8[%c0_270, %c0_271, %c96_272] : memref<1x1x128xf32, #tpu.memory_space<vmem>>, vector<1x1x16xf32>
    %569 = vector.shape_cast %568 : vector<1x1x16xf32> to vector<16xf32>
    %570 = vector.shape_cast %567 : vector<16xf32> to vector<1x1x16xf32>
    tpu.vector_store %arg8[%c0_270, %c0_271, %c96_272], %570 {strides = array<i32>} : memref<1x1x128xf32, #tpu.memory_space<vmem>>, vector<1x1x16xf32>,
    %571 = vector.extract_strided_slice %535 {offsets = [7, 0], sizes = [1, 16], strides = [1, 1]} : vector<8x16xf32> to vector<1x16xf32>
    %572 = vector.shape_cast %571 : vector<1x16xf32> to vector<16xf32>
    %c0_273 = arith.constant 0 : index
    %c0_274 = arith.constant 0 : index
    %c112 = arith.constant 112 : index
    %573 = vector.load %arg8[%c0_273, %c0_274, %c112] : memref<1x1x128xf32, #tpu.memory_space<vmem>>, vector<1x1x16xf32>
    %574 = vector.shape_cast %573 : vector<1x1x16xf32> to vector<16xf32>
    %575 = vector.shape_cast %572 : vector<16xf32> to vector<1x1x16xf32>
    tpu.vector_store %arg8[%c0_273, %c0_274, %c112], %575 {strides = array<i32>} : memref<1x1x128xf32, #tpu.memory_space<vmem>>, vector<1x1x16xf32>,
    return
  }
  func.func @transform_0(%arg0: i32) -> (i32, i32, i32) {
    %c0_i32 = arith.constant 0 : i32
    %c0_i32_0 = arith.constant 0 : i32
    %c0_i32_1 = arith.constant 0 : i32
    return %arg0, %c0_i32, %c0_i32_0 : i32, i32, i32
  }
  func.func @transform_1(%arg0: i32) -> (i32, i32) {
    %c0_i32 = arith.constant 0 : i32
    %c0_i32_0 = arith.constant 0 : i32
    %c0_i32_1 = arith.constant 0 : i32
    return %c0_i32, %c0_i32_0 : i32, i32
  }
  func.func @transform_2(%arg0: i32) -> (i32, i32) {
    %c0_i32 = arith.constant 0 : i32
    %c0_i32_0 = arith.constant 0 : i32
    %c0_i32_1 = arith.constant 0 : i32
    return %c0_i32, %c0_i32_0 : i32, i32
  }
  func.func @transform_3(%arg0: i32) -> (i32, i32) {
    %c0_i32 = arith.constant 0 : i32
    %c0_i32_0 = arith.constant 0 : i32
    %c0_i32_1 = arith.constant 0 : i32
    return %c0_i32, %c0_i32_0 : i32, i32
  }
  func.func @transform_4(%arg0: i32) -> (i32, i32) {
    %c0_i32 = arith.constant 0 : i32
    %c0_i32_0 = arith.constant 0 : i32
    %c0_i32_1 = arith.constant 0 : i32
    return %c0_i32, %c0_i32_0 : i32, i32
  }
  func.func @transform_5(%arg0: i32) -> (i32, i32) {
    %c0_i32 = arith.constant 0 : i32
    %c0_i32_0 = arith.constant 0 : i32
    %c0_i32_1 = arith.constant 0 : i32
    return %c0_i32, %c0_i32_0 : i32, i32
  }
  func.func @transform_6(%arg0: i32) -> (i32, i32) {
    %c0_i32 = arith.constant 0 : i32
    %c0_i32_0 = arith.constant 0 : i32
    %c0_i32_1 = arith.constant 0 : i32
    return %c0_i32, %c0_i32_0 : i32, i32
  }
  func.func @transform_7(%arg0: i32) -> (i32, i32, i32) {
    %c0_i32 = arith.constant 0 : i32
    %c0_i32_0 = arith.constant 0 : i32
    %c0_i32_1 = arith.constant 0 : i32
    return %arg0, %c0_i32, %c0_i32_0 : i32, i32, i32
  }
}

module attributes {stable_mosaic.version = 11 : i64} {
  func.func @_head_kernel(%arg0: memref<2x128xf32, #tpu.memory_space<vmem>>, %arg1: memref<128x512xf32, #tpu.memory_space<vmem>>, %arg2: memref<1x512xf32, #tpu.memory_space<vmem>>, %arg3: memref<512x10xf32, #tpu.memory_space<vmem>>, %arg4: memref<1x10xf32, #tpu.memory_space<vmem>>, %arg5: memref<2x10xf32, #tpu.memory_space<vmem>>) attributes {dimension_semantics = [], scalar_prefetch = 0 : i64, scratch_operands = 0 : i64, tpu.core_type = #tpu.core_type<tc>} {
    %c0 = arith.constant 0 : index
    %c0_0 = arith.constant 0 : index
    %0 = vector.load %arg0[%c0, %c0_0] : memref<2x128xf32, #tpu.memory_space<vmem>>, vector<2x128xf32>
    %c0_1 = arith.constant 0 : index
    %c0_2 = arith.constant 0 : index
    %1 = vector.load %arg1[%c0_1, %c0_2] : memref<128x512xf32, #tpu.memory_space<vmem>>, vector<128x512xf32>
    %cst = arith.constant dense<0.000000e+00> : vector<2x512xf32>
    %2 = tpu.matmul %0, %1, %cst {dimension_numbers = #tpu.dot_dimension_numbers<[1], [0], [0], [1], [0, 0, 1, 1], [], []>} : vector<2x128xf32>, vector<128x512xf32>, vector<2x512xf32> -> vector<2x512xf32>
    %c0_3 = arith.constant 0 : index
    %c0_4 = arith.constant 0 : index
    %3 = vector.load %arg2[%c0_3, %c0_4] : memref<1x512xf32, #tpu.memory_space<vmem>>, vector<1x512xf32>
    %4 = vector.broadcast %3 : vector<1x512xf32> to vector<2x512xf32>
    %5 = arith.addf %2, %4 : vector<2x512xf32>
    %cst_5 = arith.constant 0.000000e+00 : f32
    %6 = vector.broadcast %cst_5 : f32 to vector<2x512xf32>
    %7 = arith.maximumf %5, %6 : vector<2x512xf32>
    %c0_6 = arith.constant 0 : index
    %c0_7 = arith.constant 0 : index
    %8 = vector.load %arg3[%c0_6, %c0_7] : memref<512x10xf32, #tpu.memory_space<vmem>>, vector<512x10xf32>
    %cst_8 = arith.constant dense<0.000000e+00> : vector<2x10xf32>
    %9 = tpu.matmul %7, %8, %cst_8 {dimension_numbers = #tpu.dot_dimension_numbers<[1], [0], [0], [1], [0, 0, 1, 1], [], []>} : vector<2x512xf32>, vector<512x10xf32>, vector<2x10xf32> -> vector<2x10xf32>
    %c0_9 = arith.constant 0 : index
    %c0_10 = arith.constant 0 : index
    %10 = vector.load %arg4[%c0_9, %c0_10] : memref<1x10xf32, #tpu.memory_space<vmem>>, vector<1x10xf32>
    %11 = vector.broadcast %10 : vector<1x10xf32> to vector<2x10xf32>
    %12 = arith.addf %9, %11 : vector<2x10xf32>
    %cst_11 = arith.constant dense<0xFF800000> : vector<10xf32>
    %13 = vector.multi_reduction <maximumf>, %12, %cst_11 [0] : vector<2x10xf32> to vector<10xf32>
    %14 = vector.shape_cast %13 : vector<10xf32> to vector<1x10xf32>
    %15 = vector.broadcast %14 : vector<1x10xf32> to vector<2x10xf32>
    %16 = arith.subf %12, %15 : vector<2x10xf32>
    %17 = math.exp %16 : vector<2x10xf32>
    %cst_12 = arith.constant dense<0.000000e+00> : vector<10xf32>
    %18 = vector.multi_reduction <add>, %17, %cst_12 [0] : vector<2x10xf32> to vector<10xf32>
    %19 = vector.shape_cast %18 : vector<10xf32> to vector<1x10xf32>
    %20 = math.log %19 : vector<1x10xf32>
    %21 = arith.addf %20, %14 : vector<1x10xf32>
    %22 = vector.broadcast %21 : vector<1x10xf32> to vector<2x10xf32>
    %23 = arith.subf %12, %22 : vector<2x10xf32>
    %c0_13 = arith.constant 0 : index
    %c0_14 = arith.constant 0 : index
    %24 = vector.load %arg5[%c0_13, %c0_14] : memref<2x10xf32, #tpu.memory_space<vmem>>, vector<2x10xf32>
    tpu.vector_store %arg5[%c0_13, %c0_14], %23 {strides = array<i32>} : memref<2x10xf32, #tpu.memory_space<vmem>>, vector<2x10xf32>,
    return
  }
}

</mosaic_0001>

<bundles_post_ra>
// kernel: convnet_forward.3
= control target key start
LH: loop header
LB: loop body
LE: loop exit
PB: predicated region body
PF: predicated region fallthrough
CT: control target
= control target key end

     0   :  { %s829_s0 = inlined_call_operand.vmem [shape: f32[2,128], index: 0, kind: input, shape index: {}]   ;;  %s830_s1 = inlined_call_operand.vmem [shape: f32[128,512], index: 1, kind: input, shape index: {}]   ;;  %s831_s2 = inlined_call_operand.vmem [shape: f32[1,512], index: 2, kind: input, shape index: {}]   ;;  %s832_s3 = inlined_call_operand.vmem [shape: f32[512,10], index: 3, kind: input, shape index: {}]   ;;  %s833_s4 = inlined_call_operand.vmem [shape: f32[1,10], index: 4, kind: input, shape index: {}]   ;;  %s834_s5 = inlined_call_operand.hbm [shape: f32[2,10], index: 5, kind: output, shape index: {}]  }
   0x1   :  { %v84_v0 = vld [vmem:[%s830_s1 + $0x1f0] sm:$0xff]  ;;  %v85_v2 = vld [vmem:[%s830_s1 + $0x1f8] sm:$0xff]  ;;  %v82_v6 = vld [vmem:[%s830_s1 + $0x1e0] sm:$0xff] }
   0x2   :  { %v80_v1 = vld [vmem:[%s830_s1 + $0x1d0] sm:$0xff]  ;;  %136 = vmatpush.msra.mxu2 %v84_v0  ;;  %156 = vmatpush.msra.mxu3 %v85_v2  ;;  %v81_v3 = vld [vmem:[%s830_s1 + $0x1d8] sm:$0xff]  ;;  %v78_v7 = vld [vmem:[%s830_s1 + $0x1c0] sm:$0xff] }
   0x3   :  { %v76_v4 = vld [vmem:[%s830_s1 + $0x1b0] sm:$0xff]  ;;  %v77_v5 = vld [vmem:[%s830_s1 + $0x1b8] sm:$0xff]  ;;  %v83_v8 = vld [vmem:[%s830_s1 + $0x1e8] sm:$0xff]  ;;  %96 = vmatpush.msra.mxu0 %v82_v6 }
   0x4   :  { %137 = vmatpush.msra.mxu2 %v80_v1  ;;  %157 = vmatpush.msra.mxu3 %v81_v3  ;;  %v72_v9 = vld [vmem:[%s830_s1 + $0x190] sm:$0xff]  ;;  %v73_v10 = vld [vmem:[%s830_s1 + $0x198] sm:$0xff]  ;;  %v74_v11 = vld [vmem:[%s830_s1 + $0x1a0] sm:$0xff] }
   0x5   :  { %116 = vmatpush.msra.mxu1 %v83_v8  ;;  %v79_v12 = vld [vmem:[%s830_s1 + $0x1c8] sm:$0xff]  ;;  %v68_v13 = vld [vmem:[%s830_s1 + $0x170] sm:$0xff]  ;;  %97 = vmatpush.msra.mxu0 %v78_v7  ;;  %v69_v14 = vld [vmem:[%s830_s1 + $0x178] sm:$0xff] }
   0x6   :  { %138 = vmatpush.msra.mxu2 %v76_v4  ;;  %158 = vmatpush.msra.mxu3 %v77_v5  ;;  %v75_v15 = vld [vmem:[%s830_s1 + $0x1a8] sm:$0xff]  ;;  %v70_v16 = vld [vmem:[%s830_s1 + $0x180] sm:$0xff]  ;;  %v64_v18 = vld [vmem:[%s830_s1 + $0x150] sm:$0xff] }
   0x7   :  { %117 = vmatpush.msra.mxu1 %v79_v12  ;;  %v71_v17 = vld [vmem:[%s830_s1 + $0x188] sm:$0xff]  ;;  %98 = vmatpush.msra.mxu0 %v74_v11  ;;  %v65_v19 = vld [vmem:[%s830_s1 + $0x158] sm:$0xff]  ;;  %v66_v20 = vld [vmem:[%s830_s1 + $0x160] sm:$0xff] }
   0x8   :  { %139 = vmatpush.msra.mxu2 %v72_v9  ;;  %159 = vmatpush.msra.mxu3 %v73_v10  ;;  %v67_v21 = vld [vmem:[%s830_s1 + $0x168] sm:$0xff]  ;;  %v60_v22 = vld [vmem:[%s830_s1 + $0x130] sm:$0xff]  ;;  %v61_v23 = vld [vmem:[%s830_s1 + $0x138] sm:$0xff] }
   0x9   :  { %118 = vmatpush.msra.mxu1 %v75_v15  ;;  %99 = vmatpush.msra.mxu0 %v70_v16  ;;  %v62_v24 = vld [vmem:[%s830_s1 + $0x140] sm:$0xff]  ;;  %v63_v25 = vld [vmem:[%s830_s1 + $0x148] sm:$0xff]  ;;  %v56_v26 = vld [vmem:[%s830_s1 + $0x110] sm:$0xff] }
   0xa   :  { %140 = vmatpush.msra.mxu2 %v68_v13  ;;  %160 = vmatpush.msra.mxu3 %v69_v14  ;;  %v57_v27 = vld [vmem:[%s830_s1 + $0x118] sm:$0xff]  ;;  %v58_v28 = vld [vmem:[%s830_s1 + $0x120] sm:$0xff]  ;;  %v59_v29 = vld [vmem:[%s830_s1 + $0x128] sm:$0xff] }
   0xb   :  { %119 = vmatpush.msra.mxu1 %v71_v17  ;;  %100 = vmatpush.msra.mxu0 %v66_v20  ;;  %v52_v30 = vld [vmem:[%s830_s1 + $0xf0] sm:$0xff]  ;;  %v53_v31 = vld [vmem:[%s830_s1 + $0xf8] sm:$0xff]  ;;  %v54_v32 = vld [vmem:[%s830_s1 + $0x100] sm:$0xff] }
   0xc   :  { %141 = vmatpush.msra.mxu2 %v64_v18  ;;  %161 = vmatpush.msra.mxu3 %v65_v19  ;;  %v55_v33 = vld [vmem:[%s830_s1 + $0x108] sm:$0xff]  ;;  %v48_v34 = vld [vmem:[%s830_s1 + $0xd0] sm:$0xff]  ;;  %v49_v35 = vld [vmem:[%s830_s1 + $0xd8] sm:$0xff] }
   0xd   :  { %120 = vmatpush.msra.mxu1 %v67_v21  ;;  %101 = vmatpush.msra.mxu0 %v62_v24  ;;  %v50_v36 = vld [vmem:[%s830_s1 + $0xe0] sm:$0xff]  ;;  %v51_v37 = vld [vmem:[%s830_s1 + $0xe8] sm:$0xff]  ;;  %v44_v38 = vld [vmem:[%s830_s1 + $0xb0] sm:$0xff] }
   0xe   :  { %142 = vmatpush.msra.mxu2 %v60_v22  ;;  %162 = vmatpush.msra.mxu3 %v61_v23  ;;  %v45_v39 = vld [vmem:[%s830_s1 + $0xb8] sm:$0xff]  ;;  %v46_v40 = vld [vmem:[%s830_s1 + $0xc0] sm:$0xff]  ;;  %v47_v41 = vld [vmem:[%s830_s1 + $0xc8] sm:$0xff] }
   0xf   :  { %121 = vmatpush.msra.mxu1 %v63_v25  ;;  %102 = vmatpush.msra.mxu0 %v58_v28  ;;  %v40_v42 = vld [vmem:[%s830_s1 + $0x90] sm:$0xff]  ;;  %v41_v43 = vld [vmem:[%s830_s1 + $0x98] sm:$0xff]  ;;  %v42_v44 = vld [vmem:[%s830_s1 + $0xa0] sm:$0xff] }
  0x10   :  { %143 = vmatpush.msra.mxu2 %v56_v26  ;;  %163 = vmatpush.msra.mxu3 %v57_v27  ;;  %v43_v45 = vld [vmem:[%s830_s1 + $0xa8] sm:$0xff]  ;;  %v36_v46 = vld [vmem:[%s830_s1 + $0x70] sm:$0xff]  ;;  %v37_v47 = vld [vmem:[%s830_s1 + $0x78] sm:$0xff] }
  0x11   :  { %122 = vmatpush.msra.mxu1 %v59_v29  ;;  %103 = vmatpush.msra.mxu0 %v54_v32  ;;  %v38_v48 = vld [vmem:[%s830_s1 + $0x80] sm:$0xff]  ;;  %v39_v49 = vld [vmem:[%s830_s1 + $0x88] sm:$0xff]  ;;  %v32_v50 = vld [vmem:[%s830_s1 + $0x50] sm:$0xff] }
  0x12   :  { %144 = vmatpush.msra.mxu2 %v52_v30  ;;  %164 = vmatpush.msra.mxu3 %v53_v31  ;;  %v33_v51 = vld [vmem:[%s830_s1 + $0x58] sm:$0xff]  ;;  %v34_v52 = vld [vmem:[%s830_s1 + $0x60] sm:$0xff]  ;;  %v35_v53 = vld [vmem:[%s830_s1 + $0x68] sm:$0xff] }
  0x13   :  { %123 = vmatpush.msra.mxu1 %v55_v33  ;;  %104 = vmatpush.msra.mxu0 %v50_v36  ;;  %v28_v54 = vld [vmem:[%s830_s1 + $0x30] sm:$0xff]  ;;  %v29_v55 = vld [vmem:[%s830_s1 + $0x38] sm:$0xff]  ;;  %v30_v56 = vld [vmem:[%s830_s1 + $0x40] sm:$0xff] }
  0x14   :  { %145 = vmatpush.msra.mxu2 %v48_v34  ;;  %165 = vmatpush.msra.mxu3 %v49_v35  ;;  %v31_v57 = vld [vmem:[%s830_s1 + $0x48] sm:$0xff]  ;;  %v24_v58 = vld [vmem:[%s830_s1 + $0x10] sm:$0xff]  ;;  %v25_v59 = vld [vmem:[%s830_s1 + $0x18] sm:$0xff] }
  0x15   :  { %124 = vmatpush.msra.mxu1 %v51_v37  ;;  %105 = vmatpush.msra.mxu0 %v46_v40  ;;  %v21_v60 = vld [vmem:[%s829_s0] sm:$0x3]  ;;  %v27_v62 = vld [vmem:[%s830_s1 + $0x28] sm:$0xff]  ;;  %v227_v63 = vld [vmem:[%s832_s3 + $0x178] sm:$0xff] }
  0x16   :  { %146 = vmatpush.msra.mxu2 %v44_v38  ;;  %166 = vmatpush.msra.mxu3 %v45_v39  ;;  %v26_v61 = vld [vmem:[%s830_s1 + $0x20] sm:$0xff]  ;;  %v243_v0 = vld [vmem:[%s832_s3 + $0x1f8] sm:$0xff]  ;;  %v23_v2 = vld [vmem:[%s830_s1 + $0x8] sm:$0xff] }
  0x17   :  { %125 = vmatpush.msra.mxu1 %v47_v41  ;;  %106 = vmatpush.msra.mxu0 %v42_v44  ;;  %v22_v1 = vld [vmem:[%s830_s1] sm:$0xff]  ;;  %v195_v3 = vld [vmem:[%s832_s3 + $0x78] sm:$0xff]  ;;  %v226_v4 = vld [vmem:[%s832_s3 + $0x170] sm:$0xff] }
  0x18   :  { %147 = vmatpush.msra.mxu2 %v40_v42  ;;  %167 = vmatpush.msra.mxu3 %v41_v43  ;;  %v211_v5 = vld [vmem:[%s832_s3 + $0xf8] sm:$0xff]  ;;  %v242_v6 = vld [vmem:[%s832_s3 + $0x1f0] sm:$0xff]  ;;  %v225_v8 = vld [vmem:[%s832_s3 + $0x168] sm:$0xff] }
  0x19   :  { %126 = vmatpush.msra.mxu1 %v43_v45  ;;  %107 = vmatpush.msra.mxu0 %v38_v48  ;;  %v194_v7 = vld [vmem:[%s832_s3 + $0x70] sm:$0xff]  ;;  %v193_v9 = vld [vmem:[%s832_s3 + $0x68] sm:$0xff]  ;;  %v224_v12 = vld [vmem:[%s832_s3 + $0x160] sm:$0xff] }
  0x1a   :  { %148 = vmatpush.msra.mxu2 %v36_v46  ;;  %168 = vmatpush.msra.mxu3 %v37_v47  ;;  %v210_v10 = vld [vmem:[%s832_s3 + $0xf0] sm:$0xff]  ;;  %v241_v11 = vld [vmem:[%s832_s3 + $0x1e8] sm:$0xff] }
  0x1b   :  { %127 = vmatpush.msra.mxu1 %v39_v49  ;;  %108 = vmatpush.msra.mxu0 %v34_v52 }
  0x1c   :  { %149 = vmatpush.msra.mxu2 %v32_v50  ;;  %169 = vmatpush.msra.mxu3 %v33_v51 }
  0x1d   :  { %128 = vmatpush.msra.mxu1 %v35_v53  ;;  %109 = vmatpush.msra.mxu0 %v30_v56 }
  0x1e   :  { %150 = vmatpush.msra.mxu2 %v28_v54  ;;  %170 = vmatpush.msra.mxu3 %v29_v55 }
  0x1f   :  { %129 = vmatpush.msra.mxu1 %v31_v57  ;;  %110 = vmatpush.msra.mxu0 %v26_v61 }
  0x20   :  { %151 = vmatpush.msra.mxu2 %v24_v58  ;;  %171 = vmatpush.msra.mxu3 %v25_v59 }
  0x21   :  { %152 = vmatmul.f32.vlgmr.msra.gmra.mxu2 %v21_v60  ;;  %172 = vmatmul.f32.vlgmr.msra.gmra.mxu3 %v21_v60 }
  0x22   :  { %130 = vmatpush.msra.mxu1 %v27_v62  ;;  %288 = vmatpush.msrb.mxu2 %v227_v63 }
  0x23   :  { %308 = vmatpush.msrb.mxu3 %v243_v0  ;;  %111 = vmatpush.msra.mxu0 %v22_v1 }
  0x24   :  { %131 = vmatpush.msra.mxu1 %v23_v2  ;;  %112 = vmatmul.f32.vlgmr.msra.gmra.mxu0 %v21_v60 }
  0x25   :  { %132 = vmatmul.f32.vlgmr.msra.gmra.mxu1 %v21_v60  ;;  %248 = vmatpush.msrb.mxu0 %v195_v3 }
  0x26   :  { %289 = vmatpush.msrb.mxu2 %v226_v4  ;;  %268 = vmatpush.msrb.mxu1 %v211_v5 }
  0x27   :  { %309 = vmatpush.msrb.mxu3 %v242_v6 }
  0x28   :  { %10 = vsyncpa [#allocation3], 0  ;;  %249 = vmatpush.msrb.mxu0 %v194_v7  ;;  %290 = vmatpush.msrb.mxu2 %v225_v8  ;;  %v209_v13 = vld [vmem:[%s832_s3 + $0xe8] sm:$0xff]  ;;  %v240_v14 = vld [vmem:[%s832_s3 + $0x1e0] sm:$0xff]  ;;  %vm328_vm0 = vcmask 74752   ;;  %s358_s21 = sshll.u32 %s834_s5, 4  ;;  %s359_s21 = int_to_ptr.hbm [resolvable:$true] %s358_s21 }
  0x29   :  { %269 = vmatpush.msrb.mxu1 %v210_v10  ;;  %310 = vmatpush.msrb.mxu3 %v241_v11  ;;  %v192_v15 = vld [vmem:[%s832_s3 + $0x60] sm:$0xff]  ;;  %v223_v16 = vld [vmem:[%s832_s3 + $0x158] sm:$0xff]  ;;  %v222_v20 = vld [vmem:[%s832_s3 + $0x150] sm:$0xff] }
  0x2a   :  { %250 = vmatpush.msrb.mxu0 %v193_v9  ;;  %291 = vmatpush.msrb.mxu2 %v224_v12  ;;  %v208_v17 = vld [vmem:[%s832_s3 + $0xe0] sm:$0xff]  ;;  %v239_v18 = vld [vmem:[%s832_s3 + $0x1d8] sm:$0xff]  ;;  %v238_v22 = vld [vmem:[%s832_s3 + $0x1d0] sm:$0xff] }
  0x2b   :  { %270 = vmatpush.msrb.mxu1 %v209_v13  ;;  %311 = vmatpush.msrb.mxu3 %v240_v14  ;;  %v191_v19 = vld [vmem:[%s832_s3 + $0x58] sm:$0xff]  ;;  %v190_v23 = vld [vmem:[%s832_s3 + $0x50] sm:$0xff]  ;;  %v221_v24 = vld [vmem:[%s832_s3 + $0x148] sm:$0xff] }
  0x2c   :  { %251 = vmatpush.msrb.mxu0 %v192_v15  ;;  %292 = vmatpush.msrb.mxu2 %v223_v16  ;;  %v207_v21 = vld [vmem:[%s832_s3 + $0xd8] sm:$0xff]  ;;  %v206_v25 = vld [vmem:[%s832_s3 + $0xd0] sm:$0xff]  ;;  %v237_v26 = vld [vmem:[%s832_s3 + $0x1c8] sm:$0xff] }
  0x2d   :  { %271 = vmatpush.msrb.mxu1 %v208_v17  ;;  %312 = vmatpush.msrb.mxu3 %v239_v18  ;;  %v189_v27 = vld [vmem:[%s832_s3 + $0x48] sm:$0xff]  ;;  %v220_v28 = vld [vmem:[%s832_s3 + $0x140] sm:$0xff]  ;;  %v219_v32 = vld [vmem:[%s832_s3 + $0x138] sm:$0xff] }
  0x2e   :  { %252 = vmatpush.msrb.mxu0 %v191_v19  ;;  %293 = vmatpush.msrb.mxu2 %v222_v20  ;;  %v205_v29 = vld [vmem:[%s832_s3 + $0xc8] sm:$0xff]  ;;  %v236_v30 = vld [vmem:[%s832_s3 + $0x1c0] sm:$0xff]  ;;  %v235_v34 = vld [vmem:[%s832_s3 + $0x1b8] sm:$0xff] }
  0x2f   :  { %272 = vmatpush.msrb.mxu1 %v207_v21  ;;  %313 = vmatpush.msrb.mxu3 %v238_v22  ;;  %v188_v31 = vld [vmem:[%s832_s3 + $0x40] sm:$0xff]  ;;  %v187_v35 = vld [vmem:[%s832_s3 + $0x38] sm:$0xff]  ;;  %v218_v36 = vld [vmem:[%s832_s3 + $0x130] sm:$0xff] }
  0x30   :  { %253 = vmatpush.msrb.mxu0 %v190_v23  ;;  %294 = vmatpush.msrb.mxu2 %v221_v24  ;;  %v204_v33 = vld [vmem:[%s832_s3 + $0xc0] sm:$0xff]  ;;  %v203_v37 = vld [vmem:[%s832_s3 + $0xb8] sm:$0xff]  ;;  %v234_v38 = vld [vmem:[%s832_s3 + $0x1b0] sm:$0xff] }
  0x31   :  { %273 = vmatpush.msrb.mxu1 %v206_v25  ;;  %314 = vmatpush.msrb.mxu3 %v237_v26  ;;  %v186_v39 = vld [vmem:[%s832_s3 + $0x30] sm:$0xff]  ;;  %v217_v40 = vld [vmem:[%s832_s3 + $0x128] sm:$0xff]  ;;  %v216_v44 = vld [vmem:[%s832_s3 + $0x120] sm:$0xff] }
  0x32   :  { %254 = vmatpush.msrb.mxu0 %v189_v27  ;;  %295 = vmatpush.msrb.mxu2 %v220_v28  ;;  %v202_v41 = vld [vmem:[%s832_s3 + $0xb0] sm:$0xff]  ;;  %v233_v42 = vld [vmem:[%s832_s3 + $0x1a8] sm:$0xff]  ;;  %v232_v46 = vld [vmem:[%s832_s3 + $0x1a0] sm:$0xff] }
  0x33   :  { %274 = vmatpush.msrb.mxu1 %v205_v29  ;;  %315 = vmatpush.msrb.mxu3 %v236_v30  ;;  %v185_v43 = vld [vmem:[%s832_s3 + $0x28] sm:$0xff]  ;;  %v184_v47 = vld [vmem:[%s832_s3 + $0x20] sm:$0xff]  ;;  %v215_v48 = vld [vmem:[%s832_s3 + $0x118] sm:$0xff] }
  0x34   :  { %255 = vmatpush.msrb.mxu0 %v188_v31  ;;  %296 = vmatpush.msrb.mxu2 %v219_v32  ;;  %v201_v45 = vld [vmem:[%s832_s3 + $0xa8] sm:$0xff]  ;;  %v183_v49 = vld [vmem:[%s832_s3 + $0x18] sm:$0xff]  ;;  %v200_v50 = vld [vmem:[%s832_s3 + $0xa0] sm:$0xff] }
  0x35   :  { %275 = vmatpush.msrb.mxu1 %v204_v33  ;;  %316 = vmatpush.msrb.mxu3 %v235_v34  ;;  %v214_v51 = vld [vmem:[%s832_s3 + $0x110] sm:$0xff]  ;;  %v231_v52 = vld [vmem:[%s832_s3 + $0x198] sm:$0xff]  ;;  %v213_v55 = vld [vmem:[%s832_s3 + $0x108] sm:$0xff] }
  0x36   :  { %256 = vmatpush.msrb.mxu0 %v187_v35  ;;  %297 = vmatpush.msrb.mxu2 %v218_v36  ;;  %v182_v53 = vld [vmem:[%s832_s3 + $0x10] sm:$0xff]  ;;  %v199_v54 = vld [vmem:[%s832_s3 + $0x98] sm:$0xff]  ;;  %v181_v57 = vld [vmem:[%s832_s3 + $0x8] sm:$0xff] }
  0x37   :  { %276 = vmatpush.msrb.mxu1 %v203_v37  ;;  %317 = vmatpush.msrb.mxu3 %v234_v38  ;;  %v230_v56 = vld [vmem:[%s832_s3 + $0x190] sm:$0xff]  ;;  %v212_v59 = vld [vmem:[%s832_s3 + $0x100] sm:$0xff]  ;;  %v229_v60 = vld [vmem:[%s832_s3 + $0x188] sm:$0xff] }
  0x38   :  { %257 = vmatpush.msrb.mxu0 %v186_v39  ;;  %298 = vmatpush.msrb.mxu2 %v217_v40  ;;  %v198_v58 = vld [vmem:[%s832_s3 + $0x90] sm:$0xff]  ;;  %v180_v61 = vld [vmem:[%s832_s3] sm:$0xff]  ;;  %v197_v62 = vld [vmem:[%s832_s3 + $0x88] sm:$0xff] }
  0x39   :  { %277 = vmatpush.msrb.mxu1 %v202_v41  ;;  %318 = vmatpush.msrb.mxu3 %v233_v42  ;;  %v228_v63 = vld [vmem:[%s832_s3 + $0x180] sm:$0xff] }
  0x3a   :  { %258 = vmatpush.msrb.mxu0 %v185_v43  ;;  %299 = vmatpush.msrb.mxu2 %v216_v44  ;;  %v196_v0 = vld [vmem:[%s832_s3 + $0x80] sm:$0xff] }
  0x3b   :  { %278 = vmatpush.msrb.mxu1 %v201_v45  ;;  %319 = vmatpush.msrb.mxu3 %v232_v46  ;;  %v86_v1 = vld [vmem:[%s831_s2] sm:$0xf] }
  0x3c   :  { %259 = vmatpush.msrb.mxu0 %v184_v47  ;;  %300 = vmatpush.msrb.mxu2 %v215_v48  ;;  %v88_v2 = vperm.slane %v86_v1, 0  ;;  %v89_v3 = vperm.slane %v86_v1, 1  ;;  %v90_v4 = vperm.slane %v86_v1, 2  ;;  %v91_v5 = vperm.slane %v86_v1, 3  ;;  %v368_v18 = vld [vmem:[%s833_s4] ss:$0 sm:$0xff] }
  0x3d   :  { %279 = vmatpush.msrb.mxu1 %v200_v50  ;;  %320 = vmatpush.msrb.mxu3 %v231_v52  ;;  %s399_s4 = smov [#allocation2]  }
  0x3e   :  { %260 = vmatpush.msrb.mxu0 %v183_v49  ;;  %301 = vmatpush.msrb.mxu2 %v214_v51  ;;  %s356_s18 = sshll.u32 %s399_s4, 4  ;;  %s357_s18 = int_to_ptr.vmem [resolvable:$true] %s356_s18 }
  0x3f   :  { %280 = vmatpush.msrb.mxu1 %v199_v54  ;;  %321 = vmatpush.msrb.mxu3 %v230_v56 }
  0x40   :  { %261 = vmatpush.msrb.mxu0 %v182_v53  ;;  %302 = vmatpush.msrb.mxu2 %v213_v55 }
  0x41   :  { %281 = vmatpush.msrb.mxu1 %v198_v58  ;;  %322 = vmatpush.msrb.mxu3 %v229_v60 }
  0x42   :  { %262 = vmatpush.msrb.mxu0 %v181_v57  ;;  %303 = vmatpush.msrb.mxu2 %v212_v59 }
  0x43   :  { %282 = vmatpush.msrb.mxu1 %v197_v62  ;;  %323 = vmatpush.msrb.mxu3 %v228_v63 }
  0x44   :  { %263 = vmatpush.msrb.mxu0 %v180_v61 }
  0x45   :  { %283 = vmatpush.msrb.mxu1 %v196_v0 }
  0xa1   :  { %v113_v6 = vpop.f32.mrf.mxu0 }
  0xa2   :  { %v133_v7 = vpop.f32.mrf.mxu1  ;;  %v114_v8 = vadd.f32 %v113_v6, %v88_v2 }
  0xa3   :  { %v134_v9 = vadd.f32 %v133_v7, %v89_v3 }
  0xa4   :  { %v153_v10 = vpop.f32.mrf.mxu2  ;;  %v173_v11 = vpop.f32.mrf.mxu3  ;;  %v176_v13 = vmax.f32 %v114_v8, 0.0 }
  0xa5   :  { %v154_v12 = vadd.f32 %v153_v10, %v90_v4  ;;  %v174_v14 = vadd.f32 %v173_v11, %v91_v5  ;;  %v177_v15 = vmax.f32 %v134_v9, 0.0 }
  0xa6   :  { %264 = vmatmul.f32.vlgmr.msrb.gmra.mxu0 %v176_v13 }
  0xa7   :  { %v178_v16 = vmax.f32 %v154_v12, 0.0  ;;  %v179_v17 = vmax.f32 %v174_v14, 0.0  ;;  %284 = vmatmul.f32.vlgmr.msrb.gmra.mxu1 %v177_v15 }
  0xa9   :  { %304 = vmatmul.f32.vlgmr.msrb.gmra.mxu2 %v178_v16  ;;  %324 = vmatmul.f32.vlgmr.msrb.gmra.mxu3 %v179_v17 }
 0x123   :  { %v265_v19 = vpop.f32.mrf.mxu0 }
 0x124   :  { %v266_v20 = vadd.f32 %v368_v18, %v265_v19  ;;  %v285_v21 = vpop.f32.mrf.mxu1 }
 0x126   :  { %v286_v22 = vadd.f32 %v285_v21, %v266_v20 }
 0x12c   :  { %v305_v23 = vpop.f32.mrf.mxu2  ;;  %v325_v24 = vpop.f32.mrf.mxu3 }
 0x12d   :  { %v306_v25 = vadd.f32 %v305_v23, %v286_v22 }
 0x12f   :  { %v326_v26 = vadd.f32 %v325_v24, %v306_v25 }
 0x131   :  { %v329_v27 = vsel %vm328_vm0, %v326_v26, -inf }
 0x132   :  { %v330_v28 = vrot.slane %v329_v27, 4 }
 0x134   :  { %v331_v29 = vmax.f32 %v329_v27, %v330_v28 }
 0x136   :  { %v332_v30 = vrot.slane %v331_v29, 2 }
 0x138   :  { %v333_v31 = vmax.f32 %v331_v29, %v332_v30 }
 0x13a   :  { %v334_v32 = vrot.slane %v333_v31, 1 }
 0x13c   :  { %v335_v33 = vmax.f32 %v333_v31, %v334_v32 }
 0x13e   :  { %v336_v34 = vsub.f32 %v326_v26, %v335_v33 }
 0x140   :  { %v337_v35 = vmul.f32 1.442695, %v336_v34 }
 0x142   :  { %369 = vpow2.f32 %v337_v35 }
 0x148   :  { %v370_v36 = vpop.eup %369 }
 0x149   :  { %v339_v37 = vsel %vm328_vm0, %v370_v36, 0.0 }
 0x14a   :  { %v340_v38 = vrot.slane %v339_v37, 4 }
 0x14c   :  { %v341_v39 = vadd.f32 %v340_v38, %v339_v37 }
 0x14e   :  { %v342_v40 = vrot.slane %v341_v39, 2 }
 0x150   :  { %v343_v41 = vadd.f32 %v342_v40, %v341_v39 }
 0x152   :  { %v344_v42 = vrot.slane %v343_v41, 1 }
 0x154   :  { %v345_v43 = vadd.f32 %v344_v42, %v343_v41 }
 0x156   :  { %371 = vlog2.f32 %v345_v43 }
 0x15c   :  { %v372_v44 = vpop.eup %371 }
 0x15d   :  { %v347_v45 = vmul.f32 0.6931472, %v372_v44 }
 0x15f   :  { %v348_v46 = vadd.f32 %v347_v45, %v335_v33 }
 0x161   :  { %v349_v47 = vsub.f32 %v326_v26, %v348_v46 }
 0x163   :  { %350 = vst.msk [vmem:[#allocation2] sm:$0x3] %vm328_vm0, %v349_v47 }
 0x164   :  { %361 = dma.vmem_to_hbm [thread:$0]  %s357_s18, 32, %s359_s21, [#allocation3]  }
 0x165   :  { %397 = dma.done.wait [#allocation3], 32  }
 0x166   :  { %398 = vsyncadd [#allocation3], 4294967264 }
 0x167   :  { %366 = vsyncpa [#allocation3], 1 }

// kernel: convnet_forward.2
= control target key start
LH: loop header
LB: loop body
LE: loop exit
PB: predicated region body
PF: predicated region fallthrough
CT: control target
= control target key end

     0   :  { %12 = vsyncpa [#allocation5], 0  ;;  %s1572_s24 = smov 0   ;;  %s2319_s0 = inlined_call_operand.vmem [shape: f32[2,1,256], index: 0, kind: input, shape index: {}]   ;;  %s2320_s1 = inlined_call_operand.vmem [shape: f32[4,25], index: 1, kind: input, shape index: {}]   ;;  %s2321_s2 = inlined_call_operand.vmem [shape: f32[4,1], index: 2, kind: input, shape index: {}]   ;;  %s2322_s3 = inlined_call_operand.vmem [shape: f32[8,100], index: 3, kind: input, shape index: {}]   ;;  %s2323_s4 = inlined_call_operand.vmem [shape: f32[8,1], index: 4, kind: input, shape index: {}]   ;;  %s2324_s5 = inlined_call_operand.vmem [shape: f32[256,64], index: 5, kind: input, shape index: {}]   ;;  %s2325_s6 = inlined_call_operand.hbm [shape: f32[64,16], index: 6, kind: input, shape index: {}]   ;;  %s2326_s7 = inlined_call_operand.vmem [shape: f32[2,1,128], index: 7, kind: output, shape index: {}]  }
   0x1 LB: > { %s227_s27 = sshll.u32 %s2325_s6, 4  ;;  %s1348_s28 = sadd.s32 4294967295, %s1482_s24   ;;  %s1482_s24 = sphi %s1572_s24, %s18_s24   ;;  %s228_s27 = int_to_ptr.hbm [resolvable:$true] %s227_s27 }
   0x2   : > { %p1350_p0 = scmp.ge.s32.totalorder %s1482_s24, 1  ;;  %p201_p1 = scmp.lt.s32.totalorder %s1482_s24, 3 }
   0x3   : > { %p1373_p2 = scmp.eq.s32.totalorder %s1348_s28, 0  ;;  %s1484_s29 = smov [#allocation4]  }
   0x4   : > { %p202_p3 = pnand %p1350_p0, %p201_p1  ;;  %s229_s30 = sshll.u32 %s1484_s29, 4  ;;  %s230_s30 = int_to_ptr.vmem [resolvable:$true] %s229_s30 }
   0x5   : > { %s1485_s8 = smov 128   ;;  %s1486_s9 = smov 8  }
   0x6   : > { %p1369_p4 = pneg %p202_p3  ;;  %252 = sbr.rel (%p202_p3) target bundleno = 1832 (0x728), region = 48 }
   0x8   : > { %p1370_p5 = pnand %p1373_p2, %p1369_p4 }
   0xa   : > { %1372 = dma.hbm_to_vmem [thread:$0]  (!%p1370_p5), %s228_s27, 1024, %s230_s30, [#allocation5], %s1485_s8, %s1485_s8, %s1486_s9  }
   0xb   : > { %1477 = dma.done.wait (%p1373_p2), [#allocation5], 1024  }
   0xc   : > { %1479 = vsyncadd (%p1373_p2), [#allocation5], 4294966272  ;;  %p282_p6 = scmp.lt.s32.totalorder %s1348_s28, 1  ;;  %s2331_s14 = smov 48   ;;  %vm297_vm0 = vcmask 392192   ;;  %vm356_vm1 = vcmask 1040384   ;;  %v303_v24 = vlaneseq }
   0xd   : > { %s1488_s15 = smov 63   ;;  %s1489_s16 = smov 65   ;;  %vm397_vm2 = vcmask 1041408   ;;  %vm822_vm3 = vcmask 375808   ;;  %vm751_vm7 = vcmask 408576   ;;  %vm801_vm10 = vcmask 384000  }
   0xe   : > { %s2340_s28 = smov (!%p282_p6, %s1348_s28), 1  ;;  %s1490_s17 = smov 46   ;;  %v1721_v25 = vand.u32 127, %v303_v24  ;;  %vm1768_vm6 = vcmp.lt.s32.totalorder %v303_v24, 256  ;;  %vm2328_vm13 = vcmask 515072   ;;  %vm772_vm14 = vcmask 400384  }
   0xf   : > { %s1355_s10 = sshll.u32 %s2340_s28, 1  ;;  %s1491_s18 = smov 62   ;;  %vm679_vm15 = vcmask 531456  }
  0x10   : > { %s285_s13 = scalar_lea.vmem %s2319_s0, %s1355_s10  ;;  %s1492_s19 = smov 49   ;;  %v305_v29 = vadd.s32 128, %v1721_v25  ;;  %v1747_v34 = vand.u32 15, %v1721_v25 }
  0x11   : > { %v289_v0 = vld [vmem:[%s285_s13] sm:$0x3]  ;;  %s1493_s20 = smov 47   ;;  %s1494_s21 = smov 50  }
  0x12   : > { %v291_v1 = vperm.slane %v289_v0, 0  ;;  %v292_v2 = vperm.slane %v289_v0, 1  ;;  %s1495_s22 = smov 95   ;;  %s1496_s23 = smov 82   ;;  %v1732_v30 = vand.u32 15, %v305_v29  ;;  %v1753_v37 = vadd.s32 2, %v1747_v34 }
  0x13   : > { %s1497_s25 = smov 81   ;;  %s1498_s26 = smov 94   ;;  %v1794_v52 = vadd.s32 4294967294, %v1747_v34  ;;  %v1818_v0 = vadd.s32 1, %v1747_v34  ;;  %v1858_v29 = vadd.s32 4294967295, %v1747_v34 }
  0x14   : > { %293 = vrot.lane.b32.xlu0 %v291_v1, %s2331_s14  ;;  %s1499_s27 = smov 78   ;;  %s1500_s29 = smov 66   ;;  %v1740_v31 = vadd.s32 2, %v1732_v30  ;;  %vm441_vm5 = vcmp.lt.s32.totalorder %v1753_v37, 16  ;;  %v1781_v47 = vadd.s32 4294967294, %v1732_v30  ;;  %v1807_v57 = vadd.s32 1, %v1732_v30 }
  0x15   : > { %s1501_s30 = smov 79   ;;  %s1502_s8 = smov 114   ;;  %vm332_vm9 = vcmp.ge.s32.totalorder %v1794_v52, 0  ;;  %vm412_vm12 = vcmp.lt.s32.totalorder %v1818_v0, 16 }
  0x16   : > { %s1503_s9 = smov 113   ;;  %s1504_s10 = smov 110   ;;  %vm442_vm4 = vcmp.lt.s32.totalorder %v1740_v31, 16  ;;  %vm333_vm8 = vcmp.ge.s32.totalorder %v1781_v47, 0  ;;  %vm413_vm11 = vcmp.lt.s32.totalorder %v1807_v57, 16 }
  0x17   : > { %s1505_s11 = smov 111   ;;  %s1506_s12 = smov 98  }
  0x18   : > { %s1507_s13 = smov 97  }
  0x1c   : > { %295 = vrot.lane.b32.xlu0 %v292_v2, %s2331_s14 }
  0x86   : > { %v294_v3 = vpop.permute.xlu0 %293 }
  0x87   : > { %v1626_v7 = vsel %vm297_vm0, 0.0, %v294_v3 }
  0x8e   : > { %v296_v4 = vpop.permute.xlu0 %295 }
  0x8f   : > { %v1592_v5 = vsel %vm297_vm0, %v294_v3, %v296_v4  ;;  %v1600_v6 = vsel %vm297_vm0, %v296_v4, 0.0 }
  0x90   : > { %705 = vrot.lane.b32.xlu0 %v1592_v5, %s1488_s15  ;;  %675 = vrot.lane.b32.xlu2 %v1592_v5, %s1489_s16  ;;  %v394_v14 = vrot.slane %v1592_v5, 7  ;;  %v395_v18 = vrot.slane %v1600_v6, 6 }
  0x91   : > { %818 = vrot.lane.b32.xlu1 %v1592_v5, %s1490_s17 }
  0x92   : > { %v396_v19 = vsel %vm356_vm1, %v1626_v7, %v394_v14 }
  0x93   : > { %v398_v20 = vsel %vm397_vm2, %v396_v19, %v395_v18 }
  0x98   : > { %728 = vrot.lane.b32.xlu0 %v1600_v6, %s1491_s18  ;;  %677 = vrot.lane.b32.xlu2 %v1600_v6, %s1489_s16 }
  0x99   : > { %820 = vrot.lane.b32.xlu1 %v1600_v6, %s1490_s17 }
  0xa0   : > { %768 = vrot.lane.b32.xlu0 %v1592_v5, %s1492_s19  ;;  %726 = vrot.lane.b32.xlu2 %v1592_v5, %s1491_s18 }
  0xa1   : > { %707 = vrot.lane.b32.xlu1 %v1600_v6, %s1488_s15 }
  0xa8   : > { %799 = vrot.lane.b32.xlu0 %v1600_v6, %s1493_s20  ;;  %749 = vrot.lane.b32.xlu2 %v1600_v6, %s1494_s21 }
  0xa9   : > { %747 = vrot.lane.b32.xlu1 %v1592_v5, %s1494_s21 }
  0xb0   : > { %521 = vrot.lane.b32.xlu0 %v1600_v6, %s1495_s22  ;;  %797 = vrot.lane.b32.xlu2 %v1592_v5, %s1493_s20 }
  0xb1   : > { %770 = vrot.lane.b32.xlu1 %v1600_v6, %s1492_s19 }
  0xb8   : > { %561 = vrot.lane.b32.xlu0 %v1592_v5, %s1496_s23  ;;  %519 = vrot.lane.b32.xlu2 %v1592_v5, %s1495_s22 }
  0xb9   : > { %816 = vrot.lane.b32.xlu1 %v1626_v7, %s1490_s17  ;;  %s1510_s17 = smov 96  }
  0xc0   : > { %584 = vrot.lane.b32.xlu0 %v1600_v6, %s1497_s25  ;;  %542 = vrot.lane.b32.xlu2 %v1600_v6, %s1498_s26 }
  0xc1   : > { %540 = vrot.lane.b32.xlu1 %v1592_v5, %s1498_s26 }
  0xc8   : > { %633 = vrot.lane.b32.xlu0 %v1592_v5, %s1499_s27  ;;  %582 = vrot.lane.b32.xlu2 %v1592_v5, %s1497_s25 }
  0xc9   : > { %563 = vrot.lane.b32.xlu1 %v1600_v6, %s1496_s23 }
  0xd0   : > { %656 = vrot.lane.b32.xlu0 %v1600_v6, %s1500_s29  ;;  %614 = vrot.lane.b32.xlu2 %v1600_v6, %s1501_s30 }
  0xd1   : > { %612 = vrot.lane.b32.xlu1 %v1592_v5, %s1501_s30 }
  0xd8   : > { %703 = vrot.lane.b32.xlu0 %v1626_v7, %s1488_s15  ;;  %654 = vrot.lane.b32.xlu2 %v1592_v5, %s1500_s29  ;;  %s2329_s15 = smov 64  }
  0xd9   : > { %635 = vrot.lane.b32.xlu1 %v1600_v6, %s1499_s27 }
  0xe0   : > { %766 = vrot.lane.b32.xlu0 %v1626_v7, %s1492_s19  ;;  %745 = vrot.lane.b32.xlu2 %v1626_v7, %s1494_s21  ;;  %s1512_s21 = smov 127   ;;  %s1524_s19 = smov 105  }
  0xe1   : > { %673 = vrot.lane.b32.xlu1 %v1626_v7, %s1489_s16  ;;  %s2330_s16 = smov 80  }
  0xe8   : > { %342 = vrot.lane.b32.xlu0 %v1592_v5, %s1502_s8  ;;  %795 = vrot.lane.b32.xlu2 %v1626_v7, %s1493_s20  ;;  %s1515_s20 = smov 90  }
  0xe9   : > { %724 = vrot.lane.b32.xlu1 %v1626_v7, %s1491_s18  ;;  %s1511_s18 = smov 112  }
  0xea   : > { %v1669_v8 = vpop.permute.xlu2 %675 }
  0xf0   : > { %377 = vrot.lane.b32.xlu0 %v1600_v6, %s1503_s9  ;;  %375 = vrot.lane.b32.xlu2 %v1592_v5, %s1503_s9 }
  0xf1   : > { %344 = vrot.lane.b32.xlu1 %v1600_v6, %s1502_s8 }
  0xf2   : > { %v1677_v9 = vpop.permute.xlu2 %677 }
  0xf8   : > { %447 = vrot.lane.b32.xlu0 %v1592_v5, %s1504_s10  ;;  %420 = vrot.lane.b32.xlu2 %v1600_v6, %s1505_s11 }
  0xf9   : > { %418 = vrot.lane.b32.xlu1 %v1592_v5, %s1505_s11 }
  0xfa   : > { %v1685_v10 = vpop.permute.xlu2 %726 }
 0x100   : > { %470 = vrot.lane.b32.xlu0 %v1600_v6, %s1506_s12  ;;  %468 = vrot.lane.b32.xlu2 %v1592_v5, %s1506_s12 }
 0x101   : > { %449 = vrot.lane.b32.xlu1 %v1600_v6, %s1504_s10 }
 0x102   : > { %v1693_v11 = vpop.permute.xlu0 %705  ;;  %v1695_v12 = vpop.permute.xlu2 %749 }
 0x103   : > { %v819_v13 = vpop.permute.xlu1 %818 }
 0x108   : > { %517 = vrot.lane.b32.xlu0 %v1626_v7, %s1495_s22  ;;  %491 = vrot.lane.b32.xlu2 %v1600_v6, %s1507_s13 }
 0x109   : > { %489 = vrot.lane.b32.xlu1 %v1592_v5, %s1507_s13 }
 0x10a   : > { %v1704_v15 = vpop.permute.xlu0 %728  ;;  %v1706_v16 = vpop.permute.xlu2 %797 }
 0x10b   : > { %v821_v17 = vpop.permute.xlu1 %820 }
 0x10c   : > { %v824_v36 = vsel %vm822_vm3, %v819_v13, %v821_v17  ;;  %v1843_v17 = vadd.s32 4294967295, %v1732_v30 }
 0x10d   : > { %v828_v38 = vsel %vm442_vm4, %v824_v36, 0.0 }
 0x10e   : > { %v831_v43 = vrot.slane %v828_v38, 7  ;;  %vm368_vm2 = vcmp.ge.s32.totalorder %v1843_v17, 0 }
 0x110   : > { %580 = vrot.lane.b32.xlu0 %v1626_v7, %s1497_s25  ;;  %694 = vrot.lane.b32.xlu2 %v398_v20, %s2329_s15  ;;  %s1514_s15 = smov 24   ;;  %s1519_s25 = smov 88  }
 0x111   : > { %787 = vrot.lane.b32.xlu1 %v398_v20, %s2331_s14  ;;  %s1516_s14 = smov 87  }
 0x112   : > { %v1715_v21 = vpop.permute.xlu0 %768  ;;  %v1717_v22 = vpop.permute.xlu2 %519 }
 0x113   : > { %v1719_v23 = vpop.permute.xlu1 %707 }
 0x118   : > { %631 = vrot.lane.b32.xlu0 %v1626_v7, %s1499_s27  ;;  %559 = vrot.lane.b32.xlu2 %v1626_v7, %s1496_s23  ;;  %s1518_s23 = smov 89   ;;  %s1520_s27 = smov 102  }
 0x119   : > { %538 = vrot.lane.b32.xlu1 %v1626_v7, %s1498_s26 }
 0x11a   : > { %v800_v26 = vpop.permute.xlu0 %799  ;;  %v1729_v27 = vpop.permute.xlu2 %542 }
 0x11b   : > { %v748_v28 = vpop.permute.xlu1 %747  ;;  %v803_v62 = vsel %vm801_vm10, %v1706_v16, %v800_v26 }
 0x11c   : > { %v753_v51 = vsel %vm751_vm7, %v748_v28, %v1695_v12  ;;  %v807_v1 = vsel %vm413_vm11, %v803_v62, 0.0  ;;  %v711_v12 = vsel %vm2328_vm13, %v1693_v11, %v1719_v23 }
 0x11d   : > { %v757_v54 = vsel %vm333_vm8, %v753_v51, 0.0  ;;  %v810_v4 = vrot.slane %v807_v1, 7  ;;  %v715_v14 = vsel %vm413_vm11, %v711_v12, 0.0 }
 0x11e   : > { %v760_v58 = vrot.slane %v757_v54, 7  ;;  %v718_v19 = vrot.slane %v715_v14, 7 }
 0x120   : > { %373 = vrot.lane.b32.xlu0 %v1626_v7, %s1503_s9  ;;  %610 = vrot.lane.b32.xlu2 %v1626_v7, %s1501_s30  ;;  %s1522_s30 = smov 106  }
 0x121   : > { %601 = vrot.lane.b32.xlu1 %v398_v20, %s2330_s16  ;;  %s1517_s16 = smov 86  }
 0x122   : > { %v1742_v32 = vpop.permute.xlu0 %521  ;;  %v1744_v33 = vpop.permute.xlu2 %582 }
 0x123   : > { %v1749_v35 = vpop.permute.xlu1 %770 }
 0x124   : > { %v774_v26 = vsel %vm772_vm14, %v1715_v21, %v1749_v35 }
 0x125   : > { %v778_v30 = vsel %vm368_vm2, %v774_v26, 0.0 }
 0x126   : > { %v781_v38 = vrot.slane %v778_v30, 7 }
 0x128   : > { %445 = vrot.lane.b32.xlu0 %v1626_v7, %s1504_s10  ;;  %340 = vrot.lane.b32.xlu2 %v1626_v7, %s1502_s8 }
 0x129   : > { %652 = vrot.lane.b32.xlu1 %v1626_v7, %s1500_s29  ;;  %s1521_s29 = smov 104  }
 0x12a   : > { %v1763_v39 = vpop.permute.xlu0 %561  ;;  %v1765_v40 = vpop.permute.xlu2 %614 }
 0x12b   : > { %v817_v41 = vpop.permute.xlu1 %816 }
 0x12c   : > { %v823_v44 = vsel %vm822_vm3, %v817_v41, %v819_v13  ;;  %vm367_vm3 = vcmp.ge.s32.totalorder %v1858_v29, 0 }
 0x12d   : > { %v827_v45 = vsel %vm441_vm5, %v823_v44, 0.0 }
 0x12e   : > { %v832_v46 = vsel %vm356_vm1, %v827_v45, %v831_v43 }
 0x12f   : > { %835 = vst.msk [vmem:[#allocation2 + $0x30] ss:$8 sm:$0x3] %vm1768_vm6, %v832_v46 }
 0x130   : > { %508 = vrot.lane.b32.xlu0 %v398_v20, %s1510_s17  ;;  %416 = vrot.lane.b32.xlu2 %v1626_v7, %s1505_s11 }
 0x131   : > { %399 = vrot.lane.b32.xlu1 %v398_v20, %s1511_s18 }
 0x132   : > { %v1784_v48 = vpop.permute.xlu0 %584  ;;  %v1786_v49 = vpop.permute.xlu2 %654 }
 0x133   : > { %v1788_v50 = vpop.permute.xlu1 %540 }
 0x136   : > { %v844_v53 = vld [vmem:[#allocation2 + $0x30] sm:$0x1]  ;;  %v845_v47 = vld [vmem:[#allocation2 + $0x38] sm:$0x1] }
 0x137   : > { %1356 = vmatpush.msk.msra.mxu1 %vm356_vm1, %v844_v53 }
 0x138   : > { %487 = vrot.lane.b32.xlu2 %v1626_v7, %s1507_s13 }
 0x139   : > { %466 = vrot.lane.b32.xlu1 %v1626_v7, %s1506_s12 }
 0x13a   : > { %v1804_v55 = vpop.permute.xlu0 %633  ;;  %v746_v56 = vpop.permute.xlu2 %745 }
 0x13b   : > { %v752_v59 = vsel %vm751_vm7, %v746_v56, %v748_v28  ;;  %v1810_v60 = vpop.permute.xlu1 %563  ;;  %vm730_vm7 = vcmask 506880  }
 0x13c   : > { %v756_v61 = vsel %vm332_vm9, %v752_v59, 0.0  ;;  %v732_v53 = vsel %vm730_vm7, %v1685_v10, %v1704_v15 }
 0x13d   : > { %v761_v63 = vsel %vm356_vm1, %v756_v61, %v760_v58 }
 0x13e   : > { %764 = vst.msk [vmem:[#allocation2 + $0x24] ss:$8 sm:$0x3] %vm1768_vm6, %v761_v63 }
 0x142   : > { %v1826_v2 = vpop.permute.xlu0 %656  ;;  %v796_v3 = vpop.permute.xlu2 %795 }
 0x143   : > { %v802_v5 = vsel %vm801_vm10, %v796_v3, %v1706_v16  ;;  %v1830_v6 = vpop.permute.xlu1 %612  ;;  %vm565_vm10 = vcmask 670720  }
 0x144   : > { %v806_v7 = vsel %vm412_vm12, %v802_v5, 0.0  ;;  %v567_v12 = vsel %vm565_vm10, %v1763_v39, %v1810_v60 }
 0x145   : > { %v811_v13 = vsel %vm356_vm1, %v806_v7, %v810_v4  ;;  %v571_v14 = vsel %vm333_vm8, %v567_v12, 0.0 }
 0x146   : > { %814 = vst.msk [vmem:[#allocation2 + $0x27] ss:$8 sm:$0x3] %vm1768_vm6, %v811_v13 }
 0x14a   : > { %v704_v16 = vpop.permute.xlu0 %703  ;;  %v1845_v18 = vpop.permute.xlu2 %375 }
 0x14b   : > { %v710_v20 = vsel %vm2328_vm13, %v704_v16, %v1693_v11  ;;  %v1849_v23 = vpop.permute.xlu1 %635  ;;  %v681_v11 = vsel %vm679_vm15, %v1669_v8, %v1677_v9  ;;  %vm422_vm13 = vcmask 908288  }
 0x14c   : > { %v714_v24 = vsel %vm412_vm12, %v710_v20, 0.0  ;;  %v685_v35 = vsel %vm368_vm2, %v681_v11, 0.0  ;;  %v574_v20 = vrot.slane %v571_v14, 7 }
 0x14d   : > { %v719_v28 = vsel %vm356_vm1, %v714_v24, %v718_v19  ;;  %v688_v43 = vrot.slane %v685_v35, 7 }
 0x14e   : > { %722 = vst.msk [vmem:[#allocation2 + $0x22] ss:$8 sm:$0x3] %vm1768_vm6, %v719_v28 }
 0x152   : > { %v767_v36 = vpop.permute.xlu0 %766  ;;  %v1871_v34 = vpop.permute.xlu2 %420 }
 0x153   : > { %v773_v41 = vsel %vm772_vm14, %v767_v36, %v1715_v21  ;;  %v674_v9 = vpop.permute.xlu1 %673  ;;  %vm2327_vm14 = vcmask 523264  }
 0x154   : > { %v777_v44 = vsel %vm367_vm3, %v773_v41, 0.0  ;;  %v680_v45 = vsel %vm679_vm15, %v674_v9, %v1669_v8  ;;  %v736_v8 = vsel %vm442_vm4, %v732_v53, 0.0  ;;  %vm523_vm15 = vcmask 777216  }
 0x155   : > { %v782_v46 = vsel %vm356_vm1, %v777_v44, %v781_v38  ;;  %v684_v51 = vsel %vm367_vm3, %v680_v45, 0.0  ;;  %v739_v59 = vrot.slane %v736_v8, 7  ;;  %v525_v28 = vsel %vm523_vm15, %v1717_v22, %v1742_v32 }
 0x156   : > { %785 = vst.msk [vmem:[#allocation2 + $0x25] ss:$8 sm:$0x3] %vm1768_vm6, %v782_v46  ;;  %v689_v21 = vsel %vm356_vm1, %v684_v51, %v688_v43  ;;  %v529_v35 = vsel %vm413_vm11, %v525_v28, 0.0 }
 0x157   : > { %692 = vst.msk [vmem:[#allocation2 + $0x20] ss:$8 sm:$0x3] %vm1768_vm6, %v689_v21  ;;  %v532_v32 = vrot.slane %v529_v35, 7 }
 0x15a   : > { %v1892_v54 = vpop.permute.xlu0 %342  ;;  %v1894_v56 = vpop.permute.xlu2 %468 }
 0x15b   : > { %v725_v58 = vpop.permute.xlu1 %724 }
 0x15c   : > { %v731_v15 = vsel %vm730_vm7, %v725_v58, %v1685_v10  ;;  %vm616_vm7 = vcmask 646144  }
 0x15d   : > { %v735_v61 = vsel %vm441_vm5, %v731_v15, 0.0  ;;  %v618_v11 = vsel %vm616_vm7, %v1830_v6, %v1765_v40 }
 0x15e   : > { %v740_v62 = vsel %vm356_vm1, %v735_v61, %v739_v59 }
 0x15f   : > { %743 = vst.msk [vmem:[#allocation2 + $0x23] ss:$8 sm:$0x3] %vm1768_vm6, %v740_v62 }
 0x162   : > { %v1903_v63 = vpop.permute.xlu0 %377  ;;  %v1905_v1 = vpop.permute.xlu2 %491 }
 0x163   : > { %v345_v3 = vpop.permute.xlu1 %344 }
 0x16a   : > { %v1907_v4 = vpop.permute.xlu0 %447  ;;  %v695_v5 = vpop.permute.xlu2 %694 }
 0x16b   : > { %v1909_v7 = vpop.permute.xlu1 %418  ;;  %v696_v10 = vrot.slane %v695_v5, 1 }
 0x16d   : > { %v698_v13 = vsel %vm2327_vm14, %v695_v5, %v696_v10  ;;  %vm346_vm14 = vcmask 932864  }
 0x16e   : > { %701 = vst.msk [vmem:[#allocation2 + $0x21] ss:$8 sm:$0x3] %vm1768_vm6, %v698_v13  ;;  %v348_v51 = vsel %vm346_vm14, %v1892_v54, %v345_v3 }
 0x16f   : > { %v352_v21 = vsel %vm333_vm8, %v348_v51, 0.0 }
 0x170   : > { %v355_v59 = vrot.slane %v352_v21, 7 }
 0x172   : > { %v1919_v16 = vpop.permute.xlu0 %470  ;;  %v560_v19 = vpop.permute.xlu2 %559 }
 0x173   : > { %v1921_v24 = vpop.permute.xlu1 %449  ;;  %v566_v26 = vsel %vm565_vm10, %v560_v19, %v1763_v39  ;;  %v622_v39 = vsel %vm413_vm11, %v618_v11, 0.0  ;;  %vm586_vm10 = vcmask 662528  }
 0x174   : > { %v570_v60 = vsel %vm332_vm9, %v566_v26, 0.0  ;;  %v625_v41 = vrot.slane %v622_v39, 7  ;;  %v588_v46 = vsel %vm586_vm10, %v1744_v33, %v1784_v48 }
 0x175   : > { %v575_v30 = vsel %vm356_vm1, %v570_v60, %v574_v20 }
 0x176   : > { %578 = vst.msk [vmem:[#allocation2 + $0x12] ss:$8 sm:$0x3] %vm1768_vm6, %v575_v30 }
 0x17a   : > { %v518_v36 = vpop.permute.xlu0 %517  ;;  %v611_v38 = vpop.permute.xlu2 %610 }
 0x17b   : > { %v524_v40 = vsel %vm523_vm15, %v518_v36, %v1717_v22  ;;  %v1942_v9 = vpop.permute.xlu1 %489  ;;  %v617_v43 = vsel %vm616_vm7, %v611_v38, %v1830_v6  ;;  %v592_v6 = vsel %vm368_vm2, %v588_v46, 0.0  ;;  %vm544_vm15 = vcmask 769024  }
 0x17c   : > { %v528_v44 = vsel %vm412_vm12, %v524_v40, 0.0  ;;  %v621_v45 = vsel %vm412_vm12, %v617_v43, 0.0  ;;  %vm637_vm7 = vcmask 637952   ;;  %v595_v58 = vrot.slane %v592_v6, 7 }
 0x17d   : > { %v533_v22 = vsel %vm356_vm1, %v528_v44, %v532_v32  ;;  %v626_v53 = vsel %vm356_vm1, %v621_v45, %v625_v41  ;;  %v546_v3 = vsel %vm544_vm15, %v1788_v50, %v1729_v27  ;;  %v639_v13 = vsel %vm637_vm7, %v1804_v55, %v1849_v23 }
 0x17e   : > { %536 = vst.msk [vmem:[#allocation2 + $0x10] ss:$8 sm:$0x3] %vm1768_vm6, %v533_v22  ;;  %v550_v19 = vsel %vm442_vm4, %v546_v3, 0.0  ;;  %v643_v23 = vsel %vm442_vm4, %v639_v13, 0.0 }
 0x17f   : > { %629 = vst.msk [vmem:[#allocation2 + $0x15] ss:$8 sm:$0x3] %vm1768_vm6, %v626_v53  ;;  %v553_v20 = vrot.slane %v550_v19, 7  ;;  %v646_v28 = vrot.slane %v643_v23, 7 }
 0x182   : > { %v581_v48 = vpop.permute.xlu0 %580  ;;  %v341_v8 = vpop.permute.xlu2 %340 }
 0x183   : > { %v587_v15 = vsel %vm586_vm10, %v581_v48, %v1744_v33  ;;  %v788_v61 = vpop.permute.xlu1 %787  ;;  %v347_v62 = vsel %vm346_vm14, %v341_v8, %v1892_v54  ;;  %v424_v33 = vsel %vm422_vm13, %v1909_v7, %v1871_v34  ;;  %vm379_vm14 = vcmask 924672  }
 0x184   : > { %v591_v5 = vsel %vm367_vm3, %v587_v15, 0.0  ;;  %v789_v10 = vrot.slane %v788_v61, 1  ;;  %v351_v12 = vsel %vm332_vm9, %v347_v62, 0.0  ;;  %v428_v34 = vsel %vm413_vm11, %v424_v33, 0.0 }
 0x185   : > { %v596_v54 = vsel %vm356_vm1, %v591_v5, %v595_v58  ;;  %v357_v14 = vsel %vm356_vm1, %v351_v12, %v355_v59  ;;  %vm493_vm10 = vcmask 793600   ;;  %v431_v11 = vrot.slane %v428_v34, 7 }
 0x186   : > { %599 = vst.msk [vmem:[#allocation2 + $0x13] ss:$8 sm:$0x3] %vm1768_vm6, %v596_v54  ;;  %v790_v27 = vsel %vm297_vm0, %v788_v61, %v789_v10  ;;  %v381_v57 = vsel %vm379_vm14, %v1845_v18, %v1903_v63  ;;  %vm658_vm0 = vcmask 539648   ;;  %vm451_vm11 = vcmask 900096  }
 0x187   : > { %793 = vst.msk [vmem:[#allocation2 + $0x26] ss:$8 sm:$0x3] %vm1768_vm6, %v790_v27  ;;  %v385_v0 = vsel %vm368_vm2, %v381_v57, 0.0  ;;  %v453_v48 = vsel %vm451_vm11, %v1907_v4, %v1921_v24  ;;  %v660_v58 = vsel %vm658_vm0, %v1786_v49, %v1826_v2  ;;  %v927_v57 = vld [vmem:[%s2324_s5 + $0xf8] sm:$0xff] }
 0x188   : > { %363 = vst.msk [vmem:[#allocation2] ss:$8 sm:$0x3] %vm1768_vm6, %v357_v14  ;;  %v388_v43 = vrot.slane %v385_v0, 7  ;;  %v457_v29 = vsel %vm442_vm4, %v453_v48, 0.0  ;;  %v664_v24 = vsel %vm333_vm8, %v660_v58, 0.0  ;;  %979 = vmatpush.msra.mxu3 %v927_v57 }
 0x189   : > { %v460_v15 = vrot.slane %v457_v29, 7  ;;  %v667_v62 = vrot.slane %v664_v24, 7  ;;  %vm511_vm4 = vcmask 785408   ;;  %v922_v0 = vld [vmem:[%s2324_s5 + $0xd0] sm:$0xff]  ;;  %v916_v48 = vld [vmem:[%s2324_s5 + $0xa0] sm:$0xff] }
 0x18a   : > { %v632_v26 = vpop.permute.xlu0 %631  ;;  %v417_v60 = vpop.permute.xlu2 %416 }
 0x18b   : > { %v638_v30 = vsel %vm637_vm7, %v632_v26, %v1804_v55  ;;  %v539_v35 = vpop.permute.xlu1 %538  ;;  %v423_v39 = vsel %vm422_vm13, %v417_v60, %v1909_v7  ;;  %v495_v55 = vsel %vm493_vm10, %v1942_v9, %v1905_v1  ;;  %vm472_vm13 = vcmask 801792   ;;  %v837_v60 = vld [vmem:[%s2320_s1] sm:$0xf] }
 0x18c   : > { %v642_v36 = vsel %vm441_vm5, %v638_v30, 0.0  ;;  %v545_v38 = vsel %vm544_vm15, %v539_v35, %v1788_v50  ;;  %v427_v32 = vsel %vm412_vm12, %v423_v39, 0.0  ;;  %v499_v1 = vsel %vm368_vm2, %v495_v55, 0.0  ;;  %v911_v39 = vld [vmem:[%s2324_s5 + $0x78] sm:$0xff]  ;;  %v925_v55 = vld [vmem:[%s2324_s5 + $0xe8] sm:$0xff] }
 0x18d   : > { %v647_v41 = vsel %vm356_vm1, %v642_v36, %v646_v28  ;;  %v549_v7 = vsel %vm441_vm5, %v545_v38, 0.0  ;;  %v432_v63 = vsel %vm356_vm1, %v427_v32, %v431_v11  ;;  %v502_v46 = vrot.slane %v499_v1, 7  ;;  %v910_v36 = vld [vmem:[%s2324_s5 + $0x70] sm:$0xff]  ;;  %959 = vmatpush.msra.mxu2 %v911_v39  ;;  %v909_v32 = vld [vmem:[%s2324_s5 + $0x68] sm:$0xff] }
 0x18e   : > { %650 = vst.msk [vmem:[#allocation2 + $0x16] ss:$8 sm:$0x3] %vm1768_vm6, %v647_v41  ;;  %v554_v40 = vsel %vm356_vm1, %v549_v7, %v553_v20  ;;  %v842_v50 = vld [vmem:[#allocation2 + $0x20] sm:$0xff]  ;;  %vm604_vm12 = vcmask 654336   ;;  %v474_v54 = vsel %vm472_vm13, %v1894_v56, %v1919_v16  ;;  %vm846_vm2 = vcmask 203776  }
 0x18f   : > { %557 = vst.msk [vmem:[#allocation2 + $0x11] ss:$8 sm:$0x3] %vm1768_vm6, %v554_v40  ;;  %869 = vmatpush.msra.mxu1 %v842_v50  ;;  %v478_v19 = vsel %vm333_vm8, %v474_v54, 0.0  ;;  %v926_v38 = vld [vmem:[%s2324_s5 + $0xf0] sm:$0xff]  ;;  %960 = vmatpush.msra.mxu2 %v910_v36  ;;  %v908_v41 = vld [vmem:[%s2324_s5 + $0x60] sm:$0xff] }
 0x190   : > { %435 = vst.msk [vmem:[#allocation2 + $0x3] ss:$8 sm:$0x3] %vm1768_vm6, %v432_v63  ;;  %v481_v34 = vrot.slane %v478_v19, 7  ;;  %980 = vmatpush.msra.mxu3 %v926_v38  ;;  %v924_v7 = vld [vmem:[%s2324_s5 + $0xe0] sm:$0xff]  ;;  %v907_v63 = vld [vmem:[%s2324_s5 + $0x58] sm:$0xff] }
 0x191   : > { %961 = vmatpush.msra.mxu2 %v909_v32  ;;  %v923_v40 = vld [vmem:[%s2324_s5 + $0xd8] sm:$0xff]  ;;  %v906_v50 = vld [vmem:[%s2324_s5 + $0x50] sm:$0xff]  ;;  %v905_v1 = vld [vmem:[%s2324_s5 + $0x48] sm:$0xff]  ;;  %vm1006_vm8 = vcmask 719872   ;;  %vm1176_vm15 = vcmask 1043456  }
 0x192   : > { %v374_v44 = vpop.permute.xlu0 %373  ;;  %v488_v45 = vpop.permute.xlu2 %487  ;;  %981 = vmatpush.msra.mxu3 %v925_v55 }
 0x193   : > { %v380_v51 = vsel %vm379_vm14, %v374_v44, %v1845_v18  ;;  %v602_v22 = vpop.permute.xlu1 %601  ;;  %v494_v53 = vsel %vm493_vm10, %v488_v45, %v1942_v9  ;;  %962 = vmatpush.msra.mxu2 %v908_v41  ;;  %v904_v44 = vld [vmem:[%s2324_s5 + $0x40] sm:$0xff] }
 0x194   : > { %v384_v17 = vsel %vm367_vm3, %v380_v51, 0.0  ;;  %v603_v6 = vrot.slane %v602_v22, 1  ;;  %v498_v21 = vsel %vm367_vm3, %v494_v53, 0.0  ;;  %982 = vmatpush.msra.mxu3 %v924_v7  ;;  %v920_v45 = vld [vmem:[%s2324_s5 + $0xc0] sm:$0xff]  ;;  %v919_v51 = vld [vmem:[%s2324_s5 + $0xb8] sm:$0xff]  ;;  %v918_v53 = vld [vmem:[%s2324_s5 + $0xb0] sm:$0xff] }
 0x195   : > { %v389_v8 = vsel %vm356_vm1, %v384_v17, %v388_v43  ;;  %v503_v18 = vsel %vm356_vm1, %v498_v21, %v502_v46  ;;  %963 = vmatpush.msra.mxu2 %v907_v63  ;;  %v921_v43 = vld [vmem:[%s2324_s5 + $0xc8] sm:$0xff]  ;;  %v903_v46 = vld [vmem:[%s2324_s5 + $0x38] sm:$0xff]  ;;  %v900_v21 = vld [vmem:[%s2324_s5 + $0x20] sm:$0xff]  ;;  %vm1029_vm3 = vcmask 519168  }
 0x196   : > { %392 = vst.msk [vmem:[#allocation2 + $0x1] ss:$8 sm:$0x3] %vm1768_vm6, %v389_v8  ;;  %v605_v9 = vsel %vm604_vm12, %v602_v22, %v603_v6  ;;  %983 = vmatpush.msra.mxu3 %v923_v40  ;;  %v902_v22 = vld [vmem:[%s2324_s5 + $0x30] sm:$0xff]  ;;  %v901_v17 = vld [vmem:[%s2324_s5 + $0x28] sm:$0xff]  ;;  %v899_v8 = vld [vmem:[%s2324_s5 + $0x18] sm:$0xff] }
 0x197   : > { %608 = vst.msk [vmem:[#allocation2 + $0x14] ss:$8 sm:$0x3] %vm1768_vm6, %v605_v9  ;;  %964 = vmatpush.msra.mxu2 %v906_v50  ;;  %v917_v6 = vld [vmem:[%s2324_s5 + $0xa8] sm:$0xff]  ;;  %vm1218_vm12 = vcmask 457728  }
 0x198   : > { %506 = vst.msk [vmem:[#allocation2 + $0x6] ss:$8 sm:$0x3] %vm1768_vm6, %v503_v18  ;;  %984 = vmatpush.msra.mxu3 %v922_v0  ;;  %v915_v18 = vld [vmem:[%s2324_s5 + $0x98] sm:$0xff] }
 0x199   : > { %965 = vmatpush.msra.mxu2 %v905_v1 }
 0x19a   : > { %v446_v59 = vpop.permute.xlu0 %445  ;;  %985 = vmatpush.msra.mxu3 %v921_v43 }
 0x19b   : > { %v452_v2 = vsel %vm451_vm11, %v446_v59, %v1907_v4  ;;  %v653_v61 = vpop.permute.xlu1 %652  ;;  %966 = vmatpush.msra.mxu2 %v904_v44  ;;  %vm2334_vm11 = vcmask 515072  }
 0x19c   : > { %v456_v3 = vsel %vm441_vm5, %v452_v2, 0.0  ;;  %v659_v31 = vsel %vm658_vm0, %v653_v61, %v1786_v49  ;;  %vm402_vm5 = vcmask 916480   ;;  %986 = vmatpush.msra.mxu3 %v920_v45  ;;  %vm1172_vm0 = vcmask 818176  }
 0x19d   : > { %v461_v5 = vsel %vm356_vm1, %v456_v3, %v460_v15  ;;  %v663_v10 = vsel %vm332_vm9, %v659_v31, 0.0  ;;  %967 = vmatpush.msra.mxu2 %v903_v46  ;;  %v914_v3 = vld [vmem:[%s2324_s5 + $0x90] sm:$0xff]  ;;  %v897_v31 = vld [vmem:[%s2324_s5 + $0x8] sm:$0xff] }
 0x19e   : > { %464 = vst.msk [vmem:[#allocation2 + $0x4] ss:$8 sm:$0x3] %vm1768_vm6, %v461_v5  ;;  %v668_v12 = vsel %vm356_vm1, %v663_v10, %v667_v62  ;;  %987 = vmatpush.msra.mxu3 %v919_v51  ;;  %v898_v62 = vld [vmem:[%s2324_s5 + $0x10] sm:$0xff]  ;;  %v913_v5 = vld [vmem:[%s2324_s5 + $0x88] sm:$0xff]  ;;  %v896_v10 = vld [vmem:[%s2324_s5] sm:$0xff] }
 0x19f   : > { %671 = vst.msk [vmem:[#allocation2 + $0x17] ss:$8 sm:$0x3] %vm1768_vm6, %v668_v12  ;;  %968 = vmatpush.msra.mxu2 %v902_v22  ;;  %v912_v12 = vld [vmem:[%s2324_s5 + $0x80] sm:$0xff] }
 0x1a0   : > { %988 = vmatpush.msra.mxu3 %v918_v53 }
 0x1a1   : > { %969 = vmatpush.msra.mxu2 %v901_v17 }
 0x1a2   : > { %v509_v4 = vpop.permute.xlu0 %508  ;;  %989 = vmatpush.msra.mxu3 %v917_v6 }
 0x1a3   : > { %v510_v37 = vrot.slane %v509_v4, 1  ;;  %v400_v13 = vpop.permute.xlu1 %399  ;;  %970 = vmatpush.msra.mxu2 %v900_v21 }
 0x1a4   : > { %v401_v49 = vrot.slane %v400_v13, 1  ;;  %990 = vmatpush.msra.mxu3 %v916_v48 }
 0x1a5   : > { %v512_v33 = vsel %vm511_vm4, %v509_v4, %v510_v37  ;;  %971 = vmatpush.msra.mxu2 %v899_v8  ;;  %v953_v4 = vld [vmem:[%s2321_s2] sm:$0xf]  ;;  %v1513_v37 = vmov 0   ;;  %vm2335_vm4 = vcmask 523264  }
 0x1a6   : > { %515 = vst.msk [vmem:[#allocation2 + $0x7] ss:$8 sm:$0x3] %vm1768_vm6, %v512_v33  ;;  %v403_v14 = vsel %vm402_vm5, %v400_v13, %v401_v49  ;;  %v840_v27 = vld [vmem:[#allocation2 + $0x10] sm:$0xff]  ;;  %v841_v52 = vld [vmem:[#allocation2 + $0x18] sm:$0xff]  ;;  %991 = vmatpush.msra.mxu3 %v915_v18  ;;  %1441 = vset.pattern.permute.xlu0 %v1513_v37 }
 0x1a7   : > { %406 = vst.msk [vmem:[#allocation2 + $0x2] ss:$8 sm:$0x3] %vm1768_vm6, %v403_v14  ;;  %870 = vmatpush.msra.mxu1 %v840_v27  ;;  %972 = vmatpush.msra.mxu2 %v898_v62 }
 0x1a8   : > { %992 = vmatpush.msra.mxu3 %v914_v3  ;;  %956 = vperm.xlu0 %1441, %v953_v4  }
 0x1a9   : > { %973 = vmatpush.msra.mxu2 %v897_v31 }
 0x1aa   : > { %993 = vmatpush.msra.mxu3 %v913_v5 }
 0x1ab   : > { %v467_v23 = vpop.permute.xlu1 %466  ;;  %974 = vmatpush.msra.mxu2 %v896_v10 }
 0x1ac   : > { %v473_v20 = vsel %vm472_vm13, %v467_v23, %v1894_v56  ;;  %v843_v56 = vld [vmem:[#allocation2 + $0x28] sm:$0xff]  ;;  %994 = vmatpush.msra.mxu3 %v912_v12  ;;  %vm1251_vm13 = vcmask 122880  }
 0x1ad   : > { %v477_v16 = vsel %vm332_vm9, %v473_v20, 0.0 }
 0x1ae   : > { %v482_v26 = vsel %vm356_vm1, %v477_v16, %v481_v34 }
 0x1af   : > { %485 = vst.msk [vmem:[#allocation2 + $0x5] ss:$8 sm:$0x3] %vm1768_vm6, %v482_v26  ;;  %vm1004_vm6 = vcmask 195584  }
 0x1b6   : > { %v838_v28 = vld [vmem:[#allocation2] sm:$0xff]  ;;  %v839_v11 = vld [vmem:[#allocation2 + $0x8] sm:$0xff] }
 0x1b7   : > { %871 = vmatpush.msra.mxu1 %v838_v28 }
 0x1b8   : > { %1357 = vmatmul.msk.f32.vlgmr.msra.gmra.mxu1 %vm846_vm2, %v837_v60 }
 0x1b9   : > { %1358 = vmatpush.msk.msrb.mxu1 %vm356_vm1, %v845_v47  ;;  %vm934_vm1 = vcmask 1039360  }
 0x1bb   : > { %889 = vmatpush.msrb.mxu1 %v843_v56 }
 0x1bd   : > { %890 = vmatpush.msrb.mxu1 %v841_v52  ;;  %v1221_v52 = vld [vmem:[%s2323_s4] sm:$0xff] }
 0x1bf   : > { %891 = vmatpush.msrb.mxu1 %v839_v11  ;;  %v1012_v11 = vand.u32 7, %v1721_v25 }
 0x1c0   : > { %1359 = vmatmul.msk.f32.vlgmr.msrb.gmra.mxu1 %vm846_vm2, %v837_v60  ;;  %vm1262_vm2 = vcmask 387330  }
 0x1c1   : > { %v2220_v36 = vadd.s32 1, %v1012_v11  ;;  %v2225_v32 = vadd.s32 4294967294, %v1012_v11  ;;  %v2234_v50 = vadd.s32 4294967295, %v1012_v11 }
 0x1c3   : > { %vm1046_vm7 = vcmp.lt.s32.totalorder %v2220_v36, 8  ;;  %vm1021_vm14 = vcmp.ge.s32.totalorder %v2225_v32, 0  ;;  %vm1032_vm10 = vcmp.ge.s32.totalorder %v2234_v50, 0  ;;  %v1202_v36 = vld [vmem:[#allocation4 + $0x10] sm:$0xff] }
 0x21a   : > { %v957_v23 = vpop.permute.xlu0 %956 }
 0x235   : > { %v2087_v42 = vpop.f32.mrf.mxu1 }
 0x23d   : > { %v2089_v30 = vpop.f32.mrf.mxu1 }
 0x23e   : > { %v1431_v35 = vpack.i.bf16 %v2089_v30, %v2087_v42 }
 0x240   : > { %1432 = vrot.lane.b32.xlu1 %v1431_v35, %s1512_s21 }
 0x2b2   : > { %v1433_v58 = vpop.permute.xlu1 %1432 }
 0x2b3   : > { %v1435_v9 = vunpack.i.h.bf16 %v1433_v58  ;;  %v1434_v29 = vunpack.i.l.bf16 %v1433_v58 }
 0x2b5   : > { %v938_v24 = vsel %vm934_vm1, %v1435_v9, 0.0  ;;  %v935_v59 = vsel %vm934_vm1, %v1434_v29, %v1435_v9  ;;  %vm1267_vm1 = vcmask 519555  }
 0x2b6   : > { %v940_v15 = vmax.f32 %v2089_v30, %v938_v24  ;;  %v939_v2 = vmax.f32 %v2087_v42, %v935_v59  ;;  %v2213_v42 = vadd.s32 2, %v1012_v11 }
 0x2b8   : > { %v1436_v61 = vpack.i.bf16 %v940_v15, %v939_v2  ;;  %vm1055_vm9 = vcmp.lt.s32.totalorder %v2213_v42, 8  ;;  %v1207_v42 = vld [vmem:[#allocation4 + $0x38] sm:$0xff] }
 0x2b9   : > { %1238 = vmatpush.msra.mxu1 %v1207_v42 }
 0x2ba   : > { %1437 = vrot.lane.b32.xlu2 %v1436_v61, %s1511_s18 }
 0x314   : > { %v1438_v13 = vpop.permute.xlu2 %1437 }
 0x315   : > { %v1440_v49 = vunpack.i.h.bf16 %v1438_v13  ;;  %v1439_v33 = vunpack.i.l.bf16 %v1438_v13 }
 0x317   : > { %v947_v54 = vsel %vm402_vm5, %v1439_v33, %v1440_v49  ;;  %v950_v14 = vsel %vm402_vm5, %v1440_v49, 0.0  ;;  %vm1257_vm5 = vcmask 255105  }
 0x318   : > { %v951_v27 = vmax.f32 %v939_v2, %v947_v54  ;;  %v952_v19 = vmax.f32 %v940_v15, %v950_v14 }
 0x31a   : > { %975 = vmatmul.f32.vlgmr.msra.gmra.mxu2 %v951_v27  ;;  %995 = vmatmul.f32.vlgmr.msra.gmra.mxu3 %v952_v19 }
 0x39d   : > { %v976_v34 = vpop.f32.mrf.mxu2  ;;  %v996_v16 = vpop.f32.mrf.mxu3 }
 0x39e   : > { %v977_v20 = vadd.f32 %v976_v34, %v957_v23 }
 0x3a0   : > { %v997_v26 = vadd.f32 %v996_v16, %v977_v20 }
 0x3a2   : > { %v999_v60 = vmax.f32 %v997_v26, 0.0 }
 0x3a4   : > { %1001 = vrot.lane.b32.xlu1 %v999_v60, %s1514_s15  ;;  %s1528_s15 = smov 120  }
 0x416   : > { %v1002_v28 = vpop.permute.xlu1 %1001 }
 0x417   : > { %v1005_v47 = vsel %vm1004_vm6, 0.0, %v1002_v28  ;;  %vm1272_vm6 = vcmask 651780  }
 0x418   : > { %v1007_v56 = vsel %vm1006_vm8, %v1005_v47, 0.0  ;;  %vm1277_vm8 = vcmask 784005  }
 0x419   : > { %1134 = vrot.lane.b32.xlu0 %v1007_v56, %s1515_s20  ;;  %1148 = vrot.lane.b32.xlu1 %v1007_v56, %s1516_s14 }
 0x41a   : > { %1153 = vrot.lane.b32.xlu2 %v1007_v56, %s1517_s16  ;;  %s2301_s16 = scalar_lea.vmem %s2326_s7, %s2340_s28 }
 0x421   : > { %1129 = vrot.lane.b32.xlu0 %v1007_v56, %s1498_s26  ;;  %1139 = vrot.lane.b32.xlu1 %v1007_v56, %s1518_s23  ;;  %s1523_s26 = smov 103   ;;  %s2336_s23 = smov 48  }
 0x422   : > { %1144 = vrot.lane.b32.xlu2 %v1007_v56, %s1519_s25  ;;  %s1530_s25 = smov 32  }
 0x429   : > { %1105 = vrot.lane.b32.xlu0 %v1007_v56, %s1520_s27  ;;  %1115 = vrot.lane.b32.xlu1 %v1007_v56, %s1507_s13  ;;  %s1525_s13 = smov 119   ;;  %s1531_s27 = smov 16  }
 0x42a   : > { %1124 = vrot.lane.b32.xlu2 %v1007_v56, %s1495_s22  ;;  %s1526_s22 = smov 118  }
 0x431   : > { %1096 = vrot.lane.b32.xlu0 %v1007_v56, %s1521_s29  ;;  %1110 = vrot.lane.b32.xlu1 %v1007_v56, %s1506_s12  ;;  %s1527_s12 = smov 121   ;;  %s2337_s29 = smov 80  }
 0x432   : > { %1120 = vrot.lane.b32.xlu2 %v1007_v56, %s1510_s17 }
 0x439   : > { %1076 = vrot.lane.b32.xlu0 %v1007_v56, %s1505_s11  ;;  %1086 = vrot.lane.b32.xlu1 %v1007_v56, %s1522_s30  ;;  %s2338_s30 = smov 64  }
 0x43a   : > { %1100 = vrot.lane.b32.xlu2 %v1007_v56, %s1523_s26 }
 0x441   : > { %1072 = vrot.lane.b32.xlu0 %v1007_v56, %s1511_s18  ;;  %1081 = vrot.lane.b32.xlu1 %v1007_v56, %s1504_s10  ;;  %s1529_s10 = smov 122  }
 0x442   : > { %1091 = vrot.lane.b32.xlu2 %v1007_v56, %s1524_s19 }
 0x449   : > { %1048 = vrot.lane.b32.xlu0 %v1007_v56, %s1525_s13  ;;  %1057 = vrot.lane.b32.xlu1 %v1007_v56, %s1526_s22 }
 0x44a   : > { %1067 = vrot.lane.b32.xlu2 %v1007_v56, %s1503_s9 }
 0x451   : > { %1035 = vrot.lane.b32.xlu0 %v1007_v56, %s1527_s12  ;;  %1040 = vrot.lane.b32.xlu1 %v1007_v56, %s1528_s15 }
 0x452   : > { %1062 = vrot.lane.b32.xlu2 %v1007_v56, %s1502_s8 }
 0x459   : > { %1224 = vperm.xlu0 %1441, %v1221_v52   ;;  %v1158_v52 = vld [vmem:[%s2322_s3] sm:$0xff] }
 0x45a   : > { %1025 = vrot.lane.b32.xlu2 %v1007_v56, %s1529_s10 }
 0x474   : > { %v1154_v30 = vpop.permute.xlu2 %1153 }
 0x475   : > { %v1156_v35 = vsel %vm1055_vm9, %v1154_v30, 0.0  ;;  %v1206_v30 = vld [vmem:[#allocation4 + $0x30] sm:$0xff] }
 0x476   : > { %1157 = vst.msk [vmem:[#allocation3 + $0x60] sm:$0xf] %vm1029_vm3, %v1156_v35  ;;  %v1205_v35 = vld [vmem:[#allocation4 + $0x28] sm:$0xff]  ;;  %1239 = vmatpush.msra.mxu1 %v1206_v30 }
 0x478   : > { %1240 = vmatpush.msra.mxu1 %v1205_v35 }
 0x47c   : > { %v1145_v39 = vpop.permute.xlu2 %1144 }
 0x47d   : > { %1147 = vst.msk [vmem:[#allocation3 + $0x58] sm:$0xf] %vm1029_vm3, %v1145_v39  ;;  %v1171_v57 = vld [vmem:[#allocation3 + $0x60] sm:$0xf]  ;;  %v1204_v39 = vld [vmem:[#allocation4 + $0x20] sm:$0xff] }
 0x47e   : > { %1360 = vmatpush.msk.msra.mxu0 %vm1176_vm15, %v1171_v57  ;;  %v1203_v57 = vld [vmem:[#allocation4 + $0x18] sm:$0xff]  ;;  %1241 = vmatpush.msra.mxu1 %v1204_v39 }
 0x480   : > { %1242 = vmatpush.msra.mxu1 %v1203_v57 }
 0x482   : > { %1243 = vmatpush.msra.mxu1 %v1202_v36 }
 0x484   : > { %v1125_v25 = vpop.permute.xlu2 %1124 }
 0x485   : > { %v1127_v38 = vsel %vm1046_vm7, %v1125_v25, 0.0 }
 0x486   : > { %1128 = vst.msk [vmem:[#allocation3 + $0x48] sm:$0xf] %vm1029_vm3, %v1127_v38 }
 0x48b   : > { %v1135_v55 = vpop.permute.xlu0 %1134  ;;  %v1149_v41 = vpop.permute.xlu1 %1148 }
 0x48c   : > { %v1137_v7 = vsel %vm1021_vm14, %v1135_v55, 0.0  ;;  %v1151_v63 = vsel %vm1046_vm7, %v1149_v41, 0.0  ;;  %v1121_v40 = vpop.permute.xlu2 %1120  ;;  %v1201_v55 = vld [vmem:[#allocation4 + $0x8] sm:$0xff]  ;;  %v1200_v41 = vld [vmem:[#allocation4] sm:$0xff] }
 0x48d   : > { %1138 = vst.msk [vmem:[#allocation3 + $0x50] sm:$0xf] %vm1029_vm3, %v1137_v7  ;;  %1244 = vmatpush.msra.mxu1 %v1201_v55 }
 0x48e   : > { %1152 = vst.msk [vmem:[#allocation3 + $0x5c] sm:$0xf] %vm1029_vm3, %v1151_v63 }
 0x48f   : > { %1123 = vst.msk [vmem:[#allocation3 + $0x44] sm:$0xf] %vm1029_vm3, %v1121_v40  ;;  %1245 = vmatpush.msra.mxu1 %v1200_v41 }
 0x493   : > { %v1130_v0 = vpop.permute.xlu0 %1129  ;;  %v1140_v1 = vpop.permute.xlu1 %1139 }
 0x494   : > { %v1132_v43 = vsel %vm1055_vm9, %v1130_v0, 0.0  ;;  %v1142_v44 = vsel %vm1032_vm10, %v1140_v1, 0.0  ;;  %v1101_v45 = vpop.permute.xlu2 %1100 }
 0x495   : > { %1133 = vst.msk [vmem:[#allocation3 + $0x4c] sm:$0xf] %vm1029_vm3, %v1132_v43  ;;  %v1103_v46 = vsel %vm1046_vm7, %v1101_v45, 0.0  ;;  %v1170_v51 = vld [vmem:[#allocation3 + $0x58] sm:$0xff] }
 0x496   : > { %1143 = vst.msk [vmem:[#allocation3 + $0x54] sm:$0xf] %vm1029_vm3, %v1142_v44  ;;  %1184 = vmatpush.msra.mxu0 %v1170_v51 }
 0x497   : > { %1104 = vst.msk [vmem:[#allocation3 + $0x34] sm:$0xf] %vm1029_vm3, %v1103_v46 }
 0x49b   : > { %v1106_v22 = vpop.permute.xlu0 %1105  ;;  %v1116_v53 = vpop.permute.xlu1 %1115 }
 0x49c   : > { %v1108_v17 = vsel %vm1055_vm9, %v1106_v22, 0.0  ;;  %v1118_v6 = vsel %vm1032_vm10, %v1116_v53, 0.0  ;;  %v1092_v21 = vpop.permute.xlu2 %1091  ;;  %v1168_v18 = vld [vmem:[#allocation3 + $0x48] sm:$0xff] }
 0x49d   : > { %1109 = vst.msk [vmem:[#allocation3 + $0x38] sm:$0xf] %vm1029_vm3, %v1108_v17  ;;  %v1094_v48 = vsel %vm1032_vm10, %v1092_v21, 0.0  ;;  %v1169_v8 = vld [vmem:[#allocation3 + $0x50] sm:$0xff] }
 0x49e   : > { %1119 = vst.msk [vmem:[#allocation3 + $0x40] sm:$0xf] %vm1029_vm3, %v1118_v6  ;;  %1185 = vmatpush.msra.mxu0 %v1169_v8 }
 0x49f   : > { %1095 = vst.msk [vmem:[#allocation3 + $0x2c] sm:$0xf] %vm1029_vm3, %v1094_v48 }
 0x4a0   : > { %1186 = vmatpush.msra.mxu0 %v1168_v18 }
 0x4a3   : > { %v1097_v58 = vpop.permute.xlu0 %1096  ;;  %v1111_v9 = vpop.permute.xlu1 %1110 }
 0x4a4   : > { %1099 = vst.msk [vmem:[#allocation3 + $0x30] sm:$0xf] %vm1029_vm3, %v1097_v58  ;;  %v1113_v29 = vsel %vm1021_vm14, %v1111_v9, 0.0  ;;  %v1068_v24 = vpop.permute.xlu2 %1067 }
 0x4a5   : > { %1114 = vst.msk [vmem:[#allocation3 + $0x3c] sm:$0xf] %vm1029_vm3, %v1113_v29  ;;  %v1070_v59 = vsel %vm1032_vm10, %v1068_v24, 0.0  ;;  %v1167_v15 = vld [vmem:[#allocation3 + $0x40] sm:$0xff] }
 0x4a6   : > { %1071 = vst.msk [vmem:[#allocation3 + $0x18] sm:$0xf] %vm1029_vm3, %v1070_v59  ;;  %1187 = vmatpush.msra.mxu0 %v1167_v15 }
 0x4ab   : > { %v1077_v2 = vpop.permute.xlu0 %1076  ;;  %v1087_v61 = vpop.permute.xlu1 %1086  ;;  %v1165_v12 = vld [vmem:[#allocation3 + $0x30] sm:$0xff] }
 0x4ac   : > { %v1079_v62 = vsel %vm1046_vm7, %v1077_v2, 0.0  ;;  %v1089_v3 = vsel %vm1021_vm14, %v1087_v61, 0.0  ;;  %v1063_v31 = vpop.permute.xlu2 %1062  ;;  %v1166_v5 = vld [vmem:[#allocation3 + $0x38] sm:$0xff] }
 0x4ad   : > { %1080 = vst.msk [vmem:[#allocation3 + $0x20] sm:$0xf] %vm1029_vm3, %v1079_v62  ;;  %v1065_v10 = vsel %vm1021_vm14, %v1063_v31, 0.0  ;;  %1188 = vmatpush.msra.mxu0 %v1166_v5 }
 0x4ae   : > { %1090 = vst.msk [vmem:[#allocation3 + $0x28] sm:$0xf] %vm1029_vm3, %v1089_v3 }
 0x4af   : > { %1066 = vst.msk [vmem:[#allocation3 + $0x14] sm:$0xf] %vm1029_vm3, %v1065_v10  ;;  %1189 = vmatpush.msra.mxu0 %v1165_v12 }
 0x4b3   : > { %v1073_v4 = vpop.permute.xlu0 %1072  ;;  %v1082_v37 = vpop.permute.xlu1 %1081 }
 0x4b4   : > { %1075 = vst.msk [vmem:[#allocation3 + $0x1c] sm:$0xf] %vm1029_vm3, %v1073_v4  ;;  %v1084_v13 = vsel %vm1055_vm9, %v1082_v37, 0.0  ;;  %v1026_v49 = vpop.permute.xlu2 %1025 }
 0x4b5   : > { %1085 = vst.msk [vmem:[#allocation3 + $0x24] sm:$0xf] %vm1029_vm3, %v1084_v13  ;;  %v1028_v33 = vsel %vm1021_vm14, %v1026_v49, 0.0  ;;  %v1164_v54 = vld [vmem:[#allocation3 + $0x28] sm:$0xff] }
 0x4b6   : > { %1030 = vst.msk [vmem:[#allocation3] sm:$0xf] %vm1029_vm3, %v1028_v33  ;;  %1190 = vmatpush.msra.mxu0 %v1164_v54 }
 0x4bb   : > { %v1049_v14 = vpop.permute.xlu0 %1048  ;;  %v1058_v27 = vpop.permute.xlu1 %1057  ;;  %v1162_v20 = vld [vmem:[#allocation3 + $0x18] sm:$0xff] }
 0x4bc   : > { %v1051_v19 = vsel %vm1046_vm7, %v1049_v14, 0.0  ;;  %v1060_v23 = vsel %vm1055_vm9, %v1058_v27, 0.0  ;;  %v1163_v34 = vld [vmem:[#allocation3 + $0x20] sm:$0xff]  ;;  %vm1282_vm9 = vcmask 916230  }
 0x4bd   : > { %1052 = vst.msk [vmem:[#allocation3 + $0xc] sm:$0xf] %vm1029_vm3, %v1051_v19  ;;  %1191 = vmatpush.msra.mxu0 %v1163_v34 }
 0x4be   : > { %1061 = vst.msk [vmem:[#allocation3 + $0x10] sm:$0xf] %vm1029_vm3, %v1060_v23 }
 0x4bf   : > { %1192 = vmatpush.msra.mxu0 %v1162_v20 }
 0x4c3   : > { %v1036_v16 = vpop.permute.xlu0 %1035  ;;  %v1041_v26 = vpop.permute.xlu1 %1040 }
 0x4c4   : > { %v1038_v60 = vsel %vm1032_vm10, %v1036_v16, 0.0  ;;  %1043 = vst.msk [vmem:[#allocation3 + $0x8] sm:$0xf] %vm1029_vm3, %v1041_v26 }
 0x4c5   : > { %1039 = vst.msk [vmem:[#allocation3 + $0x4] sm:$0xf] %vm1029_vm3, %v1038_v60  ;;  %v1161_v28 = vld [vmem:[#allocation3 + $0x10] sm:$0xff]  ;;  %vm1287_vm3 = vcmask 1048455  }
 0x4c6   : > { %1193 = vmatpush.msra.mxu0 %v1161_v28 }
 0x4cb   : > { %v1160_v47 = vld [vmem:[#allocation3 + $0x8] sm:$0xff]  ;;  %v1225_v50 = vpop.permute.xlu0 %1224 }
 0x4cc   : > { %1194 = vmatpush.msra.mxu0 %v1160_v47  ;;  %v1159_v56 = vld [vmem:[#allocation3] sm:$0xff] }
 0x4ce   : > { %1195 = vmatpush.msra.mxu0 %v1159_v56 }
 0x4cf   : > { %1361 = vmatmul.msk.f32.vlgmr.msra.gmra.mxu0 %vm1172_vm0, %v1158_v52 }
 0x54c   : > { %v1197_v11 = vpop.f32.mrf.mxu0 }
 0x54d   : > { %1209 = vrot.lane.b32.xlu1 %v1197_v11, %s1512_s21 }
 0x5bf   : > { %v1210_v25 = vpop.permute.xlu1 %1209 }
 0x5c0   : > { %v1212_v38 = vsel %vm2334_vm11, %v1210_v25, 0.0 }
 0x5c1   : > { %v1213_v32 = vmax.f32 %v1197_v11, %v1212_v38 }
 0x5c3   : > { %1215 = vrot.lane.b32.xlu2 %v1213_v32, %s1528_s15 }
 0x61d   : > { %v1216_v7 = vpop.permute.xlu2 %1215 }
 0x61e   : > { %v1219_v63 = vsel %vm1218_vm12, %v1216_v7, 0.0 }
 0x61f   : > { %v1220_v40 = vmax.f32 %v1213_v32, %v1219_v63 }
 0x621   : > { %1362 = vmatmul.msk.f32.vlgmr.msra.gmra.mxu1 %vm2335_vm4, %v1220_v40 }
 0x69e   : > { %v1247_v0 = vpop.f32.mrf.mxu1 }
 0x69f   : > { %v1248_v1 = vadd.f32 %v1247_v0, %v1225_v50 }
 0x6a1   : > { %v1250_v43 = vmax.f32 %v1248_v1, 0.0 }
 0x6a3   : > { %1264 = vrot.lane.b32.xlu0 %v1250_v43, %s2336_s23  ;;  %1259 = vrot.lane.b32.xlu2 %v1250_v43, %s1530_s25  ;;  %1252 = vst.msk [vmem:[%s2301_s16] sm:$0x1] %vm1251_vm13, %v1250_v43 }
 0x6a4   : > { %1254 = vrot.lane.b32.xlu1 %v1250_v43, %s1531_s27 }
 0x6ab   : > { %1279 = vrot.lane.b32.xlu0 %v1250_v43, %s1510_s17  ;;  %1274 = vrot.lane.b32.xlu2 %v1250_v43, %s2337_s29 }
 0x6ac   : > { %1269 = vrot.lane.b32.xlu1 %v1250_v43, %s2338_s30 }
 0x6b4   : > { %1284 = vrot.lane.b32.xlu1 %v1250_v43, %s1511_s18 }
 0x6fd   : > { %v1260_v44 = vpop.permute.xlu2 %1259 }
 0x705   : > { %v1275_v22 = vpop.permute.xlu2 %1274 }
 0x715   : > { %v1265_v45 = vpop.permute.xlu0 %1264 }
 0x716   : > { %v1255_v46 = vpop.permute.xlu1 %1254 }
 0x717   : > { %1258 = vst.msk [vmem:[%s2301_s16 - $0x1] sm:$0x2] %vm1257_vm5, %v1255_v46 }
 0x718   : > { %1263 = vst.msk [vmem:[%s2301_s16 - $0x2] sm:$0x4] %vm1262_vm2, %v1260_v44 }
 0x719   : > { %1268 = vst.msk [vmem:[%s2301_s16 - $0x3] sm:$0x8] %vm1267_vm1, %v1265_v45 }
 0x71d   : > { %v1280_v53 = vpop.permute.xlu0 %1279 }
 0x71e   : > { %v1270_v51 = vpop.permute.xlu1 %1269 }
 0x71f   : > { %1273 = vst.msk [vmem:[%s2301_s16 - $0x4] sm:$0x10] %vm1272_vm6, %v1270_v51 }
 0x720   : > { %1278 = vst.msk [vmem:[%s2301_s16 - $0x5] sm:$0x20] %vm1277_vm8, %v1275_v22 }
 0x721   : > { %1283 = vst.msk [vmem:[%s2301_s16 - $0x6] sm:$0x40] %vm1282_vm9, %v1280_v53 }
 0x726   : > { %v1285_v17 = vpop.permute.xlu1 %1284 }
 0x727   : > { %1288 = vst.msk [vmem:[%s2301_s16 - $0x7] sm:$0x80] %vm1287_vm3, %v1285_v17 }
 0x728 PF: > { %s18_s24 = sadd.s32 1, %s1482_s24  }
 0x729   : > { %p15_p7 = scmp.ge.s32.totalorder %s18_s24, 4  }
 0x72b   :  { %17 = sbr.rel (!%p15_p7) target bundleno = 1 (0x1), region = 107 }
 0x730   :  { %1306 = vsyncpa [#allocation5], 1 }
 0x731   :  { %1308 = vsyncpa [#allocation5 + $0x1], 1 }

</bundles_post_ra>
